<compile_context>
chip_gen: v7x
topology: tpu7x:2x2x1
jax: 0.10.0
libtpu: 0.0.40
codegen_flags: <defaults>
</compile_context>

<pallas_src>
import functools

import jax
import jax.numpy as jnp
import numpy as np
from jax.experimental import pallas as pl
from jax.experimental.pallas import tpu as pltpu


# ----------------------------- config (small) -----------------------------
BATCH = 2
SEQ = 16
HIDDEN = 64
INTERMEDIATE = 128
NUM_HEADS = 4
HEAD_DIM = HIDDEN // NUM_HEADS
NUM_LAYERS = 2
LN_EPS = 1e-6


# ----------------------------- Pallas kernel ------------------------------
def _layernorm(x, g, b, eps):
    # One-pass mean / variance (single pair of cross-lane reduces).
    mu = jnp.mean(x, axis=-1, keepdims=True)
    ms = jnp.mean(x * x, axis=-1, keepdims=True)
    var = jnp.maximum(ms - mu * mu, 0.0)
    return (x - mu) * jax.lax.rsqrt(var + eps) * g + b


def _encoder_kernel(
    x_ref, wqkv_ref, bqkv_ref, wo_ref, w1_ref, b1_ref, w2_ref, vec_ref,
    o_ref,
    *, num_layers, batch, seq, num_heads, head_dim, hidden, eps,
):
    x = x_ref[...].astype(jnp.float32)                   # (B*S, D) residual stream
    scale = head_dim ** -0.5
    head_slices = [slice(h * head_dim, (h + 1) * head_dim) for h in range(num_heads)]

    # All per-layer weights are tiny and fully VMEM resident -> static unroll.
    for l in range(num_layers):
        vec = vec_ref[l]                                 # (6, D) packed small params
        ln1_g, ln1_b = vec[0:1, :], vec[1:2, :]
        bo = vec[2:3, :]
        ln2_g, ln2_b = vec[3:4, :], vec[4:5, :]
        b2 = vec[5:6, :]

        # ---- LayerNorm 1 ----
        h = _layernorm(x, ln1_g, ln1_b, eps)

        # ---- fused QKV projection: one (B*S, D) @ (D, 3D) MXU push ----
        qkv = jnp.dot(h, wqkv_ref[l], preferred_element_type=jnp.float32) + bqkv_ref[l]
        q = qkv[:, :hidden] * scale                      # fold 1/sqrt(hd) into q once
        k = qkv[:, hidden:2 * hidden]
        v = qkv[:, 2 * hidden:]

        q3 = q.reshape(batch, seq, hidden)               # leading-dim split only
        k3 = k.reshape(batch, seq, hidden)
        v3 = v.reshape(batch, seq, hidden)

        # Fold heads into a leading z = H*B axis via leading-dim concat of lane
        # slices -> scores / softmax / context each happen exactly ONCE.
        qz = jnp.concatenate([q3[:, :, hs] for hs in head_slices], axis=0)  # (H*B,S,hd)
        kz = jnp.concatenate([k3[:, :, hs] for hs in head_slices], axis=0)
        vz = jnp.concatenate([v3[:, :, hs] for hs in head_slices], axis=0)

        s = jnp.einsum("zqd,zkd->zqk", qz, kz, preferred_element_type=jnp.float32)
        s = s - jnp.max(s, axis=-1, keepdims=True)
        p = jnp.exp(s)
        p = p * pl.reciprocal(jnp.sum(p, axis=-1, keepdims=True), approx=False)
        # attention_dropout = 0.0 -> no-op
        ctx = jnp.einsum("zqk,zkd->zqd", p, vz, preferred_element_type=jnp.float32)

        # ---- out_proj: per-head sublane row-slice of W_o, accumulated ----
        wo_full = wo_ref[l]                              # (D, D)
        attn = bo
        for hh, hs in enumerate(head_slices):
            ctx_h = ctx[hh * batch:(hh + 1) * batch].reshape(batch * seq, head_dim)
            attn = attn + jnp.dot(ctx_h, wo_full[hs, :],
                                  preferred_element_type=jnp.float32)

        x = x + attn                                     # residual 1

        # ---- LayerNorm 2 + MLP ----
        h2 = _layernorm(x, ln2_g, ln2_b, eps)
        m = jnp.dot(h2, w1_ref[l], preferred_element_type=jnp.float32) + b1_ref[l]
        m = jax.nn.gelu(m, approximate=True)             # torch gelu(approximate='tanh')
        m = jnp.dot(m, w2_ref[l], preferred_element_type=jnp.float32) + b2
        x = x + m                                        # residual 2

    o_ref[...] = x.astype(o_ref.dtype)


# ------------------------------- wrapper -----------------------------------
def siglip_encoder(x, layer_params):
    """SiglipEncoder.forward: all layers fused in one pallas_call. x: (B, S, D)."""
    B, S, D = x.shape
    L = len(layer_params)
    I = layer_params[0]["w1"].shape[-1]
    x2 = x.reshape(B * S, D)

    # Fused / packed parameter slabs (one DMA each; no grid).
    wqkv = jnp.stack([jnp.concatenate([p["wq"], p["wk"], p["wv"]], axis=1)
                      for p in layer_params])                       # (L, D, 3D)
    bqkv = jnp.stack([jnp.concatenate([p["bq"], p["bk"], p["bv"]], axis=1)
                      for p in layer_params])                       # (L, 1, 3D)
    wo = jnp.stack([p["wo"] for p in layer_params])                 # (L, D, D)
    w1 = jnp.stack([p["w1"] for p in layer_params])                 # (L, D, I)
    b1 = jnp.stack([p["b1"] for p in layer_params])                 # (L, 1, I)
    w2 = jnp.stack([p["w2"] for p in layer_params])                 # (L, I, D)
    vec = jnp.stack([jnp.concatenate([p["ln1_g"], p["ln1_b"], p["bo"],
                                      p["ln2_g"], p["ln2_b"], p["b2"]], axis=0)
                     for p in layer_params])                        # (L, 6, D)
    operands = (x2, wqkv, bqkv, wo, w1, b1, w2, vec)

    kernel = functools.partial(
        _encoder_kernel,
        num_layers=L, batch=B, seq=S,
        num_heads=NUM_HEADS, head_dim=HEAD_DIM, hidden=D, eps=LN_EPS,
    )

    flops = L * (
        2 * B * S * D * (3 * D)                          # fused qkv projection
        + 2 * 2 * B * NUM_HEADS * S * S * HEAD_DIM       # scores + context
        + 2 * B * S * D * D                              # out projection
        + 2 * 2 * B * S * D * I                          # fc1 + fc2
    )
    transcendentals = L * (B * NUM_HEADS * S * S + B * S * I + 2 * B * S)
    bytes_accessed = int(2 * x2.size * x2.dtype.itemsize
                         + sum(a.size * a.dtype.itemsize for a in operands[1:]))
    cost = pl.CostEstimate(flops=flops, transcendentals=transcendentals,
                           bytes_accessed=bytes_accessed)

    vmem_spec = pl.BlockSpec(memory_space=pltpu.MemorySpace.VMEM)
    out2 = pl.pallas_call(
        kernel,
        out_shape=jax.ShapeDtypeStruct((B * S, D), x.dtype),
        in_specs=[vmem_spec] * len(operands),
        out_specs=vmem_spec,
        cost_estimate=cost,
    )(*operands)

    return out2.reshape(B, S, D)


# ------------------------- deterministic parameters ------------------------
def init_params(key):
    layer_params = []
    for _ in range(NUM_LAYERS):
        keys = jax.random.split(key, 9)
        key = keys[0]
        p = {
            "ln1_g": jnp.ones((1, HIDDEN), jnp.float32),
            "ln1_b": jnp.zeros((1, HIDDEN), jnp.float32),
            "wq": 0.05 * jax.random.normal(keys[1], (HIDDEN, HIDDEN), jnp.float32),
            "bq": 0.01 * jax.random.normal(keys[2], (1, HIDDEN), jnp.float32),
            "wk": 0.05 * jax.random.normal(keys[3], (HIDDEN, HIDDEN), jnp.float32),
            "bk": jnp.zeros((1, HIDDEN), jnp.float32),
            "wv": 0.05 * jax.random.normal(keys[4], (HIDDEN, HIDDEN), jnp.float32),
            "bv": jnp.zeros((1, HIDDEN), jnp.float32),
            "wo": 0.05 * jax.random.normal(keys[5], (HIDDEN, HIDDEN), jnp.float32),
            "bo": 0.01 * jax.random.normal(keys[6], (1, HIDDEN), jnp.float32),
            "ln2_g": jnp.ones((1, HIDDEN), jnp.float32),
            "ln2_b": jnp.zeros((1, HIDDEN), jnp.float32),
            "w1": 0.05 * jax.random.normal(keys[7], (HIDDEN, INTERMEDIATE), jnp.float32),
            "b1": jnp.zeros((1, INTERMEDIATE), jnp.float32),
            "w2": 0.05 * jax.random.normal(keys[8], (INTERMEDIATE, HIDDEN), jnp.float32),
            "b2": jnp.zeros((1, HIDDEN), jnp.float32),
        }
        layer_params.append(p)
    return layer_params


# ----------------------------- pure-JAX reference ---------------------------
def _layernorm_ref(x, g, b):
    mu = jnp.mean(x, axis=-1, keepdims=True)
    var = jnp.mean(jnp.square(x - mu), axis=-1, keepdims=True)
    return (x - mu) / jnp.sqrt(var + LN_EPS) * g + b


def encoder_ref(x, layer_params):
    h = x
    for p in layer_params:
        resid = h
        y = _layernorm_ref(h, p["ln1_g"], p["ln1_b"])
        q = y @ p["wq"] + p["bq"]
        k = y @ p["wk"] + p["bk"]
        v = y @ p["wv"] + p["bv"]
        B, S, D = y.shape
        q = q.reshape(B, S, NUM_HEADS, HEAD_DIM).transpose(0, 2, 1, 3)
        k = k.reshape(B, S, NUM_HEADS, HEAD_DIM).transpose(0, 2, 1, 3)
        v = v.reshape(B, S, NUM_HEADS, HEAD_DIM).transpose(0, 2, 1, 3)
        scores = jnp.einsum("bhqd,bhkd->bhqk", q, k) * (HEAD_DIM ** -0.5)
        attn = jax.nn.softmax(scores, axis=-1)
        out = jnp.einsum("bhqk,bhkd->bhqd", attn, v)
        out = out.transpose(0, 2, 1, 3).reshape(B, S, D)
        out = out @ p["wo"] + p["bo"]
        h = resid + out
        resid = h
        y = _layernorm_ref(h, p["ln2_g"], p["ln2_b"])
        m = jax.nn.gelu(y @ p["w1"] + p["b1"], approximate=True)
        m = m @ p["w2"] + p["b2"]
        h = resid + m
    return h


# ----------------------------------- main -----------------------------------
if __name__ == "__main__":
    key = jax.random.PRNGKey(0)
    k_in, k_par = jax.random.split(key)
    x = jax.random.normal(k_in, (BATCH, SEQ, HIDDEN), jnp.float32)
    layer_params = init_params(k_par)

    out = siglip_encoder(x, layer_params)
    out = jax.block_until_ready(out)

    ref = encoder_ref(x, layer_params)
    np.testing.assert_allclose(np.asarray(out), np.asarray(ref), rtol=2e-3, atol=2e-3)

    print("KERNEL_OK")
</pallas_src>

<mosaic_0001>
module attributes {stable_mosaic.version = 11 : i64} {
  func.func @_encoder_kernel(%arg0: memref<32x64xf32, #tpu.memory_space<vmem>>, %arg1: memref<2x64x192xf32, #tpu.memory_space<vmem>>, %arg2: memref<2x1x192xf32, #tpu.memory_space<vmem>>, %arg3: memref<2x64x64xf32, #tpu.memory_space<vmem>>, %arg4: memref<2x64x128xf32, #tpu.memory_space<vmem>>, %arg5: memref<2x1x128xf32, #tpu.memory_space<vmem>>, %arg6: memref<2x128x64xf32, #tpu.memory_space<vmem>>, %arg7: memref<2x6x64xf32, #tpu.memory_space<vmem>>, %arg8: memref<32x64xf32, #tpu.memory_space<vmem>>) attributes {dimension_semantics = [], scalar_prefetch = 0 : i64, scratch_operands = 0 : i64, tpu.core_type = #tpu.core_type<tc>} {
    %c0 = arith.constant 0 : index
    %c0_0 = arith.constant 0 : index
    %0 = vector.load %arg0[%c0, %c0_0] : memref<32x64xf32, #tpu.memory_space<vmem>>, vector<32x64xf32>
    %c0_1 = arith.constant 0 : index
    %c0_2 = arith.constant 0 : index
    %c0_3 = arith.constant 0 : index
    %1 = vector.load %arg7[%c0_1, %c0_2, %c0_3] : memref<2x6x64xf32, #tpu.memory_space<vmem>>, vector<1x6x64xf32>
    %2 = vector.shape_cast %1 : vector<1x6x64xf32> to vector<6x64xf32>
    %3 = vector.extract_strided_slice %2 {offsets = [0, 0], sizes = [1, 64], strides = [1, 1]} : vector<6x64xf32> to vector<1x64xf32>
    %4 = vector.extract_strided_slice %2 {offsets = [1, 0], sizes = [1, 64], strides = [1, 1]} : vector<6x64xf32> to vector<1x64xf32>
    %5 = vector.extract_strided_slice %2 {offsets = [2, 0], sizes = [1, 64], strides = [1, 1]} : vector<6x64xf32> to vector<1x64xf32>
    %6 = vector.extract_strided_slice %2 {offsets = [3, 0], sizes = [1, 64], strides = [1, 1]} : vector<6x64xf32> to vector<1x64xf32>
    %7 = vector.extract_strided_slice %2 {offsets = [4, 0], sizes = [1, 64], strides = [1, 1]} : vector<6x64xf32> to vector<1x64xf32>
    %8 = vector.extract_strided_slice %2 {offsets = [5, 0], sizes = [1, 64], strides = [1, 1]} : vector<6x64xf32> to vector<1x64xf32>
    %cst = arith.constant dense<0.000000e+00> : vector<32xf32>
    %9 = vector.multi_reduction <add>, %0, %cst [1] : vector<32x64xf32> to vector<32xf32>
    %10 = vector.shape_cast %9 : vector<32xf32> to vector<32x1xf32>
    %cst_4 = arith.constant 6.400000e+01 : f32
    %11 = vector.broadcast %cst_4 : f32 to vector<32x1xf32>
    %12 = arith.divf %10, %11 : vector<32x1xf32>
    %13 = arith.mulf %0, %0 : vector<32x64xf32>
    %cst_5 = arith.constant dense<0.000000e+00> : vector<32xf32>
    %14 = vector.multi_reduction <add>, %13, %cst_5 [1] : vector<32x64xf32> to vector<32xf32>
    %15 = vector.shape_cast %14 : vector<32xf32> to vector<32x1xf32>
    %cst_6 = arith.constant 6.400000e+01 : f32
    %16 = vector.broadcast %cst_6 : f32 to vector<32x1xf32>
    %17 = arith.divf %15, %16 : vector<32x1xf32>
    %18 = arith.mulf %12, %12 : vector<32x1xf32>
    %19 = arith.subf %17, %18 : vector<32x1xf32>
    %cst_7 = arith.constant 0.000000e+00 : f32
    %20 = vector.broadcast %cst_7 : f32 to vector<32x1xf32>
    %21 = arith.maximumf %19, %20 : vector<32x1xf32>
    %22 = vector.broadcast %12 : vector<32x1xf32> to vector<32x64xf32>
    %23 = arith.subf %0, %22 : vector<32x64xf32>
    %cst_8 = arith.constant 9.99999997E-7 : f32
    %24 = vector.broadcast %cst_8 : f32 to vector<32x1xf32>
    %25 = arith.addf %21, %24 : vector<32x1xf32>
    %26 = math.rsqrt %25 : vector<32x1xf32>
    %27 = vector.broadcast %26 : vector<32x1xf32> to vector<32x64xf32>
    %28 = arith.mulf %23, %27 : vector<32x64xf32>
    %29 = vector.broadcast %3 : vector<1x64xf32> to vector<32x64xf32>
    %30 = arith.mulf %28, %29 : vector<32x64xf32>
    %31 = vector.broadcast %4 : vector<1x64xf32> to vector<32x64xf32>
    %32 = arith.addf %30, %31 : vector<32x64xf32>
    %c0_9 = arith.constant 0 : index
    %c0_10 = arith.constant 0 : index
    %c0_11 = arith.constant 0 : index
    %33 = vector.load %arg1[%c0_9, %c0_10, %c0_11] : memref<2x64x192xf32, #tpu.memory_space<vmem>>, vector<1x64x192xf32>
    %34 = vector.shape_cast %33 : vector<1x64x192xf32> to vector<64x192xf32>
    %cst_12 = arith.constant dense<0.000000e+00> : vector<32x192xf32>
    %35 = tpu.matmul %32, %34, %cst_12 {dimension_numbers = #tpu.dot_dimension_numbers<[1], [0], [0], [1], [0, 0, 1, 1], [], []>} : vector<32x64xf32>, vector<64x192xf32>, vector<32x192xf32> -> vector<32x192xf32>
    %c0_13 = arith.constant 0 : index
    %c0_14 = arith.constant 0 : index
    %c0_15 = arith.constant 0 : index
    %36 = vector.load %arg2[%c0_13, %c0_14, %c0_15] : memref<2x1x192xf32, #tpu.memory_space<vmem>>, vector<1x1x192xf32>
    %37 = vector.shape_cast %36 : vector<1x1x192xf32> to vector<1x192xf32>
    %38 = vector.broadcast %37 : vector<1x192xf32> to vector<32x192xf32>
    %39 = arith.addf %35, %38 : vector<32x192xf32>
    %40 = vector.extract_strided_slice %39 {offsets = [0, 0], sizes = [32, 64], strides = [1, 1]} : vector<32x192xf32> to vector<32x64xf32>
    %cst_16 = arith.constant 2.500000e-01 : f32
    %41 = vector.broadcast %cst_16 : f32 to vector<32x64xf32>
    %42 = arith.mulf %40, %41 : vector<32x64xf32>
    %43 = vector.extract_strided_slice %39 {offsets = [0, 64], sizes = [32, 64], strides = [1, 1]} : vector<32x192xf32> to vector<32x64xf32>
    %44 = vector.extract_strided_slice %39 {offsets = [0, 128], sizes = [32, 64], strides = [1, 1]} : vector<32x192xf32> to vector<32x64xf32>
    %45 = vector.shape_cast %42 : vector<32x64xf32> to vector<2x16x64xf32>
    %46 = vector.shape_cast %43 : vector<32x64xf32> to vector<2x16x64xf32>
    %47 = vector.shape_cast %44 : vector<32x64xf32> to vector<2x16x64xf32>
    %48 = vector.extract_strided_slice %45 {offsets = [0, 0, 0], sizes = [2, 16, 16], strides = [1, 1, 1]} : vector<2x16x64xf32> to vector<2x16x16xf32>
    %49 = vector.extract_strided_slice %45 {offsets = [0, 0, 16], sizes = [2, 16, 16], strides = [1, 1, 1]} : vector<2x16x64xf32> to vector<2x16x16xf32>
    %50 = vector.extract_strided_slice %45 {offsets = [0, 0, 32], sizes = [2, 16, 16], strides = [1, 1, 1]} : vector<2x16x64xf32> to vector<2x16x16xf32>
    %51 = vector.extract_strided_slice %45 {offsets = [0, 0, 48], sizes = [2, 16, 16], strides = [1, 1, 1]} : vector<2x16x64xf32> to vector<2x16x16xf32>
    %52 = tpu.concatenate %48, %49, %50, %51 in 0 : vector<2x16x16xf32>, vector<2x16x16xf32>, vector<2x16x16xf32>, vector<2x16x16xf32> -> vector<8x16x16xf32>
    %53 = vector.extract_strided_slice %46 {offsets = [0, 0, 0], sizes = [2, 16, 16], strides = [1, 1, 1]} : vector<2x16x64xf32> to vector<2x16x16xf32>
    %54 = vector.extract_strided_slice %46 {offsets = [0, 0, 16], sizes = [2, 16, 16], strides = [1, 1, 1]} : vector<2x16x64xf32> to vector<2x16x16xf32>
    %55 = vector.extract_strided_slice %46 {offsets = [0, 0, 32], sizes = [2, 16, 16], strides = [1, 1, 1]} : vector<2x16x64xf32> to vector<2x16x16xf32>
    %56 = vector.extract_strided_slice %46 {offsets = [0, 0, 48], sizes = [2, 16, 16], strides = [1, 1, 1]} : vector<2x16x64xf32> to vector<2x16x16xf32>
    %57 = tpu.concatenate %53, %54, %55, %56 in 0 : vector<2x16x16xf32>, vector<2x16x16xf32>, vector<2x16x16xf32>, vector<2x16x16xf32> -> vector<8x16x16xf32>
    %58 = vector.extract_strided_slice %47 {offsets = [0, 0, 0], sizes = [2, 16, 16], strides = [1, 1, 1]} : vector<2x16x64xf32> to vector<2x16x16xf32>
    %59 = vector.extract_strided_slice %47 {offsets = [0, 0, 16], sizes = [2, 16, 16], strides = [1, 1, 1]} : vector<2x16x64xf32> to vector<2x16x16xf32>
    %60 = vector.extract_strided_slice %47 {offsets = [0, 0, 32], sizes = [2, 16, 16], strides = [1, 1, 1]} : vector<2x16x64xf32> to vector<2x16x16xf32>
    %61 = vector.extract_strided_slice %47 {offsets = [0, 0, 48], sizes = [2, 16, 16], strides = [1, 1, 1]} : vector<2x16x64xf32> to vector<2x16x16xf32>
    %62 = tpu.concatenate %58, %59, %60, %61 in 0 : vector<2x16x16xf32>, vector<2x16x16xf32>, vector<2x16x16xf32>, vector<2x16x16xf32> -> vector<8x16x16xf32>
    "tpu.trace_start"() <{level = 10 : i32, message = "zqd,zkd->zqk"}> : () -> ()
    %cst_17 = arith.constant dense<0.000000e+00> : vector<8x16x16xf32>
    %63 = tpu.matmul %52, %57, %cst_17 {dimension_numbers = #tpu.dot_dimension_numbers<[2], [2], [1], [1], [0, 0, 0, 1, 1, 1], [0], [0]>} : vector<8x16x16xf32>, vector<8x16x16xf32>, vector<8x16x16xf32> -> vector<8x16x16xf32>
    "tpu.trace_stop"() : () -> ()
    %cst_18 = arith.constant dense<0xFF800000> : vector<8x16xf32>
    %64 = vector.multi_reduction <maximumf>, %63, %cst_18 [2] : vector<8x16x16xf32> to vector<8x16xf32>
    %65 = vector.shape_cast %64 : vector<8x16xf32> to vector<8x16x1xf32>
    %66 = vector.broadcast %65 : vector<8x16x1xf32> to vector<8x16x16xf32>
    %67 = arith.subf %63, %66 : vector<8x16x16xf32>
    %68 = math.exp %67 : vector<8x16x16xf32>
    %cst_19 = arith.constant dense<0.000000e+00> : vector<8x16xf32>
    %69 = vector.multi_reduction <add>, %68, %cst_19 [2] : vector<8x16x16xf32> to vector<8x16xf32>
    %70 = vector.shape_cast %69 : vector<8x16xf32> to vector<8x16x1xf32>
    %71 = tpu.reciprocal %70 : vector<8x16x1xf32> -> vector<8x16x1xf32>
    %72 = vector.broadcast %71 : vector<8x16x1xf32> to vector<8x16x16xf32>
    %73 = arith.mulf %68, %72 : vector<8x16x16xf32>
    "tpu.trace_start"() <{level = 10 : i32, message = "zqk,zkd->zqd"}> : () -> ()
    %cst_20 = arith.constant dense<0.000000e+00> : vector<8x16x16xf32>
    %74 = tpu.matmul %73, %62, %cst_20 {dimension_numbers = #tpu.dot_dimension_numbers<[2], [1], [1], [2], [0, 0, 0, 1, 1, 2], [0], [0]>} : vector<8x16x16xf32>, vector<8x16x16xf32>, vector<8x16x16xf32> -> vector<8x16x16xf32>
    "tpu.trace_stop"() : () -> ()
    %c0_21 = arith.constant 0 : index
    %c0_22 = arith.constant 0 : index
    %c0_23 = arith.constant 0 : index
    %75 = vector.load %arg3[%c0_21, %c0_22, %c0_23] : memref<2x64x64xf32, #tpu.memory_space<vmem>>, vector<1x64x64xf32>
    %76 = vector.shape_cast %75 : vector<1x64x64xf32> to vector<64x64xf32>
    %77 = vector.extract_strided_slice %74 {offsets = [0, 0, 0], sizes = [2, 16, 16], strides = [1, 1, 1]} : vector<8x16x16xf32> to vector<2x16x16xf32>
    %78 = vector.shape_cast %77 : vector<2x16x16xf32> to vector<32x16xf32>
    %79 = vector.extract_strided_slice %76 {offsets = [0, 0], sizes = [16, 64], strides = [1, 1]} : vector<64x64xf32> to vector<16x64xf32>
    %cst_24 = arith.constant dense<0.000000e+00> : vector<32x64xf32>
    %80 = tpu.matmul %78, %79, %cst_24 {dimension_numbers = #tpu.dot_dimension_numbers<[1], [0], [0], [1], [0, 0, 1, 1], [], []>} : vector<32x16xf32>, vector<16x64xf32>, vector<32x64xf32> -> vector<32x64xf32>
    %81 = vector.broadcast %5 : vector<1x64xf32> to vector<32x64xf32>
    %82 = arith.addf %81, %80 : vector<32x64xf32>
    %83 = vector.extract_strided_slice %74 {offsets = [2, 0, 0], sizes = [2, 16, 16], strides = [1, 1, 1]} : vector<8x16x16xf32> to vector<2x16x16xf32>
    %84 = vector.shape_cast %83 : vector<2x16x16xf32> to vector<32x16xf32>
    %85 = vector.extract_strided_slice %76 {offsets = [16, 0], sizes = [16, 64], strides = [1, 1]} : vector<64x64xf32> to vector<16x64xf32>
    %cst_25 = arith.constant dense<0.000000e+00> : vector<32x64xf32>
    %86 = tpu.matmul %84, %85, %cst_25 {dimension_numbers = #tpu.dot_dimension_numbers<[1], [0], [0], [1], [0, 0, 1, 1], [], []>} : vector<32x16xf32>, vector<16x64xf32>, vector<32x64xf32> -> vector<32x64xf32>
    %87 = arith.addf %82, %86 : vector<32x64xf32>
    %88 = vector.extract_strided_slice %74 {offsets = [4, 0, 0], sizes = [2, 16, 16], strides = [1, 1, 1]} : vector<8x16x16xf32> to vector<2x16x16xf32>
    %89 = vector.shape_cast %88 : vector<2x16x16xf32> to vector<32x16xf32>
    %90 = vector.extract_strided_slice %76 {offsets = [32, 0], sizes = [16, 64], strides = [1, 1]} : vector<64x64xf32> to vector<16x64xf32>
    %cst_26 = arith.constant dense<0.000000e+00> : vector<32x64xf32>
    %91 = tpu.matmul %89, %90, %cst_26 {dimension_numbers = #tpu.dot_dimension_numbers<[1], [0], [0], [1], [0, 0, 1, 1], [], []>} : vector<32x16xf32>, vector<16x64xf32>, vector<32x64xf32> -> vector<32x64xf32>
    %92 = arith.addf %87, %91 : vector<32x64xf32>
    %93 = vector.extract_strided_slice %74 {offsets = [6, 0, 0], sizes = [2, 16, 16], strides = [1, 1, 1]} : vector<8x16x16xf32> to vector<2x16x16xf32>
    %94 = vector.shape_cast %93 : vector<2x16x16xf32> to vector<32x16xf32>
    %95 = vector.extract_strided_slice %76 {offsets = [48, 0], sizes = [16, 64], strides = [1, 1]} : vector<64x64xf32> to vector<16x64xf32>
    %cst_27 = arith.constant dense<0.000000e+00> : vector<32x64xf32>
    %96 = tpu.matmul %94, %95, %cst_27 {dimension_numbers = #tpu.dot_dimension_numbers<[1], [0], [0], [1], [0, 0, 1, 1], [], []>} : vector<32x16xf32>, vector<16x64xf32>, vector<32x64xf32> -> vector<32x64xf32>
    %97 = arith.addf %92, %96 : vector<32x64xf32>
    %98 = arith.addf %0, %97 : vector<32x64xf32>
    %cst_28 = arith.constant dense<0.000000e+00> : vector<32xf32>
    %99 = vector.multi_reduction <add>, %98, %cst_28 [1] : vector<32x64xf32> to vector<32xf32>
    %100 = vector.shape_cast %99 : vector<32xf32> to vector<32x1xf32>
    %cst_29 = arith.constant 6.400000e+01 : f32
    %101 = vector.broadcast %cst_29 : f32 to vector<32x1xf32>
    %102 = arith.divf %100, %101 : vector<32x1xf32>
    %103 = arith.mulf %98, %98 : vector<32x64xf32>
    %cst_30 = arith.constant dense<0.000000e+00> : vector<32xf32>
    %104 = vector.multi_reduction <add>, %103, %cst_30 [1] : vector<32x64xf32> to vector<32xf32>
    %105 = vector.shape_cast %104 : vector<32xf32> to vector<32x1xf32>
    %cst_31 = arith.constant 6.400000e+01 : f32
    %106 = vector.broadcast %cst_31 : f32 to vector<32x1xf32>
    %107 = arith.divf %105, %106 : vector<32x1xf32>
    %108 = arith.mulf %102, %102 : vector<32x1xf32>
    %109 = arith.subf %107, %108 : vector<32x1xf32>
    %cst_32 = arith.constant 0.000000e+00 : f32
    %110 = vector.broadcast %cst_32 : f32 to vector<32x1xf32>
    %111 = arith.maximumf %109, %110 : vector<32x1xf32>
    %112 = vector.broadcast %102 : vector<32x1xf32> to vector<32x64xf32>
    %113 = arith.subf %98, %112 : vector<32x64xf32>
    %cst_33 = arith.constant 9.99999997E-7 : f32
    %114 = vector.broadcast %cst_33 : f32 to vector<32x1xf32>
    %115 = arith.addf %111, %114 : vector<32x1xf32>
    %116 = math.rsqrt %115 : vector<32x1xf32>
    %117 = vector.broadcast %116 : vector<32x1xf32> to vector<32x64xf32>
    %118 = arith.mulf %113, %117 : vector<32x64xf32>
    %119 = vector.broadcast %6 : vector<1x64xf32> to vector<32x64xf32>
    %120 = arith.mulf %118, %119 : vector<32x64xf32>
    %121 = vector.broadcast %7 : vector<1x64xf32> to vector<32x64xf32>
    %122 = arith.addf %120, %121 : vector<32x64xf32>
    %c0_34 = arith.constant 0 : index
    %c0_35 = arith.constant 0 : index
    %c0_36 = arith.constant 0 : index
    %123 = vector.load %arg4[%c0_34, %c0_35, %c0_36] : memref<2x64x128xf32, #tpu.memory_space<vmem>>, vector<1x64x128xf32>
    %124 = vector.shape_cast %123 : vector<1x64x128xf32> to vector<64x128xf32>
    %cst_37 = arith.constant dense<0.000000e+00> : vector<32x128xf32>
    %125 = tpu.matmul %122, %124, %cst_37 {dimension_numbers = #tpu.dot_dimension_numbers<[1], [0], [0], [1], [0, 0, 1, 1], [], []>} : vector<32x64xf32>, vector<64x128xf32>, vector<32x128xf32> -> vector<32x128xf32>
    %c0_38 = arith.constant 0 : index
    %c0_39 = arith.constant 0 : index
    %c0_40 = arith.constant 0 : index
    %126 = vector.load %arg5[%c0_38, %c0_39, %c0_40] : memref<2x1x128xf32, #tpu.memory_space<vmem>>, vector<1x1x128xf32>
    %127 = vector.shape_cast %126 : vector<1x1x128xf32> to vector<1x128xf32>
    %128 = vector.broadcast %127 : vector<1x128xf32> to vector<32x128xf32>
    %129 = arith.addf %125, %128 : vector<32x128xf32>
    %130 = arith.mulf %129, %129 : vector<32x128xf32>
    %131 = arith.mulf %129, %130 : vector<32x128xf32>
    %cst_41 = arith.constant 4.471500e-02 : f32
    %132 = vector.broadcast %cst_41 : f32 to vector<32x128xf32>
    %133 = arith.mulf %132, %131 : vector<32x128xf32>
    %134 = arith.addf %129, %133 : vector<32x128xf32>
    %cst_42 = arith.constant 0.797884583 : f32
    %135 = vector.broadcast %cst_42 : f32 to vector<32x128xf32>
    %136 = arith.mulf %135, %134 : vector<32x128xf32>
    %137 = math.tanh %136 : vector<32x128xf32>
    %cst_43 = arith.constant 1.000000e+00 : f32
    %138 = vector.broadcast %cst_43 : f32 to vector<32x128xf32>
    %139 = arith.addf %138, %137 : vector<32x128xf32>
    %cst_44 = arith.constant 5.000000e-01 : f32
    %140 = vector.broadcast %cst_44 : f32 to vector<32x128xf32>
    %141 = arith.mulf %140, %139 : vector<32x128xf32>
    %142 = arith.mulf %129, %141 : vector<32x128xf32>
    %c0_45 = arith.constant 0 : index
    %c0_46 = arith.constant 0 : index
    %c0_47 = arith.constant 0 : index
    %143 = vector.load %arg6[%c0_45, %c0_46, %c0_47] : memref<2x128x64xf32, #tpu.memory_space<vmem>>, vector<1x128x64xf32>
    %144 = vector.shape_cast %143 : vector<1x128x64xf32> to vector<128x64xf32>
    %cst_48 = arith.constant dense<0.000000e+00> : vector<32x64xf32>
    %145 = tpu.matmul %142, %144, %cst_48 {dimension_numbers = #tpu.dot_dimension_numbers<[1], [0], [0], [1], [0, 0, 1, 1], [], []>} : vector<32x128xf32>, vector<128x64xf32>, vector<32x64xf32> -> vector<32x64xf32>
    %146 = vector.broadcast %8 : vector<1x64xf32> to vector<32x64xf32>
    %147 = arith.addf %145, %146 : vector<32x64xf32>
    %148 = arith.addf %98, %147 : vector<32x64xf32>
    %c1 = arith.constant 1 : index
    %c0_49 = arith.constant 0 : index
    %c0_50 = arith.constant 0 : index
    %149 = vector.load %arg7[%c1, %c0_49, %c0_50] : memref<2x6x64xf32, #tpu.memory_space<vmem>>, vector<1x6x64xf32>
    %150 = vector.shape_cast %149 : vector<1x6x64xf32> to vector<6x64xf32>
    %151 = vector.extract_strided_slice %150 {offsets = [0, 0], sizes = [1, 64], strides = [1, 1]} : vector<6x64xf32> to vector<1x64xf32>
    %152 = vector.extract_strided_slice %150 {offsets = [1, 0], sizes = [1, 64], strides = [1, 1]} : vector<6x64xf32> to vector<1x64xf32>
    %153 = vector.extract_strided_slice %150 {offsets = [2, 0], sizes = [1, 64], strides = [1, 1]} : vector<6x64xf32> to vector<1x64xf32>
    %154 = vector.extract_strided_slice %150 {offsets = [3, 0], sizes = [1, 64], strides = [1, 1]} : vector<6x64xf32> to vector<1x64xf32>
    %155 = vector.extract_strided_slice %150 {offsets = [4, 0], sizes = [1, 64], strides = [1, 1]} : vector<6x64xf32> to vector<1x64xf32>
    %156 = vector.extract_strided_slice %150 {offsets = [5, 0], sizes = [1, 64], strides = [1, 1]} : vector<6x64xf32> to vector<1x64xf32>
    %cst_51 = arith.constant dense<0.000000e+00> : vector<32xf32>
    %157 = vector.multi_reduction <add>, %148, %cst_51 [1] : vector<32x64xf32> to vector<32xf32>
    %158 = vector.shape_cast %157 : vector<32xf32> to vector<32x1xf32>
    %cst_52 = arith.constant 6.400000e+01 : f32
    %159 = vector.broadcast %cst_52 : f32 to vector<32x1xf32>
    %160 = arith.divf %158, %159 : vector<32x1xf32>
    %161 = arith.mulf %148, %148 : vector<32x64xf32>
    %cst_53 = arith.constant dense<0.000000e+00> : vector<32xf32>
    %162 = vector.multi_reduction <add>, %161, %cst_53 [1] : vector<32x64xf32> to vector<32xf32>
    %163 = vector.shape_cast %162 : vector<32xf32> to vector<32x1xf32>
    %cst_54 = arith.constant 6.400000e+01 : f32
    %164 = vector.broadcast %cst_54 : f32 to vector<32x1xf32>
    %165 = arith.divf %163, %164 : vector<32x1xf32>
    %166 = arith.mulf %160, %160 : vector<32x1xf32>
    %167 = arith.subf %165, %166 : vector<32x1xf32>
    %cst_55 = arith.constant 0.000000e+00 : f32
    %168 = vector.broadcast %cst_55 : f32 to vector<32x1xf32>
    %169 = arith.maximumf %167, %168 : vector<32x1xf32>
    %170 = vector.broadcast %160 : vector<32x1xf32> to vector<32x64xf32>
    %171 = arith.subf %148, %170 : vector<32x64xf32>
    %cst_56 = arith.constant 9.99999997E-7 : f32
    %172 = vector.broadcast %cst_56 : f32 to vector<32x1xf32>
    %173 = arith.addf %169, %172 : vector<32x1xf32>
    %174 = math.rsqrt %173 : vector<32x1xf32>
    %175 = vector.broadcast %174 : vector<32x1xf32> to vector<32x64xf32>
    %176 = arith.mulf %171, %175 : vector<32x64xf32>
    %177 = vector.broadcast %151 : vector<1x64xf32> to vector<32x64xf32>
    %178 = arith.mulf %176, %177 : vector<32x64xf32>
    %179 = vector.broadcast %152 : vector<1x64xf32> to vector<32x64xf32>
    %180 = arith.addf %178, %179 : vector<32x64xf32>
    %c1_57 = arith.constant 1 : index
    %c0_58 = arith.constant 0 : index
    %c0_59 = arith.constant 0 : index
    %181 = vector.load %arg1[%c1_57, %c0_58, %c0_59] : memref<2x64x192xf32, #tpu.memory_space<vmem>>, vector<1x64x192xf32>
    %182 = vector.shape_cast %181 : vector<1x64x192xf32> to vector<64x192xf32>
    %cst_60 = arith.constant dense<0.000000e+00> : vector<32x192xf32>
    %183 = tpu.matmul %180, %182, %cst_60 {dimension_numbers = #tpu.dot_dimension_numbers<[1], [0], [0], [1], [0, 0, 1, 1], [], []>} : vector<32x64xf32>, vector<64x192xf32>, vector<32x192xf32> -> vector<32x192xf32>
    %c1_61 = arith.constant 1 : index
    %c0_62 = arith.constant 0 : index
    %c0_63 = arith.constant 0 : index
    %184 = vector.load %arg2[%c1_61, %c0_62, %c0_63] : memref<2x1x192xf32, #tpu.memory_space<vmem>>, vector<1x1x192xf32>
    %185 = vector.shape_cast %184 : vector<1x1x192xf32> to vector<1x192xf32>
    %186 = vector.broadcast %185 : vector<1x192xf32> to vector<32x192xf32>
    %187 = arith.addf %183, %186 : vector<32x192xf32>
    %188 = vector.extract_strided_slice %187 {offsets = [0, 0], sizes = [32, 64], strides = [1, 1]} : vector<32x192xf32> to vector<32x64xf32>
    %cst_64 = arith.constant 2.500000e-01 : f32
    %189 = vector.broadcast %cst_64 : f32 to vector<32x64xf32>
    %190 = arith.mulf %188, %189 : vector<32x64xf32>
    %191 = vector.extract_strided_slice %187 {offsets = [0, 64], sizes = [32, 64], strides = [1, 1]} : vector<32x192xf32> to vector<32x64xf32>
    %192 = vector.extract_strided_slice %187 {offsets = [0, 128], sizes = [32, 64], strides = [1, 1]} : vector<32x192xf32> to vector<32x64xf32>
    %193 = vector.shape_cast %190 : vector<32x64xf32> to vector<2x16x64xf32>
    %194 = vector.shape_cast %191 : vector<32x64xf32> to vector<2x16x64xf32>
    %195 = vector.shape_cast %192 : vector<32x64xf32> to vector<2x16x64xf32>
    %196 = vector.extract_strided_slice %193 {offsets = [0, 0, 0], sizes = [2, 16, 16], strides = [1, 1, 1]} : vector<2x16x64xf32> to vector<2x16x16xf32>
    %197 = vector.extract_strided_slice %193 {offsets = [0, 0, 16], sizes = [2, 16, 16], strides = [1, 1, 1]} : vector<2x16x64xf32> to vector<2x16x16xf32>
    %198 = vector.extract_strided_slice %193 {offsets = [0, 0, 32], sizes = [2, 16, 16], strides = [1, 1, 1]} : vector<2x16x64xf32> to vector<2x16x16xf32>
    %199 = vector.extract_strided_slice %193 {offsets = [0, 0, 48], sizes = [2, 16, 16], strides = [1, 1, 1]} : vector<2x16x64xf32> to vector<2x16x16xf32>
    %200 = tpu.concatenate %196, %197, %198, %199 in 0 : vector<2x16x16xf32>, vector<2x16x16xf32>, vector<2x16x16xf32>, vector<2x16x16xf32> -> vector<8x16x16xf32>
    %201 = vector.extract_strided_slice %194 {offsets = [0, 0, 0], sizes = [2, 16, 16], strides = [1, 1, 1]} : vector<2x16x64xf32> to vector<2x16x16xf32>
    %202 = vector.extract_strided_slice %194 {offsets = [0, 0, 16], sizes = [2, 16, 16], strides = [1, 1, 1]} : vector<2x16x64xf32> to vector<2x16x16xf32>
    %203 = vector.extract_strided_slice %194 {offsets = [0, 0, 32], sizes = [2, 16, 16], strides = [1, 1, 1]} : vector<2x16x64xf32> to vector<2x16x16xf32>
    %204 = vector.extract_strided_slice %194 {offsets = [0, 0, 48], sizes = [2, 16, 16], strides = [1, 1, 1]} : vector<2x16x64xf32> to vector<2x16x16xf32>
    %205 = tpu.concatenate %201, %202, %203, %204 in 0 : vector<2x16x16xf32>, vector<2x16x16xf32>, vector<2x16x16xf32>, vector<2x16x16xf32> -> vector<8x16x16xf32>
    %206 = vector.extract_strided_slice %195 {offsets = [0, 0, 0], sizes = [2, 16, 16], strides = [1, 1, 1]} : vector<2x16x64xf32> to vector<2x16x16xf32>
    %207 = vector.extract_strided_slice %195 {offsets = [0, 0, 16], sizes = [2, 16, 16], strides = [1, 1, 1]} : vector<2x16x64xf32> to vector<2x16x16xf32>
    %208 = vector.extract_strided_slice %195 {offsets = [0, 0, 32], sizes = [2, 16, 16], strides = [1, 1, 1]} : vector<2x16x64xf32> to vector<2x16x16xf32>
    %209 = vector.extract_strided_slice %195 {offsets = [0, 0, 48], sizes = [2, 16, 16], strides = [1, 1, 1]} : vector<2x16x64xf32> to vector<2x16x16xf32>
    %210 = tpu.concatenate %206, %207, %208, %209 in 0 : vector<2x16x16xf32>, vector<2x16x16xf32>, vector<2x16x16xf32>, vector<2x16x16xf32> -> vector<8x16x16xf32>
    "tpu.trace_start"() <{level = 10 : i32, message = "zqd,zkd->zqk"}> : () -> ()
    %cst_65 = arith.constant dense<0.000000e+00> : vector<8x16x16xf32>
    %211 = tpu.matmul %200, %205, %cst_65 {dimension_numbers = #tpu.dot_dimension_numbers<[2], [2], [1], [1], [0, 0, 0, 1, 1, 1], [0], [0]>} : vector<8x16x16xf32>, vector<8x16x16xf32>, vector<8x16x16xf32> -> vector<8x16x16xf32>
    "tpu.trace_stop"() : () -> ()
    %cst_66 = arith.constant dense<0xFF800000> : vector<8x16xf32>
    %212 = vector.multi_reduction <maximumf>, %211, %cst_66 [2] : vector<8x16x16xf32> to vector<8x16xf32>
    %213 = vector.shape_cast %212 : vector<8x16xf32> to vector<8x16x1xf32>
    %214 = vector.broadcast %213 : vector<8x16x1xf32> to vector<8x16x16xf32>
    %215 = arith.subf %211, %214 : vector<8x16x16xf32>
    %216 = math.exp %215 : vector<8x16x16xf32>
    %cst_67 = arith.constant dense<0.000000e+00> : vector<8x16xf32>
    %217 = vector.multi_reduction <add>, %216, %cst_67 [2] : vector<8x16x16xf32> to vector<8x16xf32>
    %218 = vector.shape_cast %217 : vector<8x16xf32> to vector<8x16x1xf32>
    %219 = tpu.reciprocal %218 : vector<8x16x1xf32> -> vector<8x16x1xf32>
    %220 = vector.broadcast %219 : vector<8x16x1xf32> to vector<8x16x16xf32>
    %221 = arith.mulf %216, %220 : vector<8x16x16xf32>
    "tpu.trace_start"() <{level = 10 : i32, message = "zqk,zkd->zqd"}> : () -> ()
    %cst_68 = arith.constant dense<0.000000e+00> : vector<8x16x16xf32>
    %222 = tpu.matmul %221, %210, %cst_68 {dimension_numbers = #tpu.dot_dimension_numbers<[2], [1], [1], [2], [0, 0, 0, 1, 1, 2], [0], [0]>} : vector<8x16x16xf32>, vector<8x16x16xf32>, vector<8x16x16xf32> -> vector<8x16x16xf32>
    "tpu.trace_stop"() : () -> ()
    %c1_69 = arith.constant 1 : index
    %c0_70 = arith.constant 0 : index
    %c0_71 = arith.constant 0 : index
    %223 = vector.load %arg3[%c1_69, %c0_70, %c0_71] : memref<2x64x64xf32, #tpu.memory_space<vmem>>, vector<1x64x64xf32>
    %224 = vector.shape_cast %223 : vector<1x64x64xf32> to vector<64x64xf32>
    %225 = vector.extract_strided_slice %222 {offsets = [0, 0, 0], sizes = [2, 16, 16], strides = [1, 1, 1]} : vector<8x16x16xf32> to vector<2x16x16xf32>
    %226 = vector.shape_cast %225 : vector<2x16x16xf32> to vector<32x16xf32>
    %227 = vector.extract_strided_slice %224 {offsets = [0, 0], sizes = [16, 64], strides = [1, 1]} : vector<64x64xf32> to vector<16x64xf32>
    %cst_72 = arith.constant dense<0.000000e+00> : vector<32x64xf32>
    %228 = tpu.matmul %226, %227, %cst_72 {dimension_numbers = #tpu.dot_dimension_numbers<[1], [0], [0], [1], [0, 0, 1, 1], [], []>} : vector<32x16xf32>, vector<16x64xf32>, vector<32x64xf32> -> vector<32x64xf32>
    %229 = vector.broadcast %153 : vector<1x64xf32> to vector<32x64xf32>
    %230 = arith.addf %229, %228 : vector<32x64xf32>
    %231 = vector.extract_strided_slice %222 {offsets = [2, 0, 0], sizes = [2, 16, 16], strides = [1, 1, 1]} : vector<8x16x16xf32> to vector<2x16x16xf32>
    %232 = vector.shape_cast %231 : vector<2x16x16xf32> to vector<32x16xf32>
    %233 = vector.extract_strided_slice %224 {offsets = [16, 0], sizes = [16, 64], strides = [1, 1]} : vector<64x64xf32> to vector<16x64xf32>
    %cst_73 = arith.constant dense<0.000000e+00> : vector<32x64xf32>
    %234 = tpu.matmul %232, %233, %cst_73 {dimension_numbers = #tpu.dot_dimension_numbers<[1], [0], [0], [1], [0, 0, 1, 1], [], []>} : vector<32x16xf32>, vector<16x64xf32>, vector<32x64xf32> -> vector<32x64xf32>
    %235 = arith.addf %230, %234 : vector<32x64xf32>
    %236 = vector.extract_strided_slice %222 {offsets = [4, 0, 0], sizes = [2, 16, 16], strides = [1, 1, 1]} : vector<8x16x16xf32> to vector<2x16x16xf32>
    %237 = vector.shape_cast %236 : vector<2x16x16xf32> to vector<32x16xf32>
    %238 = vector.extract_strided_slice %224 {offsets = [32, 0], sizes = [16, 64], strides = [1, 1]} : vector<64x64xf32> to vector<16x64xf32>
    %cst_74 = arith.constant dense<0.000000e+00> : vector<32x64xf32>
    %239 = tpu.matmul %237, %238, %cst_74 {dimension_numbers = #tpu.dot_dimension_numbers<[1], [0], [0], [1], [0, 0, 1, 1], [], []>} : vector<32x16xf32>, vector<16x64xf32>, vector<32x64xf32> -> vector<32x64xf32>
    %240 = arith.addf %235, %239 : vector<32x64xf32>
    %241 = vector.extract_strided_slice %222 {offsets = [6, 0, 0], sizes = [2, 16, 16], strides = [1, 1, 1]} : vector<8x16x16xf32> to vector<2x16x16xf32>
    %242 = vector.shape_cast %241 : vector<2x16x16xf32> to vector<32x16xf32>
    %243 = vector.extract_strided_slice %224 {offsets = [48, 0], sizes = [16, 64], strides = [1, 1]} : vector<64x64xf32> to vector<16x64xf32>
    %cst_75 = arith.constant dense<0.000000e+00> : vector<32x64xf32>
    %244 = tpu.matmul %242, %243, %cst_75 {dimension_numbers = #tpu.dot_dimension_numbers<[1], [0], [0], [1], [0, 0, 1, 1], [], []>} : vector<32x16xf32>, vector<16x64xf32>, vector<32x64xf32> -> vector<32x64xf32>
    %245 = arith.addf %240, %244 : vector<32x64xf32>
    %246 = arith.addf %148, %245 : vector<32x64xf32>
    %cst_76 = arith.constant dense<0.000000e+00> : vector<32xf32>
    %247 = vector.multi_reduction <add>, %246, %cst_76 [1] : vector<32x64xf32> to vector<32xf32>
    %248 = vector.shape_cast %247 : vector<32xf32> to vector<32x1xf32>
    %cst_77 = arith.constant 6.400000e+01 : f32
    %249 = vector.broadcast %cst_77 : f32 to vector<32x1xf32>
    %250 = arith.divf %248, %249 : vector<32x1xf32>
    %251 = arith.mulf %246, %246 : vector<32x64xf32>
    %cst_78 = arith.constant dense<0.000000e+00> : vector<32xf32>
    %252 = vector.multi_reduction <add>, %251, %cst_78 [1] : vector<32x64xf32> to vector<32xf32>
    %253 = vector.shape_cast %252 : vector<32xf32> to vector<32x1xf32>
    %cst_79 = arith.constant 6.400000e+01 : f32
    %254 = vector.broadcast %cst_79 : f32 to vector<32x1xf32>
    %255 = arith.divf %253, %254 : vector<32x1xf32>
    %256 = arith.mulf %250, %250 : vector<32x1xf32>
    %257 = arith.subf %255, %256 : vector<32x1xf32>
    %cst_80 = arith.constant 0.000000e+00 : f32
    %258 = vector.broadcast %cst_80 : f32 to vector<32x1xf32>
    %259 = arith.maximumf %257, %258 : vector<32x1xf32>
    %260 = vector.broadcast %250 : vector<32x1xf32> to vector<32x64xf32>
    %261 = arith.subf %246, %260 : vector<32x64xf32>
    %cst_81 = arith.constant 9.99999997E-7 : f32
    %262 = vector.broadcast %cst_81 : f32 to vector<32x1xf32>
    %263 = arith.addf %259, %262 : vector<32x1xf32>
    %264 = math.rsqrt %263 : vector<32x1xf32>
    %265 = vector.broadcast %264 : vector<32x1xf32> to vector<32x64xf32>
    %266 = arith.mulf %261, %265 : vector<32x64xf32>
    %267 = vector.broadcast %154 : vector<1x64xf32> to vector<32x64xf32>
    %268 = arith.mulf %266, %267 : vector<32x64xf32>
    %269 = vector.broadcast %155 : vector<1x64xf32> to vector<32x64xf32>
    %270 = arith.addf %268, %269 : vector<32x64xf32>
    %c1_82 = arith.constant 1 : index
    %c0_83 = arith.constant 0 : index
    %c0_84 = arith.constant 0 : index
    %271 = vector.load %arg4[%c1_82, %c0_83, %c0_84] : memref<2x64x128xf32, #tpu.memory_space<vmem>>, vector<1x64x128xf32>
    %272 = vector.shape_cast %271 : vector<1x64x128xf32> to vector<64x128xf32>
    %cst_85 = arith.constant dense<0.000000e+00> : vector<32x128xf32>
    %273 = tpu.matmul %270, %272, %cst_85 {dimension_numbers = #tpu.dot_dimension_numbers<[1], [0], [0], [1], [0, 0, 1, 1], [], []>} : vector<32x64xf32>, vector<64x128xf32>, vector<32x128xf32> -> vector<32x128xf32>
    %c1_86 = arith.constant 1 : index
    %c0_87 = arith.constant 0 : index
    %c0_88 = arith.constant 0 : index
    %274 = vector.load %arg5[%c1_86, %c0_87, %c0_88] : memref<2x1x128xf32, #tpu.memory_space<vmem>>, vector<1x1x128xf32>
    %275 = vector.shape_cast %274 : vector<1x1x128xf32> to vector<1x128xf32>
    %276 = vector.broadcast %275 : vector<1x128xf32> to vector<32x128xf32>
    %277 = arith.addf %273, %276 : vector<32x128xf32>
    %278 = arith.mulf %277, %277 : vector<32x128xf32>
    %279 = arith.mulf %277, %278 : vector<32x128xf32>
    %cst_89 = arith.constant 4.471500e-02 : f32
    %280 = vector.broadcast %cst_89 : f32 to vector<32x128xf32>
    %281 = arith.mulf %280, %279 : vector<32x128xf32>
    %282 = arith.addf %277, %281 : vector<32x128xf32>
    %cst_90 = arith.constant 0.797884583 : f32
    %283 = vector.broadcast %cst_90 : f32 to vector<32x128xf32>
    %284 = arith.mulf %283, %282 : vector<32x128xf32>
    %285 = math.tanh %284 : vector<32x128xf32>
    %cst_91 = arith.constant 1.000000e+00 : f32
    %286 = vector.broadcast %cst_91 : f32 to vector<32x128xf32>
    %287 = arith.addf %286, %285 : vector<32x128xf32>
    %cst_92 = arith.constant 5.000000e-01 : f32
    %288 = vector.broadcast %cst_92 : f32 to vector<32x128xf32>
    %289 = arith.mulf %288, %287 : vector<32x128xf32>
    %290 = arith.mulf %277, %289 : vector<32x128xf32>
    %c1_93 = arith.constant 1 : index
    %c0_94 = arith.constant 0 : index
    %c0_95 = arith.constant 0 : index
    %291 = vector.load %arg6[%c1_93, %c0_94, %c0_95] : memref<2x128x64xf32, #tpu.memory_space<vmem>>, vector<1x128x64xf32>
    %292 = vector.shape_cast %291 : vector<1x128x64xf32> to vector<128x64xf32>
    %cst_96 = arith.constant dense<0.000000e+00> : vector<32x64xf32>
    %293 = tpu.matmul %290, %292, %cst_96 {dimension_numbers = #tpu.dot_dimension_numbers<[1], [0], [0], [1], [0, 0, 1, 1], [], []>} : vector<32x128xf32>, vector<128x64xf32>, vector<32x64xf32> -> vector<32x64xf32>
    %294 = vector.broadcast %156 : vector<1x64xf32> to vector<32x64xf32>
    %295 = arith.addf %293, %294 : vector<32x64xf32>
    %296 = arith.addf %246, %295 : vector<32x64xf32>
    %c0_97 = arith.constant 0 : index
    %c0_98 = arith.constant 0 : index
    %297 = vector.load %arg8[%c0_97, %c0_98] : memref<32x64xf32, #tpu.memory_space<vmem>>, vector<32x64xf32>
    tpu.vector_store %arg8[%c0_97, %c0_98], %296 {strides = array<i32>} : memref<32x64xf32, #tpu.memory_space<vmem>>, vector<32x64xf32>,
    return
  }
}

</mosaic_0001>

<bundles_post_ra>
// kernel: tpu_custom_call.1
= control target key start
LH: loop header
LB: loop body
LE: loop exit
PB: predicated region body
PF: predicated region fallthrough
CT: control target
= control target key end

     0   :  { %13 = vsyncpa [#allocation3], 0  ;;  %s8099_s0 = inlined_call_operand.hbm [shape: f32[32,64], index: 0, kind: input, shape index: {}]   ;;  %s8100_s1 = inlined_call_operand.vmem [shape: f32[2,64,192], index: 1, kind: input, shape index: {}]   ;;  %s8101_s2 = inlined_call_operand.vmem [shape: f32[2,1,192], index: 2, kind: input, shape index: {}]   ;;  %s8102_s3 = inlined_call_operand.vmem [shape: f32[2,64,64], index: 3, kind: input, shape index: {}]   ;;  %s8103_s4 = inlined_call_operand.hbm [shape: f32[2,64,128], index: 4, kind: input, shape index: {}]   ;;  %s8104_s5 = inlined_call_operand.vmem [shape: f32[2,1,128], index: 5, kind: input, shape index: {}]   ;;  %s8105_s6 = inlined_call_operand.vmem [shape: f32[2,128,64], index: 6, kind: input, shape index: {}]   ;;  %s8106_s7 = inlined_call_operand.vmem [shape: f32[2,6,64], index: 7, kind: input, shape index: {}]   ;;  %s8107_s8 = inlined_call_operand.hbm [shape: f32[32,64], index: 8, kind: output, shape index: {}]  }
   0x1   :  { %14 = vsyncpa [#allocation6], 0 }
   0x2   :  { %15 = vsyncpa [#allocation4], 0  ;;  %s6945_s27 = smov [#allocation2]   ;;  %s6873_s9 = scalar_lea.hbm %s8099_s0, 512 }
   0x3   :  { %s21_s28 = sshll.u32 %s6945_s27, 4  ;;  %p6874_p0 = scmp.ne.s32.totalorder %s8099_s0, %s6873_s9  ;;  %s22_s28 = int_to_ptr.vmem [resolvable:$true] %s21_s28 }
   0x4   :  { %p6877_p1 = scmp.lt.u32.totalorder %s6873_s9, %s8099_s0 }
   0x6   :  { %p6879_p2 = pnand %p6877_p1, %p6874_p0 }
   0x8   :  { %6882 = shalt.err (!%p6879_p2)
}
   0x9   :  { %s6883_s14 = scalar_lea.vmem %s22_s28, 512  ;;  %p6888_p4 = scmp.lt.s32.totalorder %s22_s28, %s22_s28 }
   0xa   :  { %p6884_p3 = scmp.ne.s32.totalorder %s22_s28, %s6883_s14  ;;  %p6889_p5 = scmp.lt.s32.totalorder %s6883_s14, %s6883_s14 }
   0xc   :  { %p6890_p6 = por %p6889_p5, %p6888_p4 }
   0xe   :  { %p6891_p7 = pnand %p6890_p6, %p6884_p3 }
  0x10   :  { %6894 = shalt.err (!%p6891_p7)
}
  0x11   :  { %s6946_s15 = smov 128   ;;  %s6947_s16 = smov 8  }
  0x12   :  { %27 = dma.hbm_to_vmem [thread:$0]  %s8099_s0, 512, %s22_s28, [#allocation3], %s6946_s15, %s6946_s15, %s6947_s16  }
  0x13   :  { %s6948_s19 = smov [#allocation5]   ;;  %s6895_s23 = scalar_lea.hbm %s8103_s4, 2048 }
  0x14   :  { %s39_s20 = sshll.u32 %s6948_s19, 4  ;;  %p6896_p8 = scmp.ne.s32.totalorder %s8103_s4, %s6895_s23  ;;  %s40_s20 = int_to_ptr.vmem [resolvable:$true] %s39_s20 }
  0x15   :  { %p6899_p9 = scmp.lt.u32.totalorder %s6895_s23, %s8103_s4 }
  0x17   :  { %p6901_p10 = pnand %p6899_p9, %p6896_p8 }
  0x19   :  { %6904 = shalt.err (!%p6901_p10)
}
  0x1a   :  { %s6905_s29 = scalar_lea.vmem %s40_s20, 2048  ;;  %p6910_p12 = scmp.lt.s32.totalorder %s40_s20, %s40_s20 }
  0x1b   :  { %p6906_p11 = scmp.ne.s32.totalorder %s40_s20, %s6905_s29  ;;  %p6911_p13 = scmp.lt.s32.totalorder %s6905_s29, %s6905_s29 }
  0x1d   :  { %p6912_p0 = por %p6911_p13, %p6910_p12 }
  0x1f   :  { %p6913_p1 = pnand %p6912_p0, %p6906_p11 }
  0x21   :  { %6916 = shalt.err (!%p6913_p1)
}
  0x22   :  { %45 = dma.hbm_to_vmem [thread:$0]  %s8103_s4, 2048, %s40_s20, [#allocation6], %s6946_s15, %s6946_s15, %s6947_s16  }
  0x23   :  { %6939 = dma.done.wait [#allocation3], 512  }
  0x24   :  { %6940 = vsyncadd [#allocation3], 4294966784 }
  0x25   :  { %6941 = dma.done.wait [#allocation6], 2048  }
  0x26   :  { %6942 = vsyncadd [#allocation6], 4294965248  ;;  %vm63_vm0 = vcmask 523264   ;;  %v7030_v0 = vld [vmem:[#allocation2 + $0x8] sm:$0xff]  ;;  %v7032_v1 = vld [vmem:[#allocation2] sm:$0xff]  ;;  %v6949_v40 = vmov 0.0   ;;  %v129_v58 = vlaneseq }
  0x27   :  { %v7034_v2 = vld [vmem:[#allocation2 + $0x10] sm:$0xff]  ;;  %v67_v3 = vsel %vm63_vm0, %v7030_v0, 0.0  ;;  %v64_v4 = vsel %vm63_vm0, %v7032_v1, 0.0  ;;  %v81_v5 = vmul.f32 %v7032_v1, %v7032_v1  ;;  %v82_v9 = vmul.f32 %v7030_v0, %v7030_v0  ;;  %v7049_v10 = vld [vmem:[#allocation2 + $0x18] sm:$0xff]  ;;  %v146_v16 = vld [vmem:[%s8100_s1 + $0x8] sm:$0xff]  ;;  %249 = vmatprep.mubr.f32.mxu0 %v6949_v40  ;;  %261 = vmatprep.mubr.f32.mxu1 %v6949_v40  ;;  %s6950_s23 = smov 112  }
  0x28   :  { %68 = vadd.xlane.f32.xlu1 %v67_v3  ;;  %65 = vadd.xlane.f32.xlu0 %v64_v4  ;;  %v70_v6 = vsel %vm63_vm0, %v7034_v2, 0.0  ;;  %v83_v8 = vmul.f32 %v7034_v2, %v7034_v2  ;;  %v84_v13 = vmul.f32 %v7049_v10, %v7049_v10  ;;  %v73_v14 = vsel %vm63_vm0, %v7049_v10, 0.0  ;;  %v148_v17 = vld [vmem:[%s8100_s1 + $0x18] sm:$0xff]  ;;  %v145_v19 = vld [vmem:[%s8100_s1] sm:$0xff]  ;;  %v147_v20 = vld [vmem:[%s8100_s1 + $0x10] sm:$0xff]  ;;  %s6951_s24 = smov 80  }
  0x29   :  { %v85_v7 = vsel %vm63_vm0, %v81_v5, 0.0  ;;  %v88_v12 = vsel %vm63_vm0, %v82_v9, 0.0  ;;  %v6121_v18 = vpack.c.bf16 %v148_v17, %v146_v16  ;;  %v6123_v21 = vpack.c.bf16 %v147_v20, %v145_v19  ;;  %v150_v22 = vld [vmem:[%s8100_s1 + $0x28] sm:$0xff]  ;;  %v152_v23 = vld [vmem:[%s8100_s1 + $0x38] sm:$0xff]  ;;  %v149_v25 = vld [vmem:[%s8100_s1 + $0x20] sm:$0xff]  ;;  %s6952_s25 = smov 64  }
  0x2a   :  { %v91_v11 = vsel %vm63_vm0, %v83_v8, 0.0  ;;  %v94_v15 = vsel %vm63_vm0, %v84_v13, 0.0  ;;  %v6125_v24 = vpack.c.bf16 %v152_v23, %v150_v22  ;;  %v151_v26 = vld [vmem:[%s8100_s1 + $0x30] sm:$0xff]  ;;  %v154_v28 = vld [vmem:[%s8100_s1 + $0x48] sm:$0xff]  ;;  %v156_v29 = vld [vmem:[%s8100_s1 + $0x58] sm:$0xff]  ;;  %vm378_vm1 = vcmask 130048  }
  0x2b   :  { %6122 = vmatprep.subr.bf16.mxu0 %v6121_v18  ;;  %6441 = vmatprep.subr.bf16.mxu1 %v6121_v18  ;;  %v6127_v27 = vpack.c.bf16 %v151_v26, %v149_v25  ;;  %v6129_v30 = vpack.c.bf16 %v156_v29, %v154_v28  ;;  %v153_v31 = vld [vmem:[%s8100_s1 + $0x40] sm:$0xff]  ;;  %v155_v32 = vld [vmem:[%s8100_s1 + $0x50] sm:$0xff]  ;;  %v158_v34 = vld [vmem:[%s8100_s1 + $0x68] sm:$0xff]  ;;  %s6953_s26 = smov 96  }
  0x2c   :  { %71 = vadd.xlane.f32.xlu1 %v70_v6  ;;  %86 = vadd.xlane.f32.xlu0 %v85_v7  ;;  %v6131_v33 = vpack.c.bf16 %v155_v32, %v153_v31  ;;  %v160_v35 = vld [vmem:[%s8100_s1 + $0x78] sm:$0xff]  ;;  %v157_v36 = vld [vmem:[%s8100_s1 + $0x60] sm:$0xff]  ;;  %v159_v38 = vld [vmem:[%s8100_s1 + $0x70] sm:$0xff]  ;;  %v7108_v7 = vshrl.u32 %v129_v58, 7 }
  0x2d   :  { %6124 = vmatpush1.bf16.msra.mxu0 %v6123_v21  ;;  %6445 = vmatpush1.bf16.msra.mxu1 %v6123_v21  ;;  %v6133_v37 = vpack.c.bf16 %v160_v35, %v158_v34  ;;  %v6135_v39 = vpack.c.bf16 %v159_v38, %v157_v36  ;;  %vm7163_vm2 = vmpackc.low %vm378_vm1, %vm378_vm1 }
  0x2e   :  { %6126 = vmatprep.subr.bf16.mxu0 %v6125_v24  ;;  %6442 = vmatprep.subr.bf16.mxu1 %v6125_v24  ;;  %v7111_v13 = vsub.s32 0, %v7108_v7  ;;  %v7117_v16 = vsub.s32 1, %v7108_v7 }
  0x30   :  { %92 = vadd.xlane.f32.xlu1 %v91_v11  ;;  %89 = vadd.xlane.f32.xlu0 %v88_v12 }
  0x31   :  { %6128 = vmatpush1.bf16.msra.mxu0 %v6127_v27  ;;  %6446 = vmatpush1.bf16.msra.mxu1 %v6127_v27 }
  0x32   :  { %6130 = vmatprep.subr.bf16.mxu0 %v6129_v30  ;;  %6443 = vmatprep.subr.bf16.mxu1 %v6129_v30 }
  0x34   :  { %74 = vadd.xlane.f32.xlu0 %v73_v14  ;;  %95 = vadd.xlane.f32.xlu1 %v94_v15  ;;  %v62_v15 = vld [vmem:[%s8106_s7] sm:$0x3f] }
  0x35   :  { %6132 = vmatpush1.bf16.msra.mxu0 %v6131_v33  ;;  %6447 = vmatpush1.bf16.msra.mxu1 %v6131_v33  ;;  %v132_v19 = vrot.slane %v62_v15, %v7111_v13  ;;  %v140_v22 = vrot.slane %v62_v15, %v7117_v16 }
  0x36   :  { %6134 = vmatprep.subr.bf16.mxu0 %v6133_v37  ;;  %6444 = vmatprep.subr.bf16.mxu1 %v6133_v37  ;;  %v161_v37 = vld [vmem:[%s8101_s2] sm:$0x3] }
  0x39   :  { %6136 = vmatpush1.bf16.msra.mxu0 %v6135_v39  ;;  %6448 = vmatpush1.bf16.msra.mxu1 %v6135_v39 }
  0xb5   :  { %v69_v41 = vpop.xlane.xlu1 %68  ;;  %v66_v42 = vpop.xlane.xlu0 %65 }
  0xb6   :  { %v77_v43 = vmul.f32 0.015625, %v66_v42  ;;  %v78_v46 = vmul.f32 0.015625, %v69_v41  ;;  %v170_v42 = vrot.slane %v161_v37, %v7117_v16 }
  0xb8   :  { %v101_v47 = vmul.f32 %v77_v43, %v77_v43  ;;  %v102_v54 = vmul.f32 %v78_v46, %v78_v46  ;;  %v113_v18 = vsub.f32 %v7032_v1, %v77_v43  ;;  %v114_v26 = vsub.f32 %v7030_v0, %v78_v46 }
  0xb9   :  { %v72_v44 = vpop.xlane.xlu1 %71  ;;  %v87_v45 = vpop.xlane.xlu0 %86 }
  0xba   :  { %v79_v48 = vmul.f32 0.015625, %v72_v44  ;;  %v97_v49 = vmul.f32 0.015625, %v87_v45 }
  0xbc   :  { %v103_v50 = vmul.f32 %v79_v48, %v79_v48  ;;  %v105_v51 = vsub.f32 %v97_v49, %v101_v47  ;;  %v115_v23 = vsub.f32 %v7034_v2, %v79_v48 }
  0xbd   :  { %v93_v52 = vpop.xlane.xlu1 %92  ;;  %v90_v53 = vpop.xlane.xlu0 %89 }
  0xbe   :  { %v109_v55 = vmax.f32 %v105_v51, 0.0  ;;  %v99_v56 = vmul.f32 0.015625, %v93_v52  ;;  %v98_v57 = vmul.f32 0.015625, %v90_v53 }
  0xc0   :  { %v117_v59 = vadd.f32 1e-06, %v109_v55  ;;  %v107_v60 = vsub.f32 %v99_v56, %v103_v50  ;;  %v106_v61 = vsub.f32 %v98_v57, %v102_v54 }
  0xc1   :  { %v75_v62 = vpop.xlane.xlu0 %74  ;;  %v96_v63 = vpop.xlane.xlu1 %95 }
  0xc2   :  { %6691 = vrsqrt.f32 %v117_v59  ;;  %v111_v3 = vmax.f32 %v107_v60, 0.0  ;;  %v110_v4 = vmax.f32 %v106_v61, 0.0  ;;  %v80_v5 = vmul.f32 0.015625, %v75_v62 }
  0xc3   :  { %v100_v6 = vmul.f32 0.015625, %v96_v63 }
  0xc4   :  { %v119_v8 = vadd.f32 1e-06, %v111_v3  ;;  %v118_v9 = vadd.f32 1e-06, %v110_v4  ;;  %v104_v11 = vmul.f32 %v80_v5, %v80_v5  ;;  %v116_v32 = vsub.f32 %v7049_v10, %v80_v5 }
  0xc5   :  { %v166_v10 = vrot.slane %v161_v37, %v7111_v13 }
  0xc6   :  { %6693 = vrsqrt.f32 %v119_v8  ;;  %v108_v12 = vsub.f32 %v100_v6, %v104_v11 }
  0xc7   :  { %6695 = vrsqrt.f32 %v118_v9 }
  0xc8   :  { %v112_v14 = vmax.f32 %v108_v12, 0.0 }
  0xca   :  { %v120_v17 = vadd.f32 1e-06, %v112_v14 }
  0xcc   :  { %v6692_v20 = vpop.eup %6691  ;;  %6697 = vrsqrt.f32 %v120_v17 }
  0xcd   :  { %v125_v21 = vmul.f32 %v6692_v20, %v113_v18 }
  0xcf   :  { %v133_v24 = vmul.f32 %v132_v19, %v125_v21 }
  0xd0   :  { %v6694_v25 = vpop.eup %6693 }
  0xd1   :  { %v6696_v27 = vpop.eup %6695  ;;  %v141_v28 = vadd.f32 %v140_v22, %v133_v24  ;;  %v127_v29 = vmul.f32 %v6694_v25, %v115_v23 }
  0xd2   :  { %v126_v30 = vmul.f32 %v6696_v27, %v114_v26 }
  0xd3   :  { %5268 = vmatmul.mubr.msk.f32.vlgmr.msra.gmra.mrb[0].mxu0 %vm63_vm0, %v141_v28  ;;  %v135_v1 = vmul.f32 %v132_v19, %v127_v29 }
  0xd4   :  { %255 = vmatprep.mubr.f32.mxu0 %v6949_v40  ;;  %v134_v31 = vmul.f32 %v132_v19, %v126_v30 }
  0xd5   :  { %v143_v33 = vadd.f32 %v140_v22, %v135_v1 }
  0xd6   :  { %v6698_v34 = vpop.eup %6697  ;;  %v142_v35 = vadd.f32 %v140_v22, %v134_v31 }
  0xd7   :  { %5270 = vmatmul.mubr.msk.f32.vlgmr.msra.gmra.mrb[0].mxu1 %vm63_vm0, %v143_v33  ;;  %v128_v2 = vmul.f32 %v6698_v34, %v116_v32 }
  0xd8   :  { %5269 = vmatmul.mubr.msk.f32.gmra.mrb[2].mxu0 %vm63_vm0, %v142_v35  ;;  %267 = vmatprep.mubr.f32.mxu1 %v6949_v40 }
  0xd9   :  { %v136_v0 = vmul.f32 %v132_v19, %v128_v2 }
  0xdb   :  { %v144_v36 = vadd.f32 %v140_v22, %v136_v0 }
  0xdd   :  { %5271 = vmatmul.mubr.msk.f32.gmra.mrb[2].mxu1 %vm63_vm0, %v144_v36 }
 0x1a6   :  { %v251_v38 = vpop.f32.mrb[0].mxu0 }
 0x1a7   :  { %v252_v39 = vadd.f32 %v251_v38, %v166_v10  ;;  %v253_v41 = vpop.f32.mrb[1].mxu0 }
 0x1a8   :  { %v254_v49 = vadd.f32 %v253_v41, %v170_v42 }
 0x1a9   :  { %v7136_v43 = vmul.f32 0.25, %v252_v39 }
 0x1aa   :  { %v263_v44 = vpop.f32.mrb[0].mxu1 }
 0x1ab   :  { %v257_v45 = vpop.f32.mrb[2].mxu0  ;;  %v265_v46 = vpop.f32.mrb[1].mxu1  ;;  %5701 = vmatprep.mubr.msk.f32.mxu1 %vm378_vm1, %v7136_v43  ;;  %v264_v55 = vadd.f32 %v263_v44, %v166_v10 }
 0x1ac   :  { %v258_v47 = vadd.f32 %v257_v45, %v166_v10  ;;  %v259_v48 = vpop.f32.mrb[3].mxu0  ;;  %v266_v58 = vadd.f32 %v265_v46, %v170_v42 }
 0x1ad   :  { %v260_v50 = vadd.f32 %v259_v48, %v170_v42  ;;  %v276_v19 = vmul.f32 0.25, %v264_v55 }
 0x1ae   :  { %v6491_v51 = vpack.i.bf16 %v258_v47, %v252_v39  ;;  %v275_v5 = vmul.f32 0.25, %v258_v47 }
 0x1af   :  { %v7140_v52 = vpack.i.bf16 %v260_v50, %v254_v49  ;;  %v7142_v53 = vpack.c.bf16 %v260_v50, %v254_v49 }
 0x1b0   :  { %6492 = vrot.lane.b32.xlu0 %v6491_v51, %s6950_s23  ;;  %v269_v54 = vpop.f32.mrb[2].mxu1 }
 0x1b1   :  { %v270_v56 = vadd.f32 %v269_v54, %v166_v10  ;;  %v271_v57 = vpop.f32.mrb[3].mxu1 }
 0x1b2   :  { %v272_v59 = vadd.f32 %v271_v57, %v170_v42 }
 0x1b3   :  { %v6496_v60 = vpack.i.bf16 %v270_v56, %v264_v55  ;;  %v277_v15 = vmul.f32 0.25, %v270_v56 }
 0x1b4   :  { %6512 = vrot.lane.b32.xlu0 %v6491_v51, %s6951_s24  ;;  %v7146_v61 = vpack.i.bf16 %v272_v59, %v266_v58  ;;  %v7148_v62 = vpack.c.bf16 %v272_v59, %v266_v58 }
 0x1b5   :  { %6497 = vrot.lane.b32.xlu1 %v6496_v60, %s6950_s23 }
 0x1b8   :  { %6522 = vrot.lane.b32.xlu0 %v6491_v51, %s6952_s25 }
 0x1b9   :  { %6502 = vrot.lane.b32.xlu1 %v6491_v51, %s6953_s26 }
 0x1bd   :  { %6507 = vrot.lane.b32.xlu1 %v6496_v60, %s6953_s26 }
 0x1c1   :  { %6517 = vrot.lane.b32.xlu1 %v6496_v60, %s6951_s24 }
 0x1c5   :  { %6527 = vrot.lane.b32.xlu1 %v6496_v60, %s6952_s25 }
 0x1c9   :  { %282 = vrot.lane.b32.xlu1 %v7136_v43, %s6950_s23 }
 0x222   :  { %v6493_v63 = vpop.permute.xlu0 %6492 }
 0x223   :  { %6532 = vrot.lane.b32.xlu0 %v6493_v63, %s6952_s25 }
 0x226   :  { %v6513_v3 = vpop.permute.xlu0 %6512 }
 0x227   :  { %v6498_v4 = vpop.permute.xlu1 %6497  ;;  %284 = vrot.lane.b32.xlu0 %v275_v5, %s6950_s23 }
 0x228   :  { %6537 = vrot.lane.b32.xlu1 %v6498_v4, %s6952_s25 }
 0x22a   :  { %v6523_v6 = vpop.permute.xlu0 %6522 }
 0x22b   :  { %v6525_v8 = vunpack.i.h.bf16 %v6523_v6  ;;  %v6524_v9 = vunpack.i.l.bf16 %v6523_v6  ;;  %v6503_v11 = vpop.permute.xlu1 %6502 }
 0x22c   :  { %288 = vrot.lane.b32.xlu1 %v277_v15, %s6950_s23  ;;  %6542 = vrot.lane.b32.xlu0 %v6503_v11, %s6952_s25 }
 0x22d   :  { %v6137_v14 = vpack.c.bf16 %v6525_v8, %v6524_v9 }
 0x22f   :  { %6139 = vmatprep.subr.msk.bf16.mxu1 %vm7163_vm2, %v6137_v14  ;;  %v6508_v17 = vpop.permute.xlu1 %6507 }
 0x230   :  { %6142 = vmatpush3.bf16.xpose.msk.msra.mxu1 %vm7163_vm2, %v6137_v14  ;;  %6547 = vrot.lane.b32.xlu1 %v6508_v17, %s6952_s25 }
 0x231   :  { %286 = vrot.lane.b32.xlu0 %v276_v19, %s6950_s23 }
 0x233   :  { %v6518_v18 = vpop.permute.xlu1 %6517 }
 0x234   :  { %290 = vrot.lane.b32.xlu1 %v7136_v43, %s6953_s26 }
 0x235   :  { %6552 = vrot.lane.b32.xlu0 %v6513_v3, %s6952_s25 }
 0x237   :  { %5702 = vmatmul.mubr.msk.f32.vlgmr.msra.gmra.mrb[4].mxu1 %vm378_vm1, %v275_v5  ;;  %v6528_v20 = vpop.permute.xlu1 %6527 }
 0x238   :  { %v6530_v21 = vunpack.i.h.bf16 %v6528_v20  ;;  %v6529_v22 = vunpack.i.l.bf16 %v6528_v20  ;;  %5708 = vmatprep.mubr.msk.f32.mxu1 %vm378_vm1, %v276_v19  ;;  %294 = vrot.lane.b32.xlu1 %v276_v19, %s6953_s26 }
 0x239   :  { %292 = vrot.lane.b32.xlu0 %v275_v5, %s6953_s26 }
 0x23a   :  { %v6143_v23 = vpack.c.bf16 %v6530_v21, %v6529_v22 }
 0x23b   :  { %v283_v24 = vpop.permute.xlu1 %282 }
 0x23c   :  { %6145 = vmatprep.subr.msk.bf16.mxu1 %vm7163_vm2, %v6143_v23  ;;  %6557 = vrot.lane.b32.xlu1 %v6518_v18, %s6952_s25 }
 0x23d   :  { %6148 = vmatpush3.bf16.xpose.msk.msra.mxu1 %vm7163_vm2, %v6143_v23  ;;  %296 = vrot.lane.b32.xlu0 %v277_v15, %s6953_s26 }
 0x240   :  { %300 = vrot.lane.b32.xlu1 %v275_v5, %s6951_s24 }
 0x241   :  { %298 = vrot.lane.b32.xlu0 %v7136_v43, %s6951_s24 }
 0x244   :  { %5709 = vmatmul.mubr.msk.f32.vlgmr.msra.gmra.mrb[6].mxu1 %vm378_vm1, %v277_v15  ;;  %304 = vrot.lane.b32.xlu1 %v277_v15, %s6951_s24 }
 0x245   :  { %5715 = vmatprep.mubr.msk.f32.mxu1 %vm378_vm1, %v283_v24  ;;  %302 = vrot.lane.b32.xlu0 %v276_v19, %s6951_s24 }
 0x248   :  { %6567 = vrot.lane.b32.xlu1 %v7146_v61, %s6950_s23 }
 0x249   :  { %6562 = vrot.lane.b32.xlu0 %v7140_v52, %s6950_s23 }
 0x295   :  { %v6533_v25 = vpop.permute.xlu0 %6532 }
 0x296   :  { %v6535_v26 = vunpack.i.h.bf16 %v6533_v25  ;;  %v6534_v27 = vunpack.i.l.bf16 %v6533_v25 }
 0x298   :  { %v6149_v28 = vpack.c.bf16 %v6535_v26, %v6534_v27 }
 0x299   :  { %v285_v30 = vpop.permute.xlu0 %284 }
 0x29a   :  { %6151 = vmatprep.subr.msk.bf16.mxu1 %vm7163_vm2, %v6149_v28  ;;  %v6538_v29 = vpop.permute.xlu1 %6537 }
 0x29b   :  { %v6540_v1 = vunpack.i.h.bf16 %v6538_v29  ;;  %v6539_v31 = vunpack.i.l.bf16 %v6538_v29  ;;  %6154 = vmatpush3.bf16.xpose.msk.msra.mxu1 %vm7163_vm2, %v6149_v28 }
 0x29d   :  { %v6155_v32 = vpack.c.bf16 %v6540_v1, %v6539_v31 }
 0x29e   :  { %v289_v33 = vpop.permute.xlu1 %288  ;;  %v6543_v34 = vpop.permute.xlu0 %6542 }
 0x29f   :  { %6157 = vmatprep.subr.msk.bf16.mxu0 %vm7163_vm2, %v6155_v32  ;;  %v6545_v35 = vunpack.i.h.bf16 %v6543_v34  ;;  %v6544_v2 = vunpack.i.l.bf16 %v6543_v34 }
 0x2a0   :  { %6160 = vmatpush3.bf16.xpose.msk.msra.mxu0 %vm7163_vm2, %v6155_v32 }
 0x2a1   :  { %v6161_v0 = vpack.c.bf16 %v6545_v35, %v6544_v2 }
 0x2a2   :  { %5716 = vmatmul.mubr.msk.f32.vlgmr.msra.gmra.mrb[8].mxu1 %vm378_vm1, %v285_v30  ;;  %v6548_v36 = vpop.permute.xlu1 %6547 }
 0x2a3   :  { %v6550_v37 = vunpack.i.h.bf16 %v6548_v36  ;;  %v6549_v10 = vunpack.i.l.bf16 %v6548_v36  ;;  %v287_v38 = vpop.permute.xlu0 %286  ;;  %6163 = vmatprep.subr.msk.bf16.mxu1 %vm7163_vm2, %v6161_v0 }
 0x2a4   :  { %5722 = vmatprep.mubr.msk.f32.mxu0 %vm378_vm1, %v287_v38  ;;  %6166 = vmatpush3.bf16.xpose.msk.msra.mxu1 %vm7163_vm2, %v6161_v0 }
 0x2a5   :  { %v6167_v39 = vpack.c.bf16 %v6550_v37, %v6549_v10 }
 0x2a6   :  { %v291_v41 = vpop.permute.xlu1 %290 }
 0x2a7   :  { %v6553_v42 = vpop.permute.xlu0 %6552  ;;  %5723 = vmatmul.mubr.msk.f32.vlgmr.msra.gmra.mrb[4].mxu0 %vm378_vm1, %v289_v33  ;;  %5729 = vmatprep.mubr.msk.f32.mxu1 %vm378_vm1, %v291_v41 }
 0x2a8   :  { %v6555_v43 = vunpack.i.h.bf16 %v6553_v42  ;;  %v6554_v44 = vunpack.i.l.bf16 %v6553_v42  ;;  %6169 = vmatprep.subr.msk.bf16.mxu0 %vm7163_vm2, %v6167_v39 }
 0x2a9   :  { %6172 = vmatpush3.bf16.xpose.msk.msra.mxu0 %vm7163_vm2, %v6167_v39 }
 0x2aa   :  { %v6173_v45 = vpack.c.bf16 %v6555_v43, %v6554_v44  ;;  %v295_v46 = vpop.permute.xlu1 %294 }
 0x2ab   :  { %v293_v47 = vpop.permute.xlu0 %292  ;;  %5736 = vmatprep.mubr.msk.f32.mxu0 %vm378_vm1, %v295_v46 }
 0x2ac   :  { %5730 = vmatmul.mubr.msk.f32.vlgmr.msra.gmra.mrb[10].mxu1 %vm378_vm1, %v293_v47  ;;  %6175 = vmatprep.subr.msk.bf16.mxu1 %vm7163_vm2, %v6173_v45 }
 0x2ad   :  { %6178 = vmatpush3.bf16.xpose.msk.msra.mxu1 %vm7163_vm2, %v6173_v45 }
 0x2ae   :  { %6186 = vmatprep.subr.bf16.mxu1 %v7142_v53  ;;  %v6558_v48 = vpop.permute.xlu1 %6557 }
 0x2af   :  { %v6560_v49 = vunpack.i.h.bf16 %v6558_v48  ;;  %v6559_v50 = vunpack.i.l.bf16 %v6558_v48  ;;  %v297_v51 = vpop.permute.xlu0 %296 }
 0x2b0   :  { %5737 = vmatmul.mubr.msk.f32.vlgmr.msra.gmra.mrb[6].mxu0 %vm378_vm1, %v297_v51 }
 0x2b1   :  { %v6179_v54 = vpack.c.bf16 %v6560_v49, %v6559_v50 }
 0x2b2   :  { %v301_v55 = vpop.permute.xlu1 %300 }
 0x2b3   :  { %v299_v56 = vpop.permute.xlu0 %298  ;;  %6181 = vmatprep.subr.msk.bf16.mxu0 %vm7163_vm2, %v6179_v54 }
 0x2b4   :  { %5743 = vmatprep.mubr.msk.f32.mxu1 %vm378_vm1, %v299_v56  ;;  %6184 = vmatpush3.bf16.xpose.msk.msra.mxu0 %vm7163_vm2, %v6179_v54 }
 0x2b5   :  { %5744 = vmatmul.mubr.msk.f32.vlgmr.msra.gmra.mrb[12].mxu1 %vm378_vm1, %v301_v55 }
 0x2b6   :  { %6188 = vmatpush3.bf16.msra.mxu1 %v7142_v53  ;;  %v305_v58 = vpop.permute.xlu1 %304 }
 0x2b7   :  { %6190 = vmatprep.subr.bf16.mxu1 %v7148_v62  ;;  %v303_v57 = vpop.permute.xlu0 %302 }
 0x2b8   :  { %5750 = vmatprep.mubr.msk.f32.mxu0 %vm378_vm1, %v303_v57 }
 0x2ba   :  { %v7293_v10 = vpop.permute.xlu1 %6567 }
 0x2bb   :  { %v6563_v59 = vpop.permute.xlu0 %6562  ;;  %5751 = vmatmul.mubr.msk.f32.vlgmr.msra.gmra.mrb[8].mxu0 %vm378_vm1, %v305_v58 }
 0x2bc   :  { %v6565_v60 = vunpack.i.h.bf16 %v6563_v59  ;;  %v6564_v63 = vunpack.i.l.bf16 %v6563_v59 }
 0x2be   :  { %v6193_v3 = vpack.c.bf16 %v6565_v60, %v6564_v63 }
 0x2c0   :  { %6194 = vmatprep.subr.bf16.mxu0 %v6193_v3 }
 0x2c1   :  { %6196 = vmatpush3.bf16.msra.mxu0 %v6193_v3 }
 0x30a   :  { %v5703_v4 = vpop.f32.mrb[4].mxu1 }
 0x30b   :  { %v453_v5 = vpop.f32.mrb[5].mxu1  ;;  %v1074_v6 = vsel %vm378_vm1, %v5703_v4, -inf }
 0x30c   :  { %1075 = vmax.xlane.f32.xlu1 %v1074_v6  ;;  %v1071_v53 = vsel %vm378_vm1, %v453_v5, -inf }
 0x30d   :  { %1072 = vmax.xlane.f32.xlu0 %v1071_v53 }
 0x317   :  { %v5710_v8 = vpop.f32.mrb[6].mxu1 }
 0x318   :  { %v540_v9 = vpop.f32.mrb[7].mxu1  ;;  %v1080_v11 = vsel %vm378_vm1, %v5710_v8, -inf }
 0x319   :  { %1081 = vmax.xlane.f32.xlu0 %v1080_v11  ;;  %v1077_v14 = vsel %vm378_vm1, %v540_v9, -inf }
 0x31d   :  { %1078 = vmax.xlane.f32.xlu0 %v1077_v14 }
 0x375   :  { %v7241_v15 = vpop.f32.mrb[8].mxu1 }
 0x376   :  { %v7243_v17 = vpop.f32.mrb[9].mxu1  ;;  %v1086_v18 = vsel %vm378_vm1, %v7241_v15, -inf }
 0x377   :  { %1087 = vmax.xlane.f32.xlu1 %v1086_v18  ;;  %v1083_v19 = vsel %vm378_vm1, %v7243_v17, -inf }
 0x378   :  { %1084 = vmax.xlane.f32.xlu0 %v1083_v19 }
 0x37a   :  { %v7249_v20 = vpop.f32.mrb[4].mxu0 }
 0x37b   :  { %v7251_v21 = vpop.f32.mrb[5].mxu0  ;;  %v1092_v22 = vsel %vm378_vm1, %v7249_v20, -inf }
 0x37c   :  { %1093 = vmax.xlane.f32.xlu1 %v1092_v22  ;;  %v1089_v23 = vsel %vm378_vm1, %v7251_v21, -inf }
 0x37d   :  { %1090 = vmax.xlane.f32.xlu0 %v1089_v23 }
 0x37f   :  { %v7257_v24 = vpop.f32.mrb[10].mxu1 }
 0x380   :  { %v7259_v25 = vpop.f32.mrb[11].mxu1  ;;  %v1098_v26 = vsel %vm378_vm1, %v7257_v24, -inf }
 0x381   :  { %1099 = vmax.xlane.f32.xlu1 %v1098_v26  ;;  %v1095_v27 = vsel %vm378_vm1, %v7259_v25, -inf }
 0x382   :  { %1096 = vmax.xlane.f32.xlu0 %v1095_v27 }
 0x383   :  { %v7265_v28 = vpop.f32.mrb[6].mxu0 }
 0x384   :  { %v7267_v29 = vpop.f32.mrb[7].mxu0  ;;  %v1104_v30 = vsel %vm378_vm1, %v7265_v28, -inf }
 0x385   :  { %1105 = vmax.xlane.f32.xlu1 %v1104_v30  ;;  %v1101_v1 = vsel %vm378_vm1, %v7267_v29, -inf }
 0x386   :  { %1102 = vmax.xlane.f32.xlu0 %v1101_v1 }
 0x388   :  { %v7273_v31 = vpop.f32.mrb[12].mxu1 }
 0x389   :  { %v7275_v32 = vpop.f32.mrb[13].mxu1  ;;  %v1110_v33 = vsel %vm378_vm1, %v7273_v31, -inf }
 0x38a   :  { %1111 = vmax.xlane.f32.xlu1 %v1110_v33  ;;  %v1107_v34 = vsel %vm378_vm1, %v7275_v32, -inf }
 0x38b   :  { %1108 = vmax.xlane.f32.xlu0 %v1107_v34 }
 0x38e   :  { %v7281_v35 = vpop.f32.mrb[8].mxu0 }
 0x38f   :  { %v7283_v2 = vpop.f32.mrb[9].mxu0  ;;  %v1116_v0 = vsel %vm378_vm1, %v7281_v35, -inf }
 0x390   :  { %1117 = vmax.xlane.f32.xlu1 %v1116_v0  ;;  %v1113_v36 = vsel %vm378_vm1, %v7283_v2, -inf }
 0x391   :  { %1114 = vmax.xlane.f32.xlu0 %v1113_v36 }
 0x399   :  { %v1076_v39 = vpop.xlane.xlu1 %1075 }
 0x39a   :  { %v1073_v37 = vpop.xlane.xlu0 %1072  ;;  %v1120_v41 = vsub.f32 %v5703_v4, %v1076_v39 }
 0x39b   :  { %v1119_v42 = vsub.f32 %v453_v5, %v1073_v37 }
 0x39c   :  { %v1137_v44 = vmul.f32 1.442695, %v1120_v41 }
 0x39d   :  { %v1135_v46 = vmul.f32 1.442695, %v1119_v42 }
 0x39e   :  { %6699 = vpow2.f32 %v1137_v44 }
 0x39f   :  { %6701 = vpow2.f32 %v1135_v46 }
 0x3a1   :  { %6577 = vrot.lane.b32.xlu1 %v7146_v61, %s6953_s26 }
 0x3a6   :  { %v1082_v38 = vpop.xlane.xlu0 %1081 }
 0x3a7   :  { %6572 = vrot.lane.b32.xlu0 %v7140_v52, %s6953_s26  ;;  %v1122_v45 = vsub.f32 %v5710_v8, %v1082_v38 }
 0x3a8   :  { %v7295_v50 = vpop.eup %6699 }
 0x3a9   :  { %v1141_v48 = vmul.f32 1.442695, %v1122_v45  ;;  %v7297_v51 = vpop.eup %6701  ;;  %v1170_v54 = vsel %vm378_vm1, %v7295_v50, 0.0 }
 0x3aa   :  { %v1079_v43 = vpop.xlane.xlu0 %1078  ;;  %v1167_v56 = vsel %vm378_vm1, %v7297_v51, 0.0 }
 0x3ab   :  { %v1121_v47 = vsub.f32 %v540_v9, %v1079_v43  ;;  %6703 = vpow2.f32 %v1141_v48 }
 0x3ad   :  { %v1139_v49 = vmul.f32 1.442695, %v1121_v47 }
 0x3af   :  { %6705 = vpow2.f32 %v1139_v49 }
 0x3b5   :  { %v7301_v55 = vpop.eup %6703 }
 0x3b6   :  { %v1176_v58 = vsel %vm378_vm1, %v7301_v55, 0.0 }
 0x3b9   :  { %v7305_v57 = vpop.eup %6705 }
 0x3ba   :  { %v1173_v59 = vsel %vm378_vm1, %v7305_v57, 0.0 }
 0x3c5   :  { %1171 = vadd.xlane.f32.xlu1 %v1170_v54 }
 0x3c6   :  { %1168 = vadd.xlane.f32.xlu0 %v1167_v56 }
 0x3c9   :  { %1177 = vadd.xlane.f32.xlu1 %v1176_v58 }
 0x3ca   :  { %1174 = vadd.xlane.f32.xlu0 %v1173_v59 }
 0x404   :  { %v1088_v60 = vpop.xlane.xlu1 %1087 }
 0x405   :  { %v1124_v63 = vsub.f32 %v7241_v15, %v1088_v60  ;;  %v1085_v3 = vpop.xlane.xlu0 %1084 }
 0x406   :  { %v1123_v4 = vsub.f32 %v7243_v17, %v1085_v3 }
 0x407   :  { %v1145_v5 = vmul.f32 1.442695, %v1124_v63 }
 0x408   :  { %v1143_v6 = vmul.f32 1.442695, %v1123_v4 }
 0x409   :  { %6707 = vpow2.f32 %v1145_v5  ;;  %v1094_v53 = vpop.xlane.xlu1 %1093 }
 0x40a   :  { %6709 = vpow2.f32 %v1143_v6  ;;  %v1126_v8 = vsub.f32 %v7249_v20, %v1094_v53  ;;  %v1091_v9 = vpop.xlane.xlu0 %1090 }
 0x40b   :  { %v1125_v11 = vsub.f32 %v7251_v21, %v1091_v9 }
 0x40c   :  { %v1149_v14 = vmul.f32 1.442695, %v1126_v8 }
 0x40d   :  { %v1147_v18 = vmul.f32 1.442695, %v1125_v11 }
 0x40e   :  { %6711 = vpow2.f32 %v1149_v14  ;;  %v1100_v19 = vpop.xlane.xlu1 %1099 }
 0x40f   :  { %6713 = vpow2.f32 %v1147_v18  ;;  %v1128_v15 = vsub.f32 %v7257_v24, %v1100_v19  ;;  %v1097_v22 = vpop.xlane.xlu0 %1096 }
 0x410   :  { %v1127_v17 = vsub.f32 %v7259_v25, %v1097_v22 }
 0x411   :  { %v1153_v23 = vmul.f32 1.442695, %v1128_v15 }
 0x412   :  { %v1151_v26 = vmul.f32 1.442695, %v1127_v17  ;;  %v1106_v27 = vpop.xlane.xlu1 %1105 }
 0x413   :  { %v7317_v30 = vpop.eup %6707  ;;  %6715 = vpow2.f32 %v1153_v23  ;;  %v1130_v20 = vsub.f32 %v7265_v28, %v1106_v27  ;;  %v1103_v1 = vpop.xlane.xlu0 %1102 }
 0x414   :  { %v7320_v21 = vpop.eup %6709  ;;  %6717 = vpow2.f32 %v1151_v26  ;;  %v1129_v33 = vsub.f32 %v7267_v29, %v1103_v1  ;;  %v1182_v24 = vsel %vm378_vm1, %v7317_v30, 0.0  ;;  %v6570_v1 = vunpack.i.h.bf16 %v7293_v10 }
 0x415   :  { %v1157_v34 = vmul.f32 1.442695, %v1130_v20  ;;  %1183 = vadd.xlane.f32.xlu1 %v1182_v24  ;;  %v1179_v25 = vsel %vm378_vm1, %v7320_v21, 0.0 }
 0x416   :  { %v1155_v0 = vmul.f32 1.442695, %v1129_v33  ;;  %1180 = vadd.xlane.f32.xlu0 %v1179_v25  ;;  %v6569_v33 = vunpack.i.l.bf16 %v7293_v10 }
 0x417   :  { %6719 = vpow2.f32 %v1157_v34  ;;  %v1112_v36 = vpop.xlane.xlu1 %1111 }
 0x418   :  { %v7327_v37 = vpop.eup %6711  ;;  %6721 = vpow2.f32 %v1155_v0  ;;  %v1132_v28 = vsub.f32 %v7273_v31, %v1112_v36  ;;  %v1109_v38 = vpop.xlane.xlu0 %1108  ;;  %v6197_v36 = vpack.c.bf16 %v6570_v1, %v6569_v33 }
 0x419   :  { %v7330_v39 = vpop.eup %6713  ;;  %v1131_v29 = vsub.f32 %v7275_v32, %v1109_v38  ;;  %v1188_v41 = vsel %vm378_vm1, %v7327_v37, 0.0 }
 0x41a   :  { %v1161_v42 = vmul.f32 1.442695, %v1132_v28  ;;  %1189 = vadd.xlane.f32.xlu1 %v1188_v41  ;;  %v1185_v43 = vsel %vm378_vm1, %v7330_v39, 0.0 }
 0x41b   :  { %v1159_v44 = vmul.f32 1.442695, %v1131_v29  ;;  %1186 = vadd.xlane.f32.xlu0 %v1185_v43 }
 0x41c   :  { %6723 = vpow2.f32 %v1161_v42 }
 0x41d   :  { %v7337_v45 = vpop.eup %6715  ;;  %6725 = vpow2.f32 %v1159_v44  ;;  %v1118_v31 = vpop.xlane.xlu1 %1117 }
 0x41e   :  { %v7339_v46 = vpop.eup %6717  ;;  %v1134_v47 = vsub.f32 %v7281_v35, %v1118_v31  ;;  %v1194_v32 = vsel %vm378_vm1, %v7337_v45, 0.0  ;;  %v1115_v48 = vpop.xlane.xlu0 %1114 }
 0x41f   :  { %1195 = vadd.xlane.f32.xlu1 %v1194_v32  ;;  %v1133_v49 = vsub.f32 %v7283_v2, %v1115_v48  ;;  %v1191_v54 = vsel %vm378_vm1, %v7339_v46, 0.0 }
 0x420   :  { %v1165_v56 = vmul.f32 1.442695, %v1134_v47  ;;  %1192 = vadd.xlane.f32.xlu0 %v1191_v54 }
 0x421   :  { %v7347_v58 = vpop.eup %6719  ;;  %v1163_v59 = vmul.f32 1.442695, %v1133_v49  ;;  %v6578_v15 = vpop.permute.xlu1 %6577 }
 0x422   :  { %v7349_v60 = vpop.eup %6721  ;;  %6727 = vpow2.f32 %v1165_v56  ;;  %v1200_v35 = vsel %vm378_vm1, %v7347_v58, 0.0  ;;  %v6573_v63 = vpop.permute.xlu0 %6572  ;;  %v6580_v25 = vunpack.i.h.bf16 %v6578_v15  ;;  %v6579_v0 = vunpack.i.l.bf16 %v6578_v15 }
 0x423   :  { %1201 = vadd.xlane.f32.xlu1 %v1200_v35  ;;  %v6575_v3 = vunpack.i.h.bf16 %v6573_v63  ;;  %v6574_v4 = vunpack.i.l.bf16 %v6573_v63  ;;  %v1197_v2 = vsel %vm378_vm1, %v7349_v60, 0.0  ;;  %6729 = vpow2.f32 %v1163_v59 }
 0x424   :  { %1198 = vadd.xlane.f32.xlu0 %v1197_v2 }
 0x425   :  { %v7355_v5 = vpack.c.bf16 %v6575_v3, %v6574_v4 }
 0x426   :  { %v7357_v6 = vpop.eup %6723 }
 0x427   :  { %v7359_v53 = vpop.eup %6725  ;;  %v1206_v8 = vsel %vm378_vm1, %v7357_v6, 0.0  ;;  %6202 = vmatprep.subr.bf16.mxu0 %v7355_v5 }
 0x428   :  { %1207 = vadd.xlane.f32.xlu1 %v1206_v8  ;;  %v1203_v9 = vsel %vm378_vm1, %v7359_v53, 0.0 }
 0x429   :  { %1204 = vadd.xlane.f32.xlu0 %v1203_v9 }
 0x42c   :  { %v7366_v11 = vpop.eup %6727 }
 0x42d   :  { %v1212_v14 = vsel %vm378_vm1, %v7366_v11, 0.0  ;;  %v7370_v18 = vpop.eup %6729 }
 0x42e   :  { %1213 = vadd.xlane.f32.xlu1 %v1212_v14  ;;  %v1209_v19 = vsel %vm378_vm1, %v7370_v18, 0.0 }
 0x432   :  { %1210 = vadd.xlane.f32.xlu1 %v1209_v19 }
 0x43f   :  { %6582 = vrot.lane.b32.xlu0 %v7140_v52, %s6951_s24 }
 0x443   :  { %6587 = vrot.lane.b32.xlu1 %v7146_v61, %s6951_s24 }
 0x452   :  { %v1172_v22 = vpop.xlane.xlu1 %1171 }
 0x453   :  { %6731 = vrcp.f32 %v1172_v22  ;;  %v1169_v17 = vpop.xlane.xlu0 %1168 }
 0x454   :  { %6733 = vrcp.f32 %v1169_v17  ;;  %v1897_v17 = vld [vmem:[%s8102_s3 + $0x10] sm:$0xff] }
 0x456   :  { %v1178_v23 = vpop.xlane.xlu1 %1177 }
 0x457   :  { %6735 = vrcp.f32 %v1178_v23  ;;  %v1175_v26 = vpop.xlane.xlu0 %1174 }
 0x458   :  { %6737 = vrcp.f32 %v1175_v26 }
 0x45d   :  { %v6732_v27 = vpop.eup %6731 }
 0x45e   :  { %v6734_v20 = vpop.eup %6733  ;;  %v1232_v24 = vmul.f32 %v6732_v27, %v7295_v50  ;;  %v6205_v50 = vpack.c.bf16 %v6580_v25, %v6579_v0  ;;  %v1900_v25 = vld [vmem:[%s8102_s3 + $0x28] sm:$0xff] }
 0x45f   :  { %v1231_v52 = vmul.f32 %v6734_v20, %v7297_v51 }
 0x461   :  { %v6736_v61 = vpop.eup %6735  ;;  %5757 = vmatprep.mubr.msk.f32.mxu1 %vm378_vm1, %v1231_v52 }
 0x462   :  { %v6738_v34 = vpop.eup %6737  ;;  %5758 = vmatmul.mubr.msk.f32.vlgmr.msra.gmra.mrb[14].mxu1 %vm378_vm1, %v1232_v24  ;;  %v1234_v10 = vmul.f32 %v6736_v61, %v7301_v55 }
 0x463   :  { %6192 = vmatpush3.bf16.msra.mxu1 %v7148_v62  ;;  %v1233_v28 = vmul.f32 %v6738_v34, %v7305_v57 }
 0x464   :  { %6198 = vmatprep.subr.bf16.mxu1 %v6197_v36 }
 0x465   :  { %5764 = vmatprep.mubr.msk.f32.mxu1 %vm378_vm1, %v1233_v28 }
 0x466   :  { %5765 = vmatmul.mubr.msk.f32.vlgmr.msra.gmra.mrb[16].mxu1 %vm378_vm1, %v1234_v10  ;;  %v1901_v10 = vld [vmem:[%s8102_s3 + $0x30] sm:$0xff] }
 0x467   :  { %6200 = vmatpush3.bf16.msra.mxu1 %v6197_v36 }
 0x468   :  { %6206 = vmatprep.subr.bf16.mxu1 %v6205_v50 }
 0x4a2   :  { %v1184_v51 = vpop.xlane.xlu1 %1183 }
 0x4a3   :  { %6739 = vrcp.f32 %v1184_v51  ;;  %v1181_v38 = vpop.xlane.xlu0 %1180 }
 0x4a4   :  { %6741 = vrcp.f32 %v1181_v38 }
 0x4a7   :  { %v1190_v29 = vpop.xlane.xlu1 %1189 }
 0x4a8   :  { %6743 = vrcp.f32 %v1190_v29  ;;  %v1187_v41 = vpop.xlane.xlu0 %1186 }
 0x4a9   :  { %6745 = vrcp.f32 %v1187_v41 }
 0x4ac   :  { %v1196_v62 = vpop.xlane.xlu1 %1195 }
 0x4ad   :  { %v6740_v57 = vpop.eup %6739  ;;  %6747 = vrcp.f32 %v1196_v62  ;;  %v1193_v42 = vpop.xlane.xlu0 %1192 }
 0x4ae   :  { %v6742_v55 = vpop.eup %6741  ;;  %6749 = vrcp.f32 %v1193_v42  ;;  %v1236_v31 = vmul.f32 %v6740_v57, %v7317_v30 }
 0x4af   :  { %v1235_v43 = vmul.f32 %v6742_v55, %v7320_v21 }
 0x4b0   :  { %v1202_v44 = vpop.xlane.xlu1 %1201 }
 0x4b1   :  { %6751 = vrcp.f32 %v1202_v44  ;;  %5771 = vmatprep.mubr.msk.f32.mxu0 %vm378_vm1, %v1235_v43  ;;  %v1199_v47 = vpop.xlane.xlu0 %1198 }
 0x4b2   :  { %v6744_v32 = vpop.eup %6743  ;;  %6753 = vrcp.f32 %v1199_v47  ;;  %5772 = vmatmul.mubr.msk.f32.vlgmr.msra.gmra.mrb[10].mxu0 %vm378_vm1, %v1236_v31 }
 0x4b3   :  { %v6746_v48 = vpop.eup %6745  ;;  %6204 = vmatpush3.bf16.msra.mxu0 %v7355_v5  ;;  %v1238_v56 = vmul.f32 %v6744_v32, %v7327_v37  ;;  %v1896_v37 = vld [vmem:[%s8102_s3 + $0x8] sm:$0xff] }
 0x4b4   :  { %v1237_v49 = vmul.f32 %v6746_v48, %v7330_v39  ;;  %v1895_v39 = vld [vmem:[%s8102_s3] sm:$0xff]  ;;  %v2002_v48 = vsub.s32 2, %v7108_v7 }
 0x4b5   :  { %v1208_v54 = vpop.xlane.xlu1 %1207  ;;  %v6217_v14 = vpack.c.bf16 %v1896_v37, %v1895_v39 }
 0x4b6   :  { %6755 = vrcp.f32 %v1208_v54  ;;  %v1205_v21 = vpop.xlane.xlu0 %1204  ;;  %5778 = vmatprep.mubr.msk.f32.mxu1 %vm378_vm1, %v1237_v49  ;;  %v7459_v49 = vld [vmem:[%s8106_s7] sm:$0x3f] }
 0x4b7   :  { %v6748_v30 = vpop.eup %6747  ;;  %6757 = vrcp.f32 %v1205_v21  ;;  %5779 = vmatmul.mubr.msk.f32.vlgmr.msra.gmra.mrb[18].mxu1 %vm378_vm1, %v1238_v56  ;;  %v2003_v54 = vrot.slane %v7459_v49, %v2002_v48 }
 0x4b8   :  { %v6750_v59 = vpop.eup %6749  ;;  %6208 = vmatpush3.bf16.msra.mxu1 %v6205_v50  ;;  %v1240_v63 = vmul.f32 %v6748_v30, %v7337_v45  ;;  %v1902_v50 = vld [vmem:[%s8102_s3 + $0x38] sm:$0xff] }
 0x4b9   :  { %v1239_v35 = vmul.f32 %v6750_v59, %v7339_v46  ;;  %v6229_v29 = vpack.c.bf16 %v1902_v50, %v1901_v10 }
 0x4ba   :  { %v6583_v3 = vpop.permute.xlu0 %6582 }
 0x4bb   :  { %v6752_v4 = vpop.eup %6751  ;;  %v6585_v2 = vunpack.i.h.bf16 %v6583_v3  ;;  %v6584_v5 = vunpack.i.l.bf16 %v6583_v3  ;;  %5785 = vmatprep.mubr.msk.f32.mxu0 %vm378_vm1, %v1239_v35  ;;  %v1214_v8 = vpop.xlane.xlu1 %1213  ;;  %v6868_v35 = vld [vmem:[#allocation2 + $0x8] sm:$0xff]  ;;  %v6869_v3 = vld [vmem:[#allocation2] sm:$0xff] }
 0x4bc   :  { %v6754_v9 = vpop.eup %6753  ;;  %5786 = vmatmul.mubr.msk.f32.vlgmr.msra.gmra.mrb[12].mxu0 %vm378_vm1, %v1240_v63  ;;  %v1242_v19 = vmul.f32 %v6752_v4, %v7347_v58  ;;  %6759 = vrcp.f32 %v1214_v8 }
 0x4bd   :  { %v6209_v46 = vpack.c.bf16 %v6585_v2, %v6584_v5  ;;  %v1241_v45 = vmul.f32 %v6754_v9, %v7349_v60  ;;  %v1898_v60 = vld [vmem:[%s8102_s3 + $0x18] sm:$0xff] }
 0x4be   :  { %v6221_v20 = vpack.c.bf16 %v1898_v60, %v1897_v17 }
 0x4bf   :  { %5792 = vmatprep.mubr.msk.f32.mxu1 %vm378_vm1, %v1241_v45  ;;  %6210 = vmatprep.subr.bf16.mxu0 %v6209_v46  ;;  %v1211_v15 = vpop.xlane.xlu1 %1210 }
 0x4c0   :  { %v6756_v22 = vpop.eup %6755  ;;  %6761 = vrcp.f32 %v1211_v15  ;;  %5793 = vmatmul.mubr.msk.f32.vlgmr.msra.gmra.mrb[20].mxu1 %vm378_vm1, %v1242_v19  ;;  %6212 = vmatpush3.bf16.msra.mxu0 %v6209_v46  ;;  %v6870_v19 = vld [vmem:[#allocation2 + $0x18] sm:$0xff] }
 0x4c1   :  { %v6758_v23 = vpop.eup %6757  ;;  %6218 = vmatprep.subr.bf16.mxu0 %v6217_v14  ;;  %v1244_v26 = vmul.f32 %v6756_v22, %v7357_v6  ;;  %v1899_v6 = vld [vmem:[%s8102_s3 + $0x20] sm:$0xff]  ;;  %v6871_v22 = vld [vmem:[#allocation2 + $0x10] sm:$0xff] }
 0x4c2   :  { %v1243_v58 = vmul.f32 %v6758_v23, %v7359_v53  ;;  %v6225_v28 = vpack.c.bf16 %v1900_v25, %v1899_v6  ;;  %v2399_v6 = vld [vmem:[#allocation5 + $0x20] sm:$0xff]  ;;  %v2400_v25 = vld [vmem:[#allocation5 + $0x28] sm:$0xff] }
 0x4c3   :  { %v6588_v27 = vpop.permute.xlu1 %6587 }
 0x4c4   :  { %v6590_v1 = vunpack.i.h.bf16 %v6588_v27  ;;  %v6589_v33 = vunpack.i.l.bf16 %v6588_v27  ;;  %5799 = vmatprep.mubr.msk.f32.mxu0 %vm378_vm1, %v1243_v58 }
 0x4c5   :  { %5800 = vmatmul.mubr.msk.f32.vlgmr.msra.gmra.mrb[14].mxu0 %vm378_vm1, %v1244_v26 }
 0x4c6   :  { %v6213_v52 = vpack.c.bf16 %v6590_v1, %v6589_v33  ;;  %6220 = vmatpush3.bf16.msra.mxu0 %v6217_v14  ;;  %v6760_v24 = vpop.eup %6759  ;;  %v2395_v33 = vld [vmem:[#allocation5] sm:$0xff] }
 0x4c7   :  { %6222 = vmatprep.subr.bf16.mxu0 %v6221_v20  ;;  %v1246_v53 = vmul.f32 %v6760_v24, %v7366_v11 }
 0x4c8   :  { %6214 = vmatprep.subr.bf16.mxu1 %v6213_v52 }
 0x4c9   :  { %6216 = vmatpush3.bf16.msra.mxu1 %v6213_v52  ;;  %v2396_v52 = vld [vmem:[#allocation5 + $0x8] sm:$0xff] }
 0x4ca   :  { %v6762_v61 = vpop.eup %6761  ;;  %v6233_v24 = vpack.c.bf16 %v2396_v52, %v2395_v33 }
 0x4cb   :  { %v1245_v34 = vmul.f32 %v6762_v61, %v7370_v18  ;;  %v2397_v61 = vld [vmem:[#allocation5 + $0x10] sm:$0xff] }
 0x4cc   :  { %6234 = vmatprep.subr.bf16.mxu1 %v6233_v24 }
 0x4cd   :  { %5806 = vmatprep.mubr.msk.f32.mxu1 %vm378_vm1, %v1245_v34  ;;  %v2398_v34 = vld [vmem:[#allocation5 + $0x18] sm:$0xff] }
 0x4ce   :  { %5807 = vmatmul.mubr.msk.f32.vlgmr.msra.gmra.mrb[22].mxu1 %vm378_vm1, %v1246_v53  ;;  %v6237_v53 = vpack.c.bf16 %v2398_v34, %v2397_v61 }
 0x4cf   :  { %6236 = vmatpush3.bf16.msra.mxu1 %v6233_v24 }
 0x4d0   :  { %6238 = vmatprep.subr.bf16.mxu1 %v6237_v53 }
 0x4d3   :  { %6240 = vmatpush3.bf16.msra.mxu1 %v6237_v53 }
 0x535   :  { %v5759_v0 = vpop.f32.mrb[14].mxu1 }
 0x536   :  { %v1319_v36 = vpop.f32.mrb[15].mxu1 }
 0x537   :  { %5813 = vmatprep.mubr.msk.f32.mxu0 %vm378_vm1, %v1319_v36  ;;  %v6241_v36 = vpack.c.bf16 %v2400_v25, %v2399_v6 }
 0x538   :  { %5814 = vmatmul.mubr.msk.f32.vlgmr.msra.gmra.mrb[16].mxu0 %vm378_vm1, %v5759_v0  ;;  %v2401_v0 = vld [vmem:[#allocation5 + $0x30] sm:$0xff] }
 0x539   :  { %v5766_v11 = vpop.f32.mrb[16].mxu1  ;;  %6224 = vmatpush3.bf16.msra.mxu0 %v6221_v20  ;;  %6242 = vmatprep.subr.bf16.mxu1 %v6241_v36 }
 0x53a   :  { %v1400_v18 = vpop.f32.mrb[17].mxu1  ;;  %6226 = vmatprep.subr.bf16.mxu0 %v6225_v28  ;;  %6244 = vmatpush3.bf16.msra.mxu1 %v6241_v36 }
 0x53b   :  { %5816 = vmatprep.mubr.msk.f32.mxu0 %vm378_vm1, %v1400_v18 }
 0x53c   :  { %5817 = vmatmul.mubr.msk.f32.gmra.mrb[18].mxu0 %vm378_vm1, %v5766_v11 }
 0x585   :  { %v5773_v51 = vpop.f32.mrb[10].mxu0 }
 0x586   :  { %v1481_v38 = vpop.f32.mrb[11].mxu0 }
 0x587   :  { %5823 = vmatprep.mubr.msk.f32.mxu0 %vm378_vm1, %v1481_v38 }
 0x588   :  { %5824 = vmatmul.mubr.msk.f32.vlgmr.msra.gmra.mrb[16].mxu0 %vm378_vm1, %v5773_v51 }
 0x589   :  { %6228 = vmatpush3.bf16.msra.mxu0 %v6225_v28  ;;  %v2402_v28 = vld [vmem:[#allocation5 + $0x38] sm:$0xff] }
 0x58a   :  { %v5780_v41 = vpop.f32.mrb[18].mxu1  ;;  %6230 = vmatprep.subr.bf16.mxu0 %v6229_v29  ;;  %v6245_v11 = vpack.c.bf16 %v2402_v28, %v2401_v0 }
 0x58b   :  { %v1562_v62 = vpop.f32.mrb[19].mxu1 }
 0x58c   :  { %5826 = vmatprep.mubr.msk.f32.mxu0 %vm378_vm1, %v1562_v62  ;;  %6246 = vmatprep.subr.bf16.mxu1 %v6245_v11 }
 0x58d   :  { %5827 = vmatmul.mubr.msk.f32.gmra.mrb[18].mxu0 %vm378_vm1, %v5780_v41  ;;  %6248 = vmatpush3.bf16.msra.mxu1 %v6245_v11 }
 0x58f   :  { %v5787_v57 = vpop.f32.mrb[12].mxu0 }
 0x590   :  { %v1643_v42 = vpop.f32.mrb[13].mxu0 }
 0x591   :  { %5833 = vmatprep.mubr.msk.f32.mxu0 %vm378_vm1, %v1643_v42 }
 0x592   :  { %5834 = vmatmul.mubr.msk.f32.vlgmr.msra.gmra.mrb[16].mxu0 %vm378_vm1, %v5787_v57 }
 0x593   :  { %v5794_v55 = vpop.f32.mrb[20].mxu1  ;;  %6232 = vmatpush3.bf16.msra.mxu0 %v6229_v29 }
 0x594   :  { %v1724_v43 = vpop.f32.mrb[21].mxu1 }
 0x595   :  { %5836 = vmatprep.mubr.msk.f32.mxu0 %vm378_vm1, %v1724_v43 }
 0x596   :  { %5837 = vmatmul.mubr.msk.f32.gmra.mrb[18].mxu0 %vm378_vm1, %v5794_v55 }
 0x598   :  { %v5801_v44 = vpop.f32.mrb[14].mxu0 }
 0x599   :  { %v1805_v31 = vpop.f32.mrb[15].mxu0 }
 0x59a   :  { %5843 = vmatprep.mubr.msk.f32.mxu0 %vm378_vm1, %v1805_v31 }
 0x59b   :  { %5844 = vmatmul.mubr.msk.f32.vlgmr.msra.gmra.mrb[16].mxu0 %vm378_vm1, %v5801_v44 }
 0x5a1   :  { %v5808_v47 = vpop.f32.mrb[22].mxu1 }
 0x5a2   :  { %v1886_v32 = vpop.f32.mrb[23].mxu1 }
 0x5a3   :  { %5846 = vmatprep.mubr.msk.f32.mxu0 %vm378_vm1, %v1886_v32 }
 0x5a4   :  { %5847 = vmatmul.mubr.msk.f32.gmra.mrb[18].mxu0 %vm378_vm1, %v5808_v47 }
 0x5a5   :  { %2840 = vmatprep.mubr.f32.mxu0 %v6949_v40 }
 0x66e   :  { %v5845_v56 = vpop.f32.mrb[16].mxu0 }
 0x66f   :  { %v6449_v21 = vadd.f32 %v5845_v56, %v2003_v54  ;;  %v2288_v30 = vpop.f32.mrb[17].mxu0 }
 0x670   :  { %v6450_v59 = vadd.f32 %v2288_v30, %v2003_v54 }
 0x671   :  { %v7464_v63 = vadd.f32 %v6868_v35, %v6449_v21 }
 0x672   :  { %v7466_v39 = vadd.f32 %v6869_v3, %v6450_v59 }
 0x673   :  { %v2318_v37 = vsel %vm63_vm0, %v7464_v63, 0.0  ;;  %v2332_v2 = vmul.f32 %v7464_v63, %v7464_v63 }
 0x674   :  { %2319 = vadd.xlane.f32.xlu1 %v2318_v37  ;;  %v2315_v4 = vsel %vm63_vm0, %v7466_v39, 0.0  ;;  %v2331_v45 = vmul.f32 %v7466_v39, %v7466_v39 }
 0x675   :  { %2316 = vadd.xlane.f32.xlu0 %v2315_v4  ;;  %v2338_v9 = vsel %vm63_vm0, %v2332_v2, 0.0 }
 0x676   :  { %v2335_v60 = vsel %vm63_vm0, %v2331_v45, 0.0 }
 0x677   :  { %v5848_v5 = vpop.f32.mrb[18].mxu0 }
 0x678   :  { %v6451_v8 = vadd.f32 %v5848_v5, %v2003_v54  ;;  %v2298_v46 = vpop.f32.mrb[19].mxu0 }
 0x679   :  { %2339 = vadd.xlane.f32.xlu0 %v2338_v9  ;;  %v6452_v14 = vadd.f32 %v2298_v46, %v2003_v54 }
 0x67a   :  { %v7477_v15 = vadd.f32 %v6870_v19, %v6451_v8 }
 0x67b   :  { %v7479_v17 = vadd.f32 %v6871_v22, %v6452_v14  ;;  %v2381_v14 = vsub.s32 3, %v7108_v7 }
 0x67c   :  { %v2324_v23 = vsel %vm63_vm0, %v7477_v15, 0.0  ;;  %v2334_v58 = vmul.f32 %v7477_v15, %v7477_v15 }
 0x67d   :  { %2336 = vadd.xlane.f32.xlu0 %v2335_v60  ;;  %2325 = vadd.xlane.f32.xlu1 %v2324_v23  ;;  %v2321_v26 = vsel %vm63_vm0, %v7479_v17, 0.0  ;;  %v2333_v20 = vmul.f32 %v7479_v17, %v7479_v17 }
 0x67e   :  { %v2344_v27 = vsel %vm63_vm0, %v2334_v58, 0.0  ;;  %v2382_v58 = vrot.slane %v7459_v49, %v2381_v14 }
 0x67f   :  { %v2341_v1 = vsel %vm63_vm0, %v2333_v20, 0.0 }
 0x681   :  { %2322 = vadd.xlane.f32.xlu0 %v2321_v26  ;;  %2345 = vadd.xlane.f32.xlu1 %v2344_v27  ;;  %v2389_v26 = vsub.s32 4, %v7108_v7 }
 0x683   :  { %v2390_v33 = vrot.slane %v7459_v49, %v2389_v26 }
 0x685   :  { %2342 = vadd.xlane.f32.xlu0 %v2341_v1 }
 0x701   :  { %v2320_v18 = vpop.xlane.xlu1 %2319 }
 0x702   :  { %v2317_v10 = vpop.xlane.xlu0 %2316  ;;  %v2328_v50 = vmul.f32 0.015625, %v2320_v18 }
 0x703   :  { %v2327_v29 = vmul.f32 0.015625, %v2317_v10 }
 0x704   :  { %v2352_v38 = vmul.f32 %v2328_v50, %v2328_v50  ;;  %v2364_v22 = vsub.f32 %v7464_v63, %v2328_v50 }
 0x705   :  { %v2351_v55 = vmul.f32 %v2327_v29, %v2327_v29  ;;  %v2363_v27 = vsub.f32 %v7466_v39, %v2327_v29 }
 0x706   :  { %v2340_v51 = vpop.xlane.xlu0 %2339 }
 0x707   :  { %v2348_v41 = vmul.f32 0.015625, %v2340_v51  ;;  %v2543_v51 = vld [vmem:[%s8105_s6] sm:$0xff] }
 0x709   :  { %v2356_v62 = vsub.f32 %v2348_v41, %v2352_v38  ;;  %v2544_v38 = vld [vmem:[%s8105_s6 + $0x8] sm:$0xff]  ;;  %v2545_v41 = vld [vmem:[%s8105_s6 + $0x10] sm:$0xff] }
 0x70a   :  { %v2337_v57 = vpop.xlane.xlu0 %2336  ;;  %v2326_v42 = vpop.xlane.xlu1 %2325  ;;  %v6249_v29 = vpack.c.bf16 %v2544_v38, %v2543_v51 }
 0x70b   :  { %v2360_v43 = vmax.f32 %v2356_v62, 0.0  ;;  %v2347_v44 = vmul.f32 0.015625, %v2337_v57  ;;  %v2330_v31 = vmul.f32 0.015625, %v2326_v42  ;;  %v2546_v62 = vld [vmem:[%s8105_s6 + $0x18] sm:$0xff]  ;;  %v2547_v42 = vld [vmem:[%s8105_s6 + $0x20] sm:$0xff] }
 0x70c   :  { %6250 = vmatprep.subr.bf16.mxu1 %v6249_v29  ;;  %v6253_v57 = vpack.c.bf16 %v2546_v62, %v2545_v41 }
 0x70d   :  { %v2368_v47 = vadd.f32 1e-06, %v2360_v43  ;;  %v2355_v32 = vsub.f32 %v2347_v44, %v2351_v55  ;;  %v2354_v54 = vmul.f32 %v2330_v31, %v2330_v31  ;;  %v2366_v34 = vsub.f32 %v7477_v15, %v2330_v31  ;;  %v2548_v55 = vld [vmem:[%s8105_s6 + $0x28] sm:$0xff]  ;;  %v2549_v44 = vld [vmem:[%s8105_s6 + $0x30] sm:$0xff]  ;;  %v2550_v31 = vld [vmem:[%s8105_s6 + $0x38] sm:$0xff] }
 0x70e   :  { %v2323_v56 = vpop.xlane.xlu0 %2322  ;;  %v2346_v21 = vpop.xlane.xlu1 %2345  ;;  %v6257_v43 = vpack.c.bf16 %v2548_v55, %v2547_v42 }
 0x70f   :  { %6763 = vrsqrt.f32 %v2368_v47  ;;  %v2359_v30 = vmax.f32 %v2355_v32, 0.0  ;;  %v2329_v59 = vmul.f32 0.015625, %v2323_v56  ;;  %v2350_v35 = vmul.f32 0.015625, %v2346_v21  ;;  %v2551_v32 = vld [vmem:[%s8105_s6 + $0x40] sm:$0xff]  ;;  %v2553_v21 = vld [vmem:[%s8105_s6 + $0x50] sm:$0xff] }
 0x710   :  { %v6261_v47 = vpack.c.bf16 %v2550_v31, %v2549_v44 }
 0x711   :  { %v2367_v3 = vadd.f32 1e-06, %v2359_v30  ;;  %v2358_v37 = vsub.f32 %v2350_v35, %v2354_v54  ;;  %v2353_v2 = vmul.f32 %v2329_v59, %v2329_v59  ;;  %v2365_v0 = vsub.f32 %v7479_v17, %v2329_v59  ;;  %v2552_v54 = vld [vmem:[%s8105_s6 + $0x48] sm:$0xff]  ;;  %v2554_v30 = vld [vmem:[%s8105_s6 + $0x58] sm:$0xff]  ;;  %v2555_v35 = vld [vmem:[%s8105_s6 + $0x60] sm:$0xff] }
 0x712   :  { %v2343_v4 = vpop.xlane.xlu0 %2342  ;;  %v6265_v56 = vpack.c.bf16 %v2552_v54, %v2551_v32  ;;  %v6269_v59 = vpack.c.bf16 %v2554_v30, %v2553_v21 }
 0x713   :  { %6765 = vrsqrt.f32 %v2367_v3  ;;  %v2362_v5 = vmax.f32 %v2358_v37, 0.0  ;;  %v2349_v8 = vmul.f32 0.015625, %v2343_v4  ;;  %v2556_v3 = vld [vmem:[%s8105_s6 + $0x68] sm:$0xff]  ;;  %v2557_v4 = vld [vmem:[%s8105_s6 + $0x70] sm:$0xff] }
 0x714   :  { %v6273_v37 = vpack.c.bf16 %v2556_v3, %v2555_v35  ;;  %v2561_v35 = vsub.s32 5, %v7108_v7 }
 0x715   :  { %v2370_v9 = vadd.f32 1e-06, %v2362_v5  ;;  %v2357_v46 = vsub.f32 %v2349_v8, %v2353_v2  ;;  %v2558_v2 = vld [vmem:[%s8105_s6 + $0x78] sm:$0xff]  ;;  %v5336_v8 = vld [vmem:[%s8104_s5] ss:$0 sm:$0xff] }
 0x716   :  { %v6277_v5 = vpack.c.bf16 %v2558_v2, %v2557_v4  ;;  %v2562_v3 = vrot.slane %v7459_v49, %v2561_v35 }
 0x717   :  { %6767 = vrsqrt.f32 %v2370_v9  ;;  %v2361_v45 = vmax.f32 %v2357_v46, 0.0 }
 0x719   :  { %v6764_v19 = vpop.eup %6763  ;;  %v2369_v60 = vadd.f32 1e-06, %v2361_v45 }
 0x71a   :  { %v2376_v23 = vmul.f32 %v6764_v19, %v2364_v22 }
 0x71b   :  { %6769 = vrsqrt.f32 %v2369_v60 }
 0x71c   :  { %v2384_v52 = vmul.f32 %v2382_v58, %v2376_v23 }
 0x71d   :  { %v6766_v20 = vpop.eup %6765 }
 0x71e   :  { %v2375_v1 = vmul.f32 %v6766_v20, %v2363_v27  ;;  %v2392_v6 = vadd.f32 %v2390_v33, %v2384_v52 }
 0x720   :  { %v2383_v24 = vmul.f32 %v2382_v58, %v2375_v1 }
 0x721   :  { %v6768_v61 = vpop.eup %6767 }
 0x722   :  { %v2391_v53 = vadd.f32 %v2390_v33, %v2383_v24  ;;  %v2378_v25 = vmul.f32 %v6768_v61, %v2366_v34 }
 0x724   :  { %5865 = vmatprep.mubr.msk.f32.mxu1 %vm63_vm0, %v2391_v53  ;;  %v2386_v11 = vmul.f32 %v2382_v58, %v2378_v25 }
 0x725   :  { %v6770_v36 = vpop.eup %6769  ;;  %5866 = vmatmul.mubr.msk.f32.vlgmr.msra.gmra.mrb[24].mxu1 %vm63_vm0, %v2392_v6 }
 0x726   :  { %v2377_v28 = vmul.f32 %v6770_v36, %v2365_v0  ;;  %v2394_v50 = vadd.f32 %v2390_v33, %v2386_v11  ;;  %6252 = vmatpush3.bf16.msra.mxu1 %v6249_v29 }
 0x727   :  { %6254 = vmatprep.subr.bf16.mxu1 %v6253_v57 }
 0x728   :  { %v2385_v18 = vmul.f32 %v2382_v58, %v2377_v28 }
 0x72a   :  { %v2393_v10 = vadd.f32 %v2390_v33, %v2385_v18  ;;  %6256 = vmatpush3.bf16.msra.mxu1 %v6253_v57 }
 0x72b   :  { %6258 = vmatprep.subr.bf16.mxu1 %v6257_v43 }
 0x72c   :  { %5868 = vmatprep.mubr.msk.f32.mxu1 %vm63_vm0, %v2393_v10 }
 0x72d   :  { %5869 = vmatmul.mubr.msk.f32.gmra.mrb[26].mxu1 %vm63_vm0, %v2394_v50 }
 0x72e   :  { %6260 = vmatpush3.bf16.msra.mxu1 %v6257_v43 }
 0x72f   :  { %6262 = vmatprep.subr.bf16.mxu1 %v6261_v47 }
 0x732   :  { %6264 = vmatpush3.bf16.msra.mxu1 %v6261_v47 }
 0x733   :  { %6266 = vmatprep.subr.bf16.mxu1 %v6265_v56 }
 0x736   :  { %6268 = vmatpush3.bf16.msra.mxu1 %v6265_v56 }
 0x737   :  { %6270 = vmatprep.subr.bf16.mxu1 %v6269_v59 }
 0x73a   :  { %6272 = vmatpush3.bf16.msra.mxu1 %v6269_v59 }
 0x73b   :  { %6274 = vmatprep.subr.bf16.mxu1 %v6273_v37 }
 0x73e   :  { %6276 = vmatpush3.bf16.msra.mxu1 %v6273_v37 }
 0x73f   :  { %6278 = vmatprep.subr.bf16.mxu1 %v6277_v5 }
 0x742   :  { %6280 = vmatpush3.bf16.msra.mxu1 %v6277_v5 }
 0x7f8   :  { %v5867_v9 = vpop.f32.mrb[24].mxu1 }
 0x7f9   :  { %v2494_v46 = vadd.f32 %v5867_v9, %v5336_v8  ;;  %v2488_v45 = vpop.f32.mrb[25].mxu1 }
 0x7fa   :  { %v2489_v19 = vadd.f32 %v5336_v8, %v2488_v45 }
 0x7fb   :  { %v2508_v22 = vmul.f32 %v2494_v46, %v2494_v46 }
 0x7fc   :  { %v2507_v60 = vmul.f32 %v2489_v19, %v2489_v19 }
 0x7fd   :  { %v2512_v23 = vmul.f32 %v2508_v22, %v2494_v46 }
 0x7fe   :  { %v2511_v58 = vmul.f32 %v2507_v60, %v2489_v19 }
 0x7ff   :  { %v2516_v27 = vmul.f32 0.044715, %v2512_v23 }
 0x800   :  { %v2515_v20 = vmul.f32 0.044715, %v2511_v58  ;;  %v5870_v1 = vpop.f32.mrb[26].mxu1 }
 0x801   :  { %v2520_v33 = vadd.f32 %v2516_v27, %v2494_v46  ;;  %v2504_v52 = vadd.f32 %v5870_v1, %v5336_v8  ;;  %v2498_v24 = vpop.f32.mrb[27].mxu1 }
 0x802   :  { %v2519_v61 = vadd.f32 %v2515_v20, %v2489_v19  ;;  %v2499_v34 = vadd.f32 %v5336_v8, %v2498_v24 }
 0x803   :  { %v2524_v53 = vmul.f32 0.7978846, %v2520_v33  ;;  %v2510_v6 = vmul.f32 %v2504_v52, %v2504_v52 }
 0x804   :  { %v2523_v25 = vmul.f32 0.7978846, %v2519_v61  ;;  %v2509_v0 = vmul.f32 %v2499_v34, %v2499_v34  ;;  %v5343_v61 = vld [vmem:[%s8100_s1 + $0x88] sm:$0xff] }
 0x805   :  { %6771 = vtanh.f32 %v2524_v53  ;;  %v2514_v36 = vmul.f32 %v2510_v6, %v2504_v52  ;;  %v5342_v6 = vld [vmem:[%s8100_s1 + $0x80] sm:$0xff] }
 0x806   :  { %v2513_v28 = vmul.f32 %v2509_v0, %v2499_v34  ;;  %6773 = vtanh.f32 %v2523_v25  ;;  %v5344_v25 = vld [vmem:[%s8100_s1 + $0x90] sm:$0xff] }
 0x807   :  { %v2518_v11 = vmul.f32 0.044715, %v2514_v36  ;;  %v6283_v0 = vpack.c.bf16 %v5344_v25, %v5342_v6  ;;  %v5347_v36 = vld [vmem:[%s8100_s1 + $0xa8] sm:$0xff] }
 0x808   :  { %v2517_v18 = vmul.f32 0.044715, %v2513_v28  ;;  %v5349_v28 = vld [vmem:[%s8100_s1 + $0xb8] sm:$0xff] }
 0x809   :  { %v2522_v10 = vadd.f32 %v2518_v11, %v2504_v52  ;;  %v6285_v11 = vpack.c.bf16 %v5349_v28, %v5347_v36 }
 0x80a   :  { %v2521_v50 = vadd.f32 %v2517_v18, %v2499_v34  ;;  %v5346_v18 = vld [vmem:[%s8100_s1 + $0xa0] sm:$0xff] }
 0x80b   :  { %v2526_v51 = vmul.f32 0.7978846, %v2522_v10  ;;  %v5348_v10 = vld [vmem:[%s8100_s1 + $0xb0] sm:$0xff] }
 0x80c   :  { %v2525_v38 = vmul.f32 0.7978846, %v2521_v50  ;;  %v6287_v50 = vpack.c.bf16 %v5348_v10, %v5346_v18 }
 0x80d   :  { %6775 = vtanh.f32 %v2526_v51  ;;  %v5351_v51 = vld [vmem:[%s8100_s1 + $0xc8] sm:$0xff] }
 0x80e   :  { %6777 = vtanh.f32 %v2525_v38  ;;  %v5353_v38 = vld [vmem:[%s8100_s1 + $0xd8] sm:$0xff] }
 0x80f   :  { %v6772_v29 = vpop.eup %6771 }
 0x810   :  { %v6774_v41 = vpop.eup %6773  ;;  %v2532_v62 = vadd.f32 1.0, %v6772_v29  ;;  %v6289_v29 = vpack.c.bf16 %v5353_v38, %v5351_v51 }
 0x811   :  { %v2531_v57 = vadd.f32 1.0, %v6774_v41  ;;  %v5350_v41 = vld [vmem:[%s8100_s1 + $0xc0] sm:$0xff] }
 0x812   :  { %v2536_v42 = vmul.f32 0.5, %v2532_v62  ;;  %v5352_v62 = vld [vmem:[%s8100_s1 + $0xd0] sm:$0xff] }
 0x813   :  { %v2535_v55 = vmul.f32 0.5, %v2531_v57  ;;  %v6291_v57 = vpack.c.bf16 %v5352_v62, %v5350_v41 }
 0x814   :  { %v2540_v44 = vmul.f32 %v2536_v42, %v2494_v46  ;;  %v5355_v42 = vld [vmem:[%s8100_s1 + $0xe8] sm:$0xff] }
 0x815   :  { %v2539_v43 = vmul.f32 %v2535_v55, %v2489_v19  ;;  %v5357_v55 = vld [vmem:[%s8100_s1 + $0xf8] sm:$0xff] }
 0x817   :  { %v6776_v31 = vpop.eup %6775  ;;  %5903 = vmatprep.mubr.f32.mxu1 %v2539_v43  ;;  %v6293_v43 = vpack.c.bf16 %v5357_v55, %v5355_v42 }
 0x818   :  { %v6778_v47 = vpop.eup %6777  ;;  %5904 = vmatmul.mubr.f32.vlgmr.msra.gmra.mrb[28].mxu1 %v2540_v44  ;;  %v2534_v32 = vadd.f32 1.0, %v6776_v31  ;;  %v5354_v44 = vld [vmem:[%s8100_s1 + $0xe0] sm:$0xff]  ;;  %v5356_v31 = vld [vmem:[%s8100_s1 + $0xf0] sm:$0xff] }
 0x819   :  { %v2533_v54 = vadd.f32 1.0, %v6778_v47  ;;  %v6295_v47 = vpack.c.bf16 %v5356_v31, %v5354_v44 }
 0x81a   :  { %v2538_v56 = vmul.f32 0.5, %v2534_v32 }
 0x81b   :  { %v2537_v21 = vmul.f32 0.5, %v2533_v54 }
 0x81c   :  { %v2542_v59 = vmul.f32 %v2538_v56, %v2504_v52 }
 0x81d   :  { %v2541_v30 = vmul.f32 %v2537_v21, %v2499_v34  ;;  %v5345_v34 = vld [vmem:[%s8100_s1 + $0x98] sm:$0xff] }
 0x81e   :  { %v6281_v53 = vpack.c.bf16 %v5345_v34, %v5343_v61  ;;  %v5341_v34 = vld [vmem:[%s8106_s7 + $0x8] sm:$0x3f] }
 0x81f   :  { %5906 = vmatprep.mubr.f32.mxu1 %v2541_v30  ;;  %v2721_v36 = vrot.slane %v5341_v34, %v7111_v13  ;;  %v2729_v10 = vrot.slane %v5341_v34, %v7117_v16 }
 0x820   :  { %5907 = vmatmul.mubr.f32.gmra.mrb[30].mxu1 %v2542_v59  ;;  %6282 = vmatprep.subr.bf16.mxu0 %v6281_v53 }
 0x821   :  { %6284 = vmatpush1.bf16.msra.mxu0 %v6283_v0 }
 0x822   :  { %6286 = vmatprep.subr.bf16.mxu0 %v6285_v11 }
 0x825   :  { %6288 = vmatpush1.bf16.msra.mxu0 %v6287_v50 }
 0x826   :  { %6290 = vmatprep.subr.bf16.mxu0 %v6289_v29 }
 0x829   :  { %6292 = vmatpush1.bf16.msra.mxu0 %v6291_v57 }
 0x82a   :  { %6294 = vmatprep.subr.bf16.mxu0 %v6293_v43 }
 0x82d   :  { %6296 = vmatpush1.bf16.msra.mxu0 %v6295_v47 }
 0x8eb   :  { %v5905_v37 = vpop.f32.mrb[28].mxu1 }
 0x8ec   :  { %v2635_v4 = vadd.f32 %v5905_v37, %v2562_v3  ;;  %v2629_v2 = vpop.f32.mrb[29].mxu1 }
 0x8ed   :  { %v2630_v5 = vadd.f32 %v2629_v2, %v2562_v3 }
 0x8ee   :  { %v7564_v8 = vadd.f32 %v2635_v4, %v7464_v63 }
 0x8ef   :  { %v7567_v9 = vadd.f32 %v2630_v5, %v7466_v39 }
 0x8f0   :  { %v2671_v22 = vmul.f32 %v7564_v8, %v7564_v8  ;;  %v2657_v39 = vsel %vm63_vm0, %v7564_v8, 0.0 }
 0x8f1   :  { %v2654_v46 = vsel %vm63_vm0, %v7567_v9, 0.0  ;;  %v2670_v45 = vmul.f32 %v7567_v9, %v7567_v9 }
 0x8f2   :  { %2655 = vadd.xlane.f32.xlu0 %v2654_v46  ;;  %v2677_v20 = vsel %vm63_vm0, %v2671_v22, 0.0 }
 0x8f3   :  { %v5908_v19 = vpop.f32.mrb[30].mxu1  ;;  %v2674_v49 = vsel %vm63_vm0, %v2670_v45, 0.0 }
 0x8f4   :  { %v2645_v60 = vadd.f32 %v5908_v19, %v2562_v3  ;;  %2675 = vadd.xlane.f32.xlu1 %v2674_v49  ;;  %v2639_v63 = vpop.f32.mrb[31].mxu1 }
 0x8f5   :  { %v2640_v23 = vadd.f32 %v2639_v63, %v2562_v3 }
 0x8f6   :  { %2658 = vadd.xlane.f32.xlu0 %v2657_v39  ;;  %v7579_v58 = vadd.f32 %v2645_v60, %v7477_v15 }
 0x8f7   :  { %v7582_v27 = vadd.f32 %v2640_v23, %v7479_v17 }
 0x8f8   :  { %2678 = vadd.xlane.f32.xlu1 %v2677_v20  ;;  %v2673_v24 = vmul.f32 %v7579_v58, %v7579_v58  ;;  %v2663_v15 = vsel %vm63_vm0, %v7579_v58, 0.0 }
 0x8f9   :  { %v2660_v1 = vsel %vm63_vm0, %v7582_v27, 0.0  ;;  %v2672_v33 = vmul.f32 %v7582_v27, %v7582_v27 }
 0x8fa   :  { %2661 = vadd.xlane.f32.xlu0 %v2660_v1  ;;  %v2683_v17 = vsel %vm63_vm0, %v2673_v24, 0.0 }
 0x8fb   :  { %v2680_v52 = vsel %vm63_vm0, %v2672_v33, 0.0 }
 0x8fc   :  { %2681 = vadd.xlane.f32.xlu1 %v2680_v52 }
 0x8fe   :  { %2664 = vadd.xlane.f32.xlu0 %v2663_v15 }
 0x900   :  { %2684 = vadd.xlane.f32.xlu1 %v2683_v17 }
 0x97f   :  { %v2656_v32 = vpop.xlane.xlu0 %2655 }
 0x980   :  { %v2666_v54 = vmul.f32 0.015625, %v2656_v32 }
 0x981   :  { %v2676_v56 = vpop.xlane.xlu1 %2675 }
 0x982   :  { %v2690_v21 = vmul.f32 %v2666_v54, %v2666_v54  ;;  %v2686_v30 = vmul.f32 0.015625, %v2676_v56  ;;  %v2702_v0 = vsub.f32 %v7567_v9, %v2666_v54 }
 0x983   :  { %v2659_v59 = vpop.xlane.xlu0 %2658 }
 0x984   :  { %v2694_v3 = vsub.f32 %v2686_v30, %v2690_v21  ;;  %v2667_v37 = vmul.f32 0.015625, %v2659_v59  ;;  %v5358_v30 = vld [vmem:[%s8101_s2 + $0x2] sm:$0x3] }
 0x985   :  { %v2679_v4 = vpop.xlane.xlu1 %2678  ;;  %v2757_v59 = vrot.slane %v5358_v30, %v7111_v13 }
 0x986   :  { %v2698_v2 = vmax.f32 %v2694_v3, 0.0  ;;  %v2691_v5 = vmul.f32 %v2667_v37, %v2667_v37  ;;  %v2687_v46 = vmul.f32 0.015625, %v2679_v4  ;;  %v2703_v51 = vsub.f32 %v7564_v8, %v2667_v37 }
 0x987   :  { %v2662_v45 = vpop.xlane.xlu0 %2661 }
 0x988   :  { %v2706_v19 = vadd.f32 1e-06, %v2698_v2  ;;  %v2695_v49 = vsub.f32 %v2687_v46, %v2691_v5  ;;  %v2668_v22 = vmul.f32 0.015625, %v2662_v45  ;;  %v2761_v2 = vrot.slane %v5358_v30, %v7117_v16 }
 0x989   :  { %v2682_v60 = vpop.xlane.xlu1 %2681 }
 0x98a   :  { %6779 = vrsqrt.f32 %v2706_v19  ;;  %v2699_v63 = vmax.f32 %v2695_v49, 0.0  ;;  %v2692_v23 = vmul.f32 %v2668_v22, %v2668_v22  ;;  %v2688_v39 = vmul.f32 0.015625, %v2682_v60 }
 0x98b   :  { %v2665_v20 = vpop.xlane.xlu0 %2664  ;;  %v2704_v57 = vsub.f32 %v7582_v27, %v2668_v22 }
 0x98c   :  { %v2707_v1 = vadd.f32 1e-06, %v2699_v63  ;;  %v2669_v33 = vmul.f32 0.015625, %v2665_v20  ;;  %v2696_v52 = vsub.f32 %v2688_v39, %v2692_v23 }
 0x98d   :  { %v2685_v24 = vpop.xlane.xlu1 %2684 }
 0x98e   :  { %6781 = vrsqrt.f32 %v2707_v1  ;;  %v2693_v15 = vmul.f32 %v2669_v33, %v2669_v33  ;;  %v2689_v17 = vmul.f32 0.015625, %v2685_v24  ;;  %v2700_v61 = vmax.f32 %v2696_v52, 0.0 }
 0x98f   :  { %v2705_v44 = vsub.f32 %v7579_v58, %v2669_v33 }
 0x990   :  { %v2697_v53 = vsub.f32 %v2689_v17, %v2693_v15  ;;  %v2708_v6 = vadd.f32 1e-06, %v2700_v61 }
 0x992   :  { %v2701_v25 = vmax.f32 %v2697_v53, 0.0  ;;  %6783 = vrsqrt.f32 %v2708_v6 }
 0x994   :  { %v6780_v28 = vpop.eup %6779  ;;  %v2709_v11 = vadd.f32 1e-06, %v2701_v25 }
 0x995   :  { %v2714_v18 = vmul.f32 %v6780_v28, %v2702_v0 }
 0x996   :  { %6785 = vrsqrt.f32 %v2709_v11 }
 0x997   :  { %v2722_v50 = vmul.f32 %v2721_v36, %v2714_v18 }
 0x998   :  { %v6782_v38 = vpop.eup %6781 }
 0x999   :  { %v2730_v29 = vadd.f32 %v2729_v10, %v2722_v50  ;;  %v2715_v41 = vmul.f32 %v6782_v38, %v2703_v51 }
 0x99b   :  { %5359 = vmatmul.mubr.msk.f32.vlgmr.msra.gmra.mrb[20].mxu0 %vm63_vm0, %v2730_v29  ;;  %v2723_v62 = vmul.f32 %v2721_v36, %v2715_v41 }
 0x99c   :  { %2846 = vmatprep.mubr.f32.mxu0 %v6949_v40  ;;  %v6784_v42 = vpop.eup %6783 }
 0x99d   :  { %v2731_v55 = vadd.f32 %v2729_v10, %v2723_v62  ;;  %v2716_v43 = vmul.f32 %v6784_v42, %v2704_v57 }
 0x99f   :  { %5360 = vmatmul.mubr.msk.f32.gmra.mrb[22].mxu0 %vm63_vm0, %v2731_v55  ;;  %v2724_v47 = vmul.f32 %v2721_v36, %v2716_v43 }
 0x9a0   :  { %v6786_v31 = vpop.eup %6785  ;;  %2852 = vmatprep.mubr.f32.mxu0 %v6949_v40 }
 0x9a1   :  { %v2717_v32 = vmul.f32 %v6786_v31, %v2705_v44  ;;  %v2732_v54 = vadd.f32 %v2729_v10, %v2724_v47 }
 0x9a3   :  { %v2725_v56 = vmul.f32 %v2721_v36, %v2717_v32  ;;  %5361 = vmatmul.mubr.msk.f32.gmra.mrb[24].mxu0 %vm63_vm0, %v2732_v54 }
 0x9a4   :  { %2858 = vmatprep.mubr.f32.mxu0 %v6949_v40 }
 0x9a5   :  { %v2733_v21 = vadd.f32 %v2729_v10, %v2725_v56 }
 0x9a7   :  { %5362 = vmatmul.mubr.msk.f32.gmra.mrb[26].mxu0 %vm63_vm0, %v2733_v21 }
 0xa6e   :  { %v2842_v3 = vpop.f32.mrb[20].mxu0 }
 0xa6f   :  { %v2843_v37 = vadd.f32 %v2842_v3, %v2757_v59  ;;  %v2844_v4 = vpop.f32.mrb[21].mxu0 }
 0xa70   :  { %v2845_v40 = vadd.f32 %v2844_v4, %v2761_v2 }
 0xa71   :  { %v7664_v5 = vmul.f32 0.25, %v2843_v37 }
 0xa72   :  { %v2848_v46 = vpop.f32.mrb[22].mxu0 }
 0xa73   :  { %v2849_v45 = vadd.f32 %v2848_v46, %v2757_v59  ;;  %v2850_v19 = vpop.f32.mrb[23].mxu0  ;;  %5913 = vmatprep.mubr.msk.f32.mxu1 %vm378_vm1, %v7664_v5 }
 0xa74   :  { %v2851_v49 = vadd.f32 %v2850_v19, %v2761_v2 }
 0xa75   :  { %v6591_v22 = vpack.i.bf16 %v2849_v45, %v2843_v37  ;;  %v2866_v6 = vmul.f32 0.25, %v2849_v45 }
 0xa76   :  { %v7668_v60 = vpack.c.bf16 %v2851_v49, %v2845_v40  ;;  %v7670_v63 = vpack.i.bf16 %v2851_v49, %v2845_v40  ;;  %v2854_v13 = vpop.f32.mrb[24].mxu0 }
 0xa77   :  { %6592 = vrot.lane.b32.xlu0 %v6591_v22, %s6950_s23  ;;  %v2855_v23 = vadd.f32 %v2854_v13, %v2757_v59  ;;  %v2856_v16 = vpop.f32.mrb[25].mxu0 }
 0xa78   :  { %v2857_v52 = vadd.f32 %v2856_v16, %v2761_v2 }
 0xa79   :  { %v2867_v39 = vmul.f32 0.25, %v2855_v23 }
 0xa7a   :  { %v2860_v20 = vpop.f32.mrb[26].mxu0 }
 0xa7b   :  { %6612 = vrot.lane.b32.xlu0 %v6591_v22, %s6951_s24  ;;  %v2861_v1 = vadd.f32 %v2860_v20, %v2757_v59  ;;  %v2862_v33 = vpop.f32.mrb[27].mxu0  ;;  %5920 = vmatprep.mubr.msk.f32.mxu0 %vm378_vm1, %v2867_v39 }
 0xa7c   :  { %v2863_v24 = vadd.f32 %v2862_v33, %v2761_v2 }
 0xa7d   :  { %v6596_v15 = vpack.i.bf16 %v2861_v1, %v2855_v23  ;;  %v2868_v10 = vmul.f32 0.25, %v2861_v1 }
 0xa7e   :  { %v7676_v17 = vpack.c.bf16 %v2863_v24, %v2857_v52  ;;  %v7678_v61 = vpack.i.bf16 %v2863_v24, %v2857_v52 }
 0xa7f   :  { %6622 = vrot.lane.b32.xlu0 %v6591_v22, %s6952_s25  ;;  %6597 = vrot.lane.b32.xlu1 %v6596_v15, %s6950_s23 }
 0xa83   :  { %6602 = vrot.lane.b32.xlu1 %v6591_v22, %s6953_s26 }
 0xa87   :  { %6607 = vrot.lane.b32.xlu1 %v6596_v15, %s6953_s26 }
 0xa8b   :  { %6617 = vrot.lane.b32.xlu1 %v6596_v15, %s6951_s24 }
 0xa8f   :  { %6627 = vrot.lane.b32.xlu1 %v6596_v15, %s6952_s25 }
 0xa93   :  { %2873 = vrot.lane.b32.xlu1 %v7664_v5, %s6950_s23 }
 0xae9   :  { %v6593_v34 = vpop.permute.xlu0 %6592 }
 0xaea   :  { %6632 = vrot.lane.b32.xlu0 %v6593_v34, %s6952_s25 }
 0xaed   :  { %v6613_v53 = vpop.permute.xlu0 %6612 }
 0xaee   :  { %2875 = vrot.lane.b32.xlu0 %v2866_v6, %s6950_s23 }
 0xaf1   :  { %v6623_v25 = vpop.permute.xlu0 %6622  ;;  %v6598_v0 = vpop.permute.xlu1 %6597 }
 0xaf2   :  { %v6625_v36 = vunpack.i.h.bf16 %v6623_v25  ;;  %v6624_v28 = vunpack.i.l.bf16 %v6623_v25  ;;  %6642 = vrot.lane.b32.xlu1 %v6598_v0, %s6952_s25 }
 0xaf4   :  { %v6297_v11 = vpack.c.bf16 %v6625_v36, %v6624_v28 }
 0xaf5   :  { %v6603_v18 = vpop.permute.xlu1 %6602 }
 0xaf6   :  { %6299 = vmatprep.subr.msk.bf16.mxu1 %vm7163_vm2, %v6297_v11  ;;  %2879 = vrot.lane.b32.xlu1 %v2868_v10, %s6950_s23 }
 0xaf7   :  { %6302 = vmatpush3.bf16.xpose.msk.msra.mxu1 %vm7163_vm2, %v6297_v11  ;;  %6637 = vrot.lane.b32.xlu0 %v6603_v18, %s6952_s25 }
 0xaf9   :  { %v6608_v50 = vpop.permute.xlu1 %6607 }
 0xafa   :  { %6652 = vrot.lane.b32.xlu1 %v6608_v50, %s6952_s25 }
 0xafb   :  { %2877 = vrot.lane.b32.xlu0 %v2867_v39, %s6950_s23 }
 0xafd   :  { %v6618_v51 = vpop.permute.xlu1 %6617 }
 0xafe   :  { %5914 = vmatmul.mubr.msk.f32.vlgmr.msra.gmra.mrb[32].mxu1 %vm378_vm1, %v2866_v6  ;;  %2881 = vrot.lane.b32.xlu1 %v7664_v5, %s6953_s26 }
 0xaff   :  { %6647 = vrot.lane.b32.xlu0 %v6613_v53, %s6952_s25 }
 0xb01   :  { %v6628_v38 = vpop.permute.xlu1 %6627 }
 0xb02   :  { %v6630_v29 = vunpack.i.h.bf16 %v6628_v38  ;;  %v6629_v41 = vunpack.i.l.bf16 %v6628_v38  ;;  %6657 = vrot.lane.b32.xlu1 %v6618_v51, %s6952_s25 }
 0xb03   :  { %2883 = vrot.lane.b32.xlu0 %v2866_v6, %s6953_s26 }
 0xb04   :  { %v6303_v62 = vpack.c.bf16 %v6630_v29, %v6629_v41 }
 0xb05   :  { %v2874_v57 = vpop.permute.xlu1 %2873 }
 0xb06   :  { %6305 = vmatprep.subr.msk.bf16.mxu0 %vm7163_vm2, %v6303_v62  ;;  %5927 = vmatprep.mubr.msk.f32.mxu1 %vm378_vm1, %v2874_v57 }
 0xb07   :  { %6308 = vmatpush3.bf16.xpose.msk.msra.mxu0 %vm7163_vm2, %v6303_v62  ;;  %2887 = vrot.lane.b32.xlu1 %v2868_v10, %s6953_s26 }
 0xb08   :  { %2885 = vrot.lane.b32.xlu0 %v2867_v39, %s6953_s26 }
 0xb0b   :  { %2891 = vrot.lane.b32.xlu1 %v2866_v6, %s6951_s24 }
 0xb0c   :  { %2889 = vrot.lane.b32.xlu0 %v7664_v5, %s6951_s24 }
 0xb0e   :  { %5921 = vmatmul.mubr.msk.f32.vlgmr.msra.gmra.mrb[28].mxu0 %vm378_vm1, %v2868_v10 }
 0xb0f   :  { %2895 = vrot.lane.b32.xlu1 %v2868_v10, %s6951_s24 }
 0xb10   :  { %2893 = vrot.lane.b32.xlu0 %v2867_v39, %s6951_s24 }
 0xb5c   :  { %v6633_v42 = vpop.permute.xlu0 %6632 }
 0xb5d   :  { %v6635_v55 = vunpack.i.h.bf16 %v6633_v42  ;;  %v6634_v43 = vunpack.i.l.bf16 %v6633_v42 }
 0xb5f   :  { %v6309_v44 = vpack.c.bf16 %v6635_v55, %v6634_v43 }
 0xb60   :  { %v2876_v31 = vpop.permute.xlu0 %2875 }
 0xb61   :  { %6311 = vmatprep.subr.msk.bf16.mxu1 %vm7163_vm2, %v6309_v44 }
 0xb62   :  { %6314 = vmatpush3.bf16.xpose.msk.msra.mxu1 %vm7163_vm2, %v6309_v44 }
 0xb64   :  { %v6643_v47 = vpop.permute.xlu1 %6642 }
 0xb65   :  { %v6645_v32 = vunpack.i.h.bf16 %v6643_v47  ;;  %v6644_v54 = vunpack.i.l.bf16 %v6643_v47 }
 0xb67   :  { %v6315_v56 = vpack.c.bf16 %v6645_v32, %v6644_v54 }
 0xb68   :  { %v2880_v21 = vpop.permute.xlu1 %2879 }
 0xb69   :  { %v6638_v30 = vpop.permute.xlu0 %6637  ;;  %5928 = vmatmul.mubr.msk.f32.vlgmr.msra.gmra.mrb[34].mxu1 %vm378_vm1, %v2876_v31  ;;  %6317 = vmatprep.subr.msk.bf16.mxu0 %vm7163_vm2, %v6315_v56 }
 0xb6a   :  { %v6640_v59 = vunpack.i.h.bf16 %v6638_v30  ;;  %v6639_v3 = vunpack.i.l.bf16 %v6638_v30  ;;  %6320 = vmatpush3.bf16.xpose.msk.msra.mxu0 %vm7163_vm2, %v6315_v56 }
 0xb6c   :  { %v6321_v37 = vpack.c.bf16 %v6640_v59, %v6639_v3  ;;  %v6653_v4 = vpop.permute.xlu1 %6652 }
 0xb6d   :  { %v2878_v2 = vpop.permute.xlu0 %2877  ;;  %v6655_v5 = vunpack.i.h.bf16 %v6653_v4  ;;  %v6654_v46 = vunpack.i.l.bf16 %v6653_v4 }
 0xb6e   :  { %5934 = vmatprep.mubr.msk.f32.mxu0 %vm378_vm1, %v2878_v2  ;;  %6323 = vmatprep.subr.msk.bf16.mxu1 %vm7163_vm2, %v6321_v37 }
 0xb6f   :  { %6326 = vmatpush3.bf16.xpose.msk.msra.mxu1 %vm7163_vm2, %v6321_v37  ;;  %v6327_v45 = vpack.c.bf16 %v6655_v5, %v6654_v46 }
 0xb70   :  { %v2882_v19 = vpop.permute.xlu1 %2881 }
 0xb71   :  { %v6648_v40 = vpop.permute.xlu0 %6647  ;;  %5935 = vmatmul.mubr.msk.f32.vlgmr.msra.gmra.mrb[30].mxu0 %vm378_vm1, %v2880_v21  ;;  %5941 = vmatprep.mubr.msk.f32.mxu1 %vm378_vm1, %v2882_v19 }
 0xb72   :  { %v6650_v49 = vunpack.i.h.bf16 %v6648_v40  ;;  %v6649_v22 = vunpack.i.l.bf16 %v6648_v40  ;;  %6329 = vmatprep.subr.msk.bf16.mxu0 %vm7163_vm2, %v6327_v45 }
 0xb73   :  { %6332 = vmatpush3.bf16.xpose.msk.msra.mxu0 %vm7163_vm2, %v6327_v45 }
 0xb74   :  { %v6333_v13 = vpack.c.bf16 %v6650_v49, %v6649_v22  ;;  %v6658_v23 = vpop.permute.xlu1 %6657 }
 0xb75   :  { %v6660_v16 = vunpack.i.h.bf16 %v6658_v23  ;;  %v6659_v39 = vunpack.i.l.bf16 %v6658_v23  ;;  %v2884_v20 = vpop.permute.xlu0 %2883 }
 0xb76   :  { %6335 = vmatprep.subr.msk.bf16.mxu1 %vm7163_vm2, %v6333_v13  ;;  %5942 = vmatmul.mubr.msk.f32.vlgmr.msra.gmra.mrb[36].mxu1 %vm378_vm1, %v2884_v20 }
 0xb77   :  { %v6339_v1 = vpack.c.bf16 %v6660_v16, %v6659_v39  ;;  %6338 = vmatpush3.bf16.xpose.msk.msra.mxu1 %vm7163_vm2, %v6333_v13 }
 0xb78   :  { %6346 = vmatprep.subr.bf16.mxu1 %v7668_v60 }
 0xb79   :  { %v2888_v33 = vpop.permute.xlu1 %2887  ;;  %6341 = vmatprep.subr.msk.bf16.mxu0 %vm7163_vm2, %v6339_v1 }
 0xb7a   :  { %v2886_v52 = vpop.permute.xlu0 %2885 }
 0xb7b   :  { %5948 = vmatprep.mubr.msk.f32.mxu0 %vm378_vm1, %v2886_v52 }
 0xb7c   :  { %5949 = vmatmul.mubr.msk.f32.vlgmr.msra.gmra.mrb[32].mxu0 %vm378_vm1, %v2888_v33 }
 0xb7d   :  { %6344 = vmatpush3.bf16.xpose.msk.msra.mxu0 %vm7163_vm2, %v6339_v1  ;;  %v2892_v24 = vpop.permute.xlu1 %2891 }
 0xb7e   :  { %6350 = vmatprep.subr.bf16.mxu0 %v7676_v17  ;;  %v2890_v15 = vpop.permute.xlu0 %2889 }
 0xb7f   :  { %5955 = vmatprep.mubr.msk.f32.mxu1 %vm378_vm1, %v2890_v15 }
 0xb80   :  { %5956 = vmatmul.mubr.msk.f32.vlgmr.msra.gmra.mrb[38].mxu1 %vm378_vm1, %v2892_v24 }
 0xb81   :  { %6348 = vmatpush3.bf16.msra.mxu1 %v7668_v60  ;;  %v2896_v34 = vpop.permute.xlu1 %2895 }
 0xb82   :  { %v2894_v53 = vpop.permute.xlu0 %2893 }
 0xb83   :  { %5962 = vmatprep.mubr.msk.f32.mxu0 %vm378_vm1, %v2894_v53 }
 0xb84   :  { %5963 = vmatmul.mubr.msk.f32.vlgmr.msra.gmra.mrb[34].mxu0 %vm378_vm1, %v2896_v34 }
 0xb85   :  { %6352 = vmatpush3.bf16.msra.mxu0 %v7676_v17 }
 0xbd1   :  { %v5915_v12 = vpop.f32.mrb[32].mxu1 }
 0xbd2   :  { %v3043_v6 = vpop.f32.mrb[33].mxu1  ;;  %v3664_v25 = vsel %vm378_vm1, %v5915_v12, -inf }
 0xbd3   :  { %3665 = vmax.xlane.f32.xlu1 %v3664_v25  ;;  %v3661_v0 = vsel %vm378_vm1, %v3043_v6, -inf }
 0xbd4   :  { %3662 = vmax.xlane.f32.xlu0 %v3661_v0 }
 0xbe1   :  { %v5922_v36 = vpop.f32.mrb[28].mxu0 }
 0xbe2   :  { %v3130_v28 = vpop.f32.mrb[29].mxu0  ;;  %v3670_v60 = vsel %vm378_vm1, %v5922_v36, -inf }
 0xbe3   :  { %3671 = vmax.xlane.f32.xlu0 %v3670_v60  ;;  %v3667_v11 = vsel %vm378_vm1, %v3130_v28, -inf }
 0xbe7   :  { %3668 = vmax.xlane.f32.xlu0 %v3667_v11 }
 0xc3c   :  { %v7760_v18 = vpop.f32.mrb[34].mxu1 }
 0xc3d   :  { %v7762_v10 = vpop.f32.mrb[35].mxu1  ;;  %v3676_v17 = vsel %vm378_vm1, %v7760_v18, -inf }
 0xc3e   :  { %3677 = vmax.xlane.f32.xlu1 %v3676_v17  ;;  %v3673_v50 = vsel %vm378_vm1, %v7762_v10, -inf }
 0xc3f   :  { %3674 = vmax.xlane.f32.xlu0 %v3673_v50 }
 0xc44   :  { %v7768_v51 = vpop.f32.mrb[30].mxu0 }
 0xc45   :  { %v7770_v38 = vpop.f32.mrb[31].mxu0  ;;  %v3682_v29 = vsel %vm378_vm1, %v7768_v51, -inf }
 0xc46   :  { %3683 = vmax.xlane.f32.xlu1 %v3682_v29  ;;  %v3679_v41 = vsel %vm378_vm1, %v7770_v38, -inf }
 0xc47   :  { %3680 = vmax.xlane.f32.xlu0 %v3679_v41 }
 0xc49   :  { %v7776_v62 = vpop.f32.mrb[36].mxu1 }
 0xc4a   :  { %v7778_v57 = vpop.f32.mrb[37].mxu1  ;;  %v3688_v42 = vsel %vm378_vm1, %v7776_v62, -inf }
 0xc4b   :  { %3689 = vmax.xlane.f32.xlu1 %v3688_v42  ;;  %v3685_v55 = vsel %vm378_vm1, %v7778_v57, -inf }
 0xc4c   :  { %3686 = vmax.xlane.f32.xlu0 %v3685_v55 }
 0xc4f   :  { %v7784_v43 = vpop.f32.mrb[32].mxu0 }
 0xc50   :  { %v7786_v44 = vpop.f32.mrb[33].mxu0  ;;  %v3694_v31 = vsel %vm378_vm1, %v7784_v43, -inf }
 0xc51   :  { %3695 = vmax.xlane.f32.xlu1 %v3694_v31  ;;  %v3691_v47 = vsel %vm378_vm1, %v7786_v44, -inf }
 0xc52   :  { %3692 = vmax.xlane.f32.xlu0 %v3691_v47 }
 0xc53   :  { %v7792_v32 = vpop.f32.mrb[38].mxu1 }
 0xc54   :  { %v7794_v54 = vpop.f32.mrb[39].mxu1  ;;  %v3700_v56 = vsel %vm378_vm1, %v7792_v32, -inf }
 0xc55   :  { %3701 = vmax.xlane.f32.xlu1 %v3700_v56  ;;  %v3697_v21 = vsel %vm378_vm1, %v7794_v54, -inf }
 0xc56   :  { %3698 = vmax.xlane.f32.xlu0 %v3697_v21 }
 0xc57   :  { %v7800_v30 = vpop.f32.mrb[34].mxu0 }
 0xc58   :  { %v7802_v59 = vpop.f32.mrb[35].mxu0  ;;  %v3706_v3 = vsel %vm378_vm1, %v7800_v30, -inf }
 0xc59   :  { %3707 = vmax.xlane.f32.xlu1 %v3706_v3  ;;  %v3703_v37 = vsel %vm378_vm1, %v7802_v59, -inf }
 0xc5a   :  { %3704 = vmax.xlane.f32.xlu0 %v3703_v37 }
 0xc60   :  { %v3666_v45 = vpop.xlane.xlu1 %3665 }
 0xc61   :  { %v3663_v4 = vpop.xlane.xlu0 %3662  ;;  %v3710_v49 = vsub.f32 %v5915_v12, %v3666_v45 }
 0xc62   :  { %v3709_v5 = vsub.f32 %v3043_v6, %v3663_v4 }
 0xc63   :  { %v3727_v13 = vmul.f32 1.442695, %v3710_v49 }
 0xc64   :  { %v3725_v19 = vmul.f32 1.442695, %v3709_v5 }
 0xc66   :  { %6787 = vpow2.f32 %v3725_v19 }
 0xc6a   :  { %6667 = vrot.lane.b32.xlu1 %v7678_v61, %s6950_s23 }
 0xc6e   :  { %6672 = vrot.lane.b32.xlu1 %v7670_v63, %s6953_s26 }
 0xc70   :  { %6662 = vrot.lane.b32.xlu0 %v7670_v63, %s6950_s23  ;;  %v3672_v2 = vpop.xlane.xlu0 %3671  ;;  %v7816_v39 = vpop.eup %6787 }
 0xc71   :  { %v3712_v23 = vsub.f32 %v5922_v36, %v3672_v2  ;;  %v3757_v20 = vsel %vm378_vm1, %v7816_v39, 0.0 }
 0xc72   :  { %6677 = vrot.lane.b32.xlu1 %v7678_v61, %s6953_s26 }
 0xc73   :  { %v3731_v16 = vmul.f32 1.442695, %v3712_v23 }
 0xc74   :  { %v3669_v46 = vpop.xlane.xlu0 %3668 }
 0xc75   :  { %v3711_v40 = vsub.f32 %v3130_v28, %v3669_v46 }
 0xc77   :  { %v3729_v22 = vmul.f32 1.442695, %v3711_v40 }
 0xc79   :  { %6789 = vpow2.f32 %v3729_v22 }
 0xc7a   :  { %6791 = vpow2.f32 %v3727_v13 }
 0xc7b   :  { %6793 = vpow2.f32 %v3731_v16 }
 0xc83   :  { %v7820_v1 = vpop.eup %6789 }
 0xc84   :  { %v7822_v33 = vpop.eup %6791  ;;  %v3763_v52 = vsel %vm378_vm1, %v7820_v1, 0.0 }
 0xc85   :  { %v3760_v24 = vsel %vm378_vm1, %v7822_v33, 0.0  ;;  %v7828_v15 = vpop.eup %6793 }
 0xc86   :  { %v3766_v34 = vsel %vm378_vm1, %v7828_v15, 0.0 }
 0xc8f   :  { %3758 = vadd.xlane.f32.xlu0 %v3757_v20 }
 0xc93   :  { %3764 = vadd.xlane.f32.xlu0 %v3763_v52 }
 0xc96   :  { %3761 = vadd.xlane.f32.xlu1 %v3760_v24 }
 0xc9a   :  { %3767 = vadd.xlane.f32.xlu1 %v3766_v34 }
 0xccb   :  { %v3678_v53 = vpop.xlane.xlu1 %3677 }
 0xccc   :  { %v3714_v12 = vsub.f32 %v7760_v18, %v3678_v53  ;;  %v3675_v6 = vpop.xlane.xlu0 %3674 }
 0xccd   :  { %v3713_v25 = vsub.f32 %v7762_v10, %v3675_v6 }
 0xcce   :  { %v3735_v0 = vmul.f32 1.442695, %v3714_v12 }
 0xccf   :  { %v3733_v36 = vmul.f32 1.442695, %v3713_v25 }
 0xcd0   :  { %6795 = vpow2.f32 %v3735_v0 }
 0xcd1   :  { %6797 = vpow2.f32 %v3733_v36 }
 0xcd3   :  { %v3684_v28 = vpop.xlane.xlu1 %3683 }
 0xcd4   :  { %v3716_v60 = vsub.f32 %v7768_v51, %v3684_v28  ;;  %v3681_v11 = vpop.xlane.xlu0 %3680 }
 0xcd5   :  { %v3715_v17 = vsub.f32 %v7770_v38, %v3681_v11 }
 0xcd6   :  { %v3739_v50 = vmul.f32 1.442695, %v3716_v60 }
 0xcd7   :  { %v3737_v29 = vmul.f32 1.442695, %v3715_v17 }
 0xcd8   :  { %6799 = vpow2.f32 %v3739_v50  ;;  %v3690_v41 = vpop.xlane.xlu1 %3689 }
 0xcd9   :  { %6801 = vpow2.f32 %v3737_v29  ;;  %v3718_v18 = vsub.f32 %v7776_v62, %v3690_v41  ;;  %v3687_v10 = vpop.xlane.xlu0 %3686 }
 0xcda   :  { %v7836_v42 = vpop.eup %6795  ;;  %v3717_v31 = vsub.f32 %v7778_v57, %v3687_v10 }
 0xcdb   :  { %v7839_v55 = vpop.eup %6797  ;;  %v3772_v51 = vsel %vm378_vm1, %v7836_v42, 0.0  ;;  %v3743_v47 = vmul.f32 1.442695, %v3718_v18 }
 0xcdc   :  { %3773 = vadd.xlane.f32.xlu1 %v3772_v51  ;;  %v3769_v38 = vsel %vm378_vm1, %v7839_v55, 0.0  ;;  %v3741_v56 = vmul.f32 1.442695, %v3717_v31 }
 0xcdd   :  { %3770 = vadd.xlane.f32.xlu0 %v3769_v38  ;;  %6803 = vpow2.f32 %v3743_v47 }
 0xcde   :  { %v3696_v21 = vpop.xlane.xlu1 %3695  ;;  %6805 = vpow2.f32 %v3741_v56 }
 0xcdf   :  { %v3720_v62 = vsub.f32 %v7784_v43, %v3696_v21  ;;  %v3693_v3 = vpop.xlane.xlu0 %3692 }
 0xce0   :  { %v3719_v37 = vsub.f32 %v7786_v44, %v3693_v3 }
 0xce1   :  { %v3747_v4 = vmul.f32 1.442695, %v3720_v62 }
 0xce2   :  { %v3745_v57 = vmul.f32 1.442695, %v3719_v37  ;;  %v3702_v2 = vpop.xlane.xlu1 %3701  ;;  %v7848_v5 = vpop.eup %6799 }
 0xce3   :  { %6807 = vpow2.f32 %v3747_v4  ;;  %v3722_v46 = vsub.f32 %v7792_v32, %v3702_v2  ;;  %v3699_v45 = vpop.xlane.xlu0 %3698  ;;  %v7851_v19 = vpop.eup %6801  ;;  %v3778_v43 = vsel %vm378_vm1, %v7848_v5, 0.0 }
 0xce4   :  { %6809 = vpow2.f32 %v3745_v57  ;;  %v3721_v40 = vsub.f32 %v7794_v54, %v3699_v45  ;;  %3779 = vadd.xlane.f32.xlu1 %v3778_v43  ;;  %v3775_v44 = vsel %vm378_vm1, %v7851_v19, 0.0 }
 0xce5   :  { %v3751_v49 = vmul.f32 1.442695, %v3722_v46  ;;  %3776 = vadd.xlane.f32.xlu0 %v3775_v44 }
 0xce6   :  { %v3749_v22 = vmul.f32 1.442695, %v3721_v40  ;;  %v3708_v13 = vpop.xlane.xlu1 %3707 }
 0xce7   :  { %6811 = vpow2.f32 %v3751_v49  ;;  %v3724_v32 = vsub.f32 %v7800_v30, %v3708_v13  ;;  %v3705_v23 = vpop.xlane.xlu0 %3704  ;;  %v7859_v16 = vpop.eup %6803 }
 0xce8   :  { %6813 = vpow2.f32 %v3749_v22  ;;  %v3723_v54 = vsub.f32 %v7802_v59, %v3705_v23  ;;  %v7862_v20 = vpop.eup %6805  ;;  %v3784_v24 = vsel %vm378_vm1, %v7859_v16, 0.0 }
 0xce9   :  { %v3755_v52 = vmul.f32 1.442695, %v3724_v32  ;;  %3785 = vadd.xlane.f32.xlu1 %v3784_v24  ;;  %v3781_v12 = vsel %vm378_vm1, %v7862_v20, 0.0 }
 0xcea   :  { %v3753_v34 = vmul.f32 1.442695, %v3723_v54  ;;  %v6668_v53 = vpop.permute.xlu1 %6667  ;;  %3782 = vadd.xlane.f32.xlu0 %v3781_v12 }
 0xceb   :  { %6815 = vpow2.f32 %v3755_v52  ;;  %v6670_v30 = vunpack.i.h.bf16 %v6668_v53  ;;  %v6669_v6 = vunpack.i.l.bf16 %v6668_v53  ;;  %v6663_v25 = vpop.permute.xlu0 %6662 }
 0xcec   :  { %6817 = vpow2.f32 %v3753_v34  ;;  %v6665_v0 = vunpack.i.h.bf16 %v6663_v25  ;;  %v6664_v59 = vunpack.i.l.bf16 %v6663_v25 }
 0xced   :  { %v7868_v36 = vpop.eup %6807  ;;  %v6357_v28 = vpack.c.bf16 %v6670_v30, %v6669_v6 }
 0xcee   :  { %v7870_v60 = vpop.eup %6809  ;;  %v6353_v11 = vpack.c.bf16 %v6665_v0, %v6664_v59  ;;  %v3790_v17 = vsel %vm378_vm1, %v7868_v36, 0.0  ;;  %v6673_v56 = vpop.permute.xlu1 %6672 }
 0xcef   :  { %3791 = vadd.xlane.f32.xlu1 %v3790_v17  ;;  %6358 = vmatprep.subr.bf16.mxu0 %v6357_v28  ;;  %v3787_v50 = vsel %vm378_vm1, %v7870_v60, 0.0  ;;  %v6675_v45 = vunpack.i.h.bf16 %v6673_v56 }
 0xcf0   :  { %3788 = vadd.xlane.f32.xlu0 %v3787_v50  ;;  %6354 = vmatprep.subr.bf16.mxu1 %v6353_v11 }
 0xcf1   :  { %v7876_v29 = vpop.eup %6811 }
 0xcf2   :  { %v7878_v41 = vpop.eup %6813  ;;  %v3796_v18 = vsel %vm378_vm1, %v7876_v29, 0.0  ;;  %v6678_v62 = vpop.permute.xlu1 %6677 }
 0xcf3   :  { %3797 = vadd.xlane.f32.xlu1 %v3796_v18  ;;  %v3793_v10 = vsel %vm378_vm1, %v7878_v41, 0.0  ;;  %v6680_v44 = vunpack.i.h.bf16 %v6678_v62  ;;  %v6679_v22 = vunpack.i.l.bf16 %v6678_v62 }
 0xcf4   :  { %3794 = vadd.xlane.f32.xlu0 %v3793_v10 }
 0xcf5   :  { %v7884_v31 = vpop.eup %6815  ;;  %v6365_v32 = vpack.c.bf16 %v6680_v44, %v6679_v22 }
 0xcf6   :  { %v7886_v51 = vpop.eup %6817  ;;  %v3802_v47 = vsel %vm378_vm1, %v7884_v31, 0.0 }
 0xcf7   :  { %3803 = vadd.xlane.f32.xlu1 %v3802_v47  ;;  %v3799_v38 = vsel %vm378_vm1, %v7886_v51, 0.0 }
 0xcf8   :  { %3800 = vadd.xlane.f32.xlu0 %v3799_v38 }
 0xd08   :  { %6687 = vrot.lane.b32.xlu1 %v7678_v61, %s6951_s24 }
 0xd0e   :  { %6682 = vrot.lane.b32.xlu0 %v7670_v63, %s6951_s24  ;;  %v6674_v63 = vunpack.i.l.bf16 %v6673_v56 }
 0xd10   :  { %v6361_v49 = vpack.c.bf16 %v6675_v45, %v6674_v63 }
 0xd1c   :  { %v3759_v21 = vpop.xlane.xlu0 %3758 }
 0xd1d   :  { %6819 = vrcp.f32 %v3759_v21 }
 0xd20   :  { %v3765_v3 = vpop.xlane.xlu0 %3764 }
 0xd21   :  { %6821 = vrcp.f32 %v3765_v3 }
 0xd23   :  { %v3762_v37 = vpop.xlane.xlu1 %3761 }
 0xd24   :  { %6823 = vrcp.f32 %v3762_v37 }
 0xd27   :  { %v6820_v4 = vpop.eup %6819  ;;  %v3768_v57 = vpop.xlane.xlu1 %3767 }
 0xd28   :  { %6825 = vrcp.f32 %v3768_v57  ;;  %v3821_v2 = vmul.f32 %v6820_v4, %v7816_v39 }
 0xd2a   :  { %5969 = vmatprep.mubr.msk.f32.mxu1 %vm378_vm1, %v3821_v2 }
 0xd2b   :  { %v6822_v46 = vpop.eup %6821 }
 0xd2c   :  { %v3823_v61 = vmul.f32 %v6822_v46, %v7820_v1 }
 0xd2e   :  { %v6824_v40 = vpop.eup %6823  ;;  %5976 = vmatprep.mubr.msk.f32.mxu0 %vm378_vm1, %v3823_v61 }
 0xd2f   :  { %v3822_v43 = vmul.f32 %v6824_v40, %v7822_v33  ;;  %v5413_v40 = vld [vmem:[%s8102_s3 + $0x50] sm:$0xff] }
 0xd31   :  { %5970 = vmatmul.mubr.msk.f32.vlgmr.msra.gmra.mrb[40].mxu1 %vm378_vm1, %v3822_v43 }
 0xd32   :  { %v6826_v13 = vpop.eup %6825  ;;  %6356 = vmatpush3.bf16.msra.mxu1 %v6353_v11 }
 0xd33   :  { %v3824_v39 = vmul.f32 %v6826_v13, %v7828_v15  ;;  %6362 = vmatprep.subr.bf16.mxu1 %v6361_v49 }
 0xd35   :  { %5977 = vmatmul.mubr.msk.f32.vlgmr.msra.gmra.mrb[36].mxu0 %vm378_vm1, %v3824_v39  ;;  %v5415_v39 = vld [vmem:[%s8102_s3 + $0x60] sm:$0xff] }
 0xd36   :  { %6360 = vmatpush3.bf16.msra.mxu0 %v6357_v28 }
 0xd37   :  { %6366 = vmatprep.subr.bf16.mxu0 %v6365_v32 }
 0xd69   :  { %v3774_v1 = vpop.xlane.xlu1 %3773 }
 0xd6a   :  { %6827 = vrcp.f32 %v3774_v1  ;;  %v3771_v23 = vpop.xlane.xlu0 %3770 }
 0xd6b   :  { %6829 = vrcp.f32 %v3771_v23 }
 0xd71   :  { %v3780_v33 = vpop.xlane.xlu1 %3779 }
 0xd72   :  { %6831 = vrcp.f32 %v3780_v33  ;;  %v3777_v54 = vpop.xlane.xlu0 %3776  ;;  %v5417_v33 = vld [vmem:[%s8102_s3 + $0x70] sm:$0xff] }
 0xd73   :  { %6833 = vrcp.f32 %v3777_v54  ;;  %v5418_v54 = vld [vmem:[%s8102_s3 + $0x78] sm:$0xff] }
 0xd74   :  { %v6828_v52 = vpop.eup %6827 }
 0xd75   :  { %v6830_v24 = vpop.eup %6829  ;;  %v3826_v15 = vmul.f32 %v6828_v52, %v7836_v42 }
 0xd76   :  { %v3825_v34 = vmul.f32 %v6830_v24, %v7839_v55  ;;  %v3786_v53 = vpop.xlane.xlu1 %3785 }
 0xd77   :  { %6835 = vrcp.f32 %v3786_v53  ;;  %v3783_v12 = vpop.xlane.xlu0 %3782 }
 0xd78   :  { %5983 = vmatprep.mubr.msk.f32.mxu1 %vm378_vm1, %v3825_v34  ;;  %6837 = vrcp.f32 %v3783_v12  ;;  %v6389_v34 = vpack.c.bf16 %v5418_v54, %v5417_v33 }
 0xd79   :  { %5984 = vmatmul.mubr.msk.f32.vlgmr.msra.gmra.mrb[42].mxu1 %vm378_vm1, %v3826_v15 }
 0xd7a   :  { %6364 = vmatpush3.bf16.msra.mxu1 %v6361_v49 }
 0xd7c   :  { %v3792_v30 = vpop.xlane.xlu1 %3791  ;;  %v6832_v6 = vpop.eup %6831 }
 0xd7d   :  { %6839 = vrcp.f32 %v3792_v30  ;;  %v3789_v25 = vpop.xlane.xlu0 %3788  ;;  %v6834_v0 = vpop.eup %6833  ;;  %v3828_v55 = vmul.f32 %v6832_v6, %v7848_v5 }
 0xd7e   :  { %6841 = vrcp.f32 %v3789_v25  ;;  %v3827_v59 = vmul.f32 %v6834_v0, %v7851_v19 }
 0xd80   :  { %v3798_v42 = vpop.xlane.xlu1 %3797  ;;  %5990 = vmatprep.mubr.msk.f32.mxu0 %vm378_vm1, %v3827_v59 }
 0xd81   :  { %v3795_v28 = vpop.xlane.xlu0 %3794  ;;  %v6836_v11 = vpop.eup %6835  ;;  %5991 = vmatmul.mubr.msk.f32.vlgmr.msra.gmra.mrb[38].mxu0 %vm378_vm1, %v3828_v55 }
 0xd82   :  { %6843 = vrcp.f32 %v3795_v28  ;;  %v6838_v17 = vpop.eup %6837  ;;  %6368 = vmatpush3.bf16.msra.mxu0 %v6365_v32  ;;  %v3830_v10 = vmul.f32 %v6836_v11, %v7859_v16  ;;  %v5412_v16 = vld [vmem:[%s8102_s3 + $0x48] sm:$0xff] }
 0xd83   :  { %6845 = vrcp.f32 %v3798_v42  ;;  %v3829_v18 = vmul.f32 %v6838_v17, %v7862_v20  ;;  %v5411_v20 = vld [vmem:[%s8102_s3 + $0x40] sm:$0xff]  ;;  %v7971_v28 = vld [vmem:[%s8106_s7 + $0x8] sm:$0x3f] }
 0xd84   :  { %v3804_v50 = vpop.xlane.xlu1 %3803  ;;  %v4594_v11 = vrot.slane %v7971_v28, %v2002_v48 }
 0xd85   :  { %6847 = vrcp.f32 %v3804_v50  ;;  %v3801_v19 = vpop.xlane.xlu0 %3800  ;;  %5997 = vmatprep.mubr.msk.f32.mxu1 %vm378_vm1, %v3829_v18 }
 0xd86   :  { %6849 = vrcp.f32 %v3801_v19  ;;  %5998 = vmatmul.mubr.msk.f32.vlgmr.msra.gmra.mrb[44].mxu1 %vm378_vm1, %v3830_v10 }
 0xd87   :  { %v6840_v5 = vpop.eup %6839 }
 0xd88   :  { %v6842_v47 = vpop.eup %6841  ;;  %v6688_v38 = vpop.permute.xlu1 %6687  ;;  %v3832_v37 = vmul.f32 %v6840_v5, %v7868_v36  ;;  %v5414_v36 = vld [vmem:[%s8102_s3 + $0x58] sm:$0xff] }
 0xd89   :  { %v6690_v56 = vunpack.i.h.bf16 %v6688_v38  ;;  %v6689_v21 = vunpack.i.l.bf16 %v6688_v38  ;;  %v6683_v62 = vpop.permute.xlu0 %6682  ;;  %v3831_v3 = vmul.f32 %v6842_v47, %v7870_v60  ;;  %v6377_v60 = vpack.c.bf16 %v5412_v16, %v5411_v20 }
 0xd8a   :  { %v6685_v4 = vunpack.i.h.bf16 %v6683_v62  ;;  %v6684_v57 = vunpack.i.l.bf16 %v6683_v62  ;;  %v6381_v22 = vpack.c.bf16 %v5414_v36, %v5413_v40  ;;  %v4990_v40 = vld [vmem:[#allocation5 + $0x58] sm:$0xff] }
 0xd8b   :  { %v6373_v2 = vpack.c.bf16 %v6690_v56, %v6689_v21  ;;  %6004 = vmatprep.mubr.msk.f32.mxu0 %vm378_vm1, %v3831_v3 }
 0xd8c   :  { %v6844_v46 = vpop.eup %6843  ;;  %v6369_v61 = vpack.c.bf16 %v6685_v4, %v6684_v57  ;;  %6005 = vmatmul.mubr.msk.f32.vlgmr.msra.gmra.mrb[40].mxu0 %vm378_vm1, %v3832_v37 }
 0xd8d   :  { %v6846_v45 = vpop.eup %6845  ;;  %6374 = vmatprep.subr.bf16.mxu0 %v6373_v2  ;;  %v3833_v63 = vmul.f32 %v6844_v46, %v7878_v41 }
 0xd8e   :  { %6370 = vmatprep.subr.bf16.mxu1 %v6369_v61  ;;  %6376 = vmatpush3.bf16.msra.mxu0 %v6373_v2  ;;  %v3834_v44 = vmul.f32 %v6846_v45, %v7876_v29  ;;  %v5416_v29 = vld [vmem:[%s8102_s3 + $0x68] sm:$0xff] }
 0xd8f   :  { %v6848_v43 = vpop.eup %6847  ;;  %6372 = vmatpush3.bf16.msra.mxu1 %v6369_v61  ;;  %6011 = vmatprep.mubr.msk.f32.mxu1 %vm378_vm1, %v3833_v63  ;;  %v6385_v1 = vpack.c.bf16 %v5416_v29, %v5415_v39  ;;  %v4988_v45 = vld [vmem:[#allocation5 + $0x48] sm:$0xff] }
 0xd90   :  { %v6850_v49 = vpop.eup %6849  ;;  %6378 = vmatprep.subr.bf16.mxu1 %v6377_v60  ;;  %v3836_v13 = vmul.f32 %v6848_v43, %v7884_v31  ;;  %v4991_v43 = vld [vmem:[#allocation5 + $0x60] sm:$0xff] }
 0xd91   :  { %v3835_v41 = vmul.f32 %v6850_v49, %v7886_v51  ;;  %v4992_v49 = vld [vmem:[#allocation5 + $0x68] sm:$0xff] }
 0xd92   :  { %6012 = vmatmul.mubr.msk.f32.vlgmr.msra.gmra.mrb[46].mxu1 %vm378_vm1, %v3834_v44  ;;  %v4993_v44 = vld [vmem:[#allocation5 + $0x70] sm:$0xff] }
 0xd93   :  { %6018 = vmatprep.mubr.msk.f32.mxu0 %vm378_vm1, %v3835_v41  ;;  %6380 = vmatpush3.bf16.msra.mxu1 %v6377_v60  ;;  %v4987_v60 = vld [vmem:[#allocation5 + $0x40] sm:$0xff]  ;;  %v4994_v41 = vld [vmem:[#allocation5 + $0x78] sm:$0xff] }
 0xd94   :  { %6019 = vmatmul.mubr.msk.f32.vlgmr.msra.gmra.mrb[42].mxu0 %vm378_vm1, %v3836_v13  ;;  %6382 = vmatprep.subr.bf16.mxu1 %v6381_v22  ;;  %v6393_v63 = vpack.c.bf16 %v4988_v45, %v4987_v60  ;;  %v6405_v13 = vpack.c.bf16 %v4994_v41, %v4993_v44  ;;  %v5442_v41 = vld [vmem:[%s8105_s6 + $0x88] sm:$0xff] }
 0xd96   :  { %6394 = vmatprep.subr.bf16.mxu0 %v6393_v63 }
 0xd97   :  { %6396 = vmatpush3.bf16.msra.mxu0 %v6393_v63 }
 0xe04   :  { %v5971_v32 = vpop.f32.mrb[40].mxu1 }
 0xe05   :  { %v3909_v51 = vpop.f32.mrb[41].mxu1 }
 0xe06   :  { %6025 = vmatprep.mubr.msk.f32.mxu1 %vm378_vm1, %v3909_v51 }
 0xe07   :  { %6026 = vmatmul.mubr.msk.f32.vlgmr.msra.gmra.mrb[48].mxu1 %vm378_vm1, %v5971_v32 }
 0xe08   :  { %v5978_v31 = vpop.f32.mrb[36].mxu0  ;;  %6384 = vmatpush3.bf16.msra.mxu1 %v6381_v22  ;;  %v6401_v22 = vpack.c.bf16 %v4992_v49, %v4991_v43 }
 0xe09   :  { %v3990_v23 = vpop.f32.mrb[37].mxu0  ;;  %6386 = vmatprep.subr.bf16.mxu1 %v6385_v1 }
 0xe0a   :  { %6028 = vmatprep.mubr.msk.f32.mxu1 %vm378_vm1, %v3990_v23 }
 0xe0b   :  { %6029 = vmatmul.mubr.msk.f32.gmra.mrb[50].mxu1 %vm378_vm1, %v5978_v31 }
 0xe4c   :  { %v5985_v52 = vpop.f32.mrb[42].mxu1 }
 0xe4d   :  { %v4071_v24 = vpop.f32.mrb[43].mxu1 }
 0xe4e   :  { %6035 = vmatprep.mubr.msk.f32.mxu1 %vm378_vm1, %v4071_v24 }
 0xe4f   :  { %6036 = vmatmul.mubr.msk.f32.vlgmr.msra.gmra.mrb[48].mxu1 %vm378_vm1, %v5985_v52 }
 0xe50   :  { %6388 = vmatpush3.bf16.msra.mxu1 %v6385_v1 }
 0xe51   :  { %6390 = vmatprep.subr.bf16.mxu1 %v6389_v34 }
 0xe54   :  { %v5992_v15 = vpop.f32.mrb[38].mxu0 }
 0xe55   :  { %v4152_v53 = vpop.f32.mrb[39].mxu0 }
 0xe56   :  { %6038 = vmatprep.mubr.msk.f32.mxu1 %vm378_vm1, %v4152_v53 }
 0xe57   :  { %6039 = vmatmul.mubr.msk.f32.gmra.mrb[50].mxu1 %vm378_vm1, %v5992_v15 }
 0xe59   :  { %v5999_v12 = vpop.f32.mrb[44].mxu1 }
 0xe5a   :  { %v4233_v30 = vpop.f32.mrb[45].mxu1 }
 0xe5b   :  { %6045 = vmatprep.mubr.msk.f32.mxu1 %vm378_vm1, %v4233_v30 }
 0xe5c   :  { %6046 = vmatmul.mubr.msk.f32.vlgmr.msra.gmra.mrb[48].mxu1 %vm378_vm1, %v5999_v12 }
 0xe5d   :  { %6392 = vmatpush3.bf16.msra.mxu1 %v6389_v34 }
 0xe5f   :  { %v6006_v6 = vpop.f32.mrb[40].mxu0 }
 0xe60   :  { %v4314_v25 = vpop.f32.mrb[41].mxu0 }
 0xe61   :  { %6048 = vmatprep.mubr.msk.f32.mxu1 %vm378_vm1, %v4314_v25 }
 0xe62   :  { %6049 = vmatmul.mubr.msk.f32.gmra.mrb[50].mxu1 %vm378_vm1, %v6006_v6 }
 0xe65   :  { %v6013_v0 = vpop.f32.mrb[46].mxu1 }
 0xe66   :  { %v4395_v59 = vpop.f32.mrb[47].mxu1 }
 0xe67   :  { %v6020_v55 = vpop.f32.mrb[42].mxu0  ;;  %6055 = vmatprep.mubr.msk.f32.mxu1 %vm378_vm1, %v4395_v59 }
 0xe68   :  { %v4476_v42 = vpop.f32.mrb[43].mxu0  ;;  %6056 = vmatmul.mubr.msk.f32.vlgmr.msra.gmra.mrb[48].mxu1 %vm378_vm1, %v6013_v0 }
 0xe69   :  { %6058 = vmatprep.mubr.msk.f32.mxu1 %vm378_vm1, %v4476_v42 }
 0xe6c   :  { %6059 = vmatmul.mubr.msk.f32.gmra.mrb[50].mxu1 %vm378_vm1, %v6020_v55 }
 0xf3b   :  { %v6057_v17 = vpop.f32.mrb[48].mxu1 }
 0xf3c   :  { %v6453_v50 = vadd.f32 %v6057_v17, %v4594_v11  ;;  %v4879_v18 = vpop.f32.mrb[49].mxu1 }
 0xf3d   :  { %v6454_v10 = vadd.f32 %v4879_v18, %v4594_v11 }
 0xf3e   :  { %v7977_v19 = vadd.f32 %v6453_v50, %v7564_v8 }
 0xf3f   :  { %v7980_v5 = vadd.f32 %v6454_v10, %v7567_v9  ;;  %v6060_v47 = vpop.f32.mrb[50].mxu1 }
 0xf40   :  { %v6455_v38 = vadd.f32 %v6060_v47, %v4594_v11  ;;  %v4889_v56 = vpop.f32.mrb[51].mxu1  ;;  %v4909_v21 = vsel %vm63_vm0, %v7977_v19, 0.0  ;;  %v4923_v62 = vmul.f32 %v7977_v19, %v7977_v19 }
 0xf41   :  { %4910 = vadd.xlane.f32.xlu1 %v4909_v21  ;;  %v4906_v48 = vsel %vm63_vm0, %v7980_v5, 0.0  ;;  %v6456_v20 = vadd.f32 %v4889_v56, %v4594_v11  ;;  %v4922_v37 = vmul.f32 %v7980_v5, %v7980_v5 }
 0xf42   :  { %v7989_v3 = vadd.f32 %v6455_v38, %v7579_v58  ;;  %4907 = vadd.xlane.f32.xlu0 %v4906_v48  ;;  %v4929_v16 = vsel %vm63_vm0, %v4923_v62, 0.0 }
 0xf43   :  { %v8000_v58 = vadd.f32 %v6456_v20, %v7582_v27  ;;  %v4926_v57 = vsel %vm63_vm0, %v4922_v37, 0.0  ;;  %v4989_v27 = vld [vmem:[#allocation5 + $0x50] sm:$0xff]  ;;  %v4973_v20 = vrot.slane %v7971_v28, %v2381_v14 }
 0xf44   :  { %v4915_v8 = vsel %vm63_vm0, %v7989_v3, 0.0  ;;  %v4925_v9 = vmul.f32 %v7989_v3, %v7989_v3  ;;  %v6397_v36 = vpack.c.bf16 %v4990_v40, %v4989_v27 }
 0xf45   :  { %4916 = vadd.xlane.f32.xlu1 %v4915_v8  ;;  %v4912_v2 = vsel %vm63_vm0, %v8000_v58, 0.0  ;;  %v4924_v46 = vmul.f32 %v8000_v58, %v8000_v58 }
 0xf46   :  { %4930 = vadd.xlane.f32.xlu0 %v4929_v16  ;;  %v4935_v4 = vsel %vm63_vm0, %v4925_v9, 0.0  ;;  %6398 = vmatprep.subr.bf16.mxu0 %v6397_v36 }
 0xf47   :  { %v4932_v61 = vsel %vm63_vm0, %v4924_v46, 0.0  ;;  %6400 = vmatpush3.bf16.msra.mxu0 %v6397_v36 }
 0xf48   :  { %6402 = vmatprep.subr.bf16.mxu0 %v6401_v22 }
 0xf49   :  { %4936 = vadd.xlane.f32.xlu1 %v4935_v4 }
 0xf4a   :  { %4927 = vadd.xlane.f32.xlu0 %v4926_v57  ;;  %v4981_v57 = vrot.slane %v7971_v28, %v2389_v26 }
 0xf4b   :  { %6404 = vmatpush3.bf16.msra.mxu0 %v6401_v22  ;;  %v5441_v22 = vld [vmem:[%s8105_s6 + $0x80] sm:$0xff] }
 0xf4c   :  { %6406 = vmatprep.subr.bf16.mxu0 %v6405_v13 }
 0xf4e   :  { %4913 = vadd.xlane.f32.xlu0 %v4912_v2 }
 0xf4f   :  { %6408 = vmatpush3.bf16.msra.mxu0 %v6405_v13  ;;  %v6409_v13 = vpack.c.bf16 %v5442_v41, %v5441_v22 }
 0xf51   :  { %6410 = vmatprep.subr.bf16.mxu0 %v6409_v13 }
 0xf52   :  { %4933 = vadd.xlane.f32.xlu0 %v4932_v61 }
 0xfce   :  { %v4911_v39 = vpop.xlane.xlu1 %4910 }
 0xfcf   :  { %v4908_v29 = vpop.xlane.xlu0 %4907  ;;  %v4919_v32 = vmul.f32 0.015625, %v4911_v39  ;;  %v5443_v39 = vld [vmem:[%s8105_s6 + $0x90] sm:$0xff] }
 0xfd0   :  { %v4918_v33 = vmul.f32 0.015625, %v4908_v29  ;;  %v5444_v29 = vld [vmem:[%s8105_s6 + $0x98] sm:$0xff] }
 0xfd1   :  { %v4943_v23 = vmul.f32 %v4919_v32, %v4919_v32  ;;  %v4955_v62 = vsub.f32 %v7977_v19, %v4919_v32  ;;  %v6413_v32 = vpack.c.bf16 %v5444_v29, %v5443_v39 }
 0xfd2   :  { %v4917_v51 = vpop.xlane.xlu1 %4916  ;;  %v4942_v12 = vmul.f32 %v4918_v33, %v4918_v33  ;;  %v4954_v16 = vsub.f32 %v7980_v5, %v4918_v33  ;;  %v5448_v33 = vld [vmem:[%s8105_s6 + $0xb8] sm:$0xff] }
 0xfd3   :  { %v4921_v1 = vmul.f32 0.015625, %v4917_v51  ;;  %v4931_v31 = vpop.xlane.xlu0 %4930  ;;  %v5445_v51 = vld [vmem:[%s8105_s6 + $0xa0] sm:$0xff] }
 0xfd4   :  { %v4939_v54 = vmul.f32 0.015625, %v4931_v31 }
 0xfd5   :  { %v4945_v34 = vmul.f32 %v4921_v1, %v4921_v1  ;;  %v4957_v60 = vsub.f32 %v7989_v3, %v4921_v1  ;;  %v5446_v1 = vld [vmem:[%s8105_s6 + $0xa8] sm:$0xff] }
 0xfd6   :  { %v4947_v52 = vsub.f32 %v4939_v54, %v4943_v23  ;;  %v4937_v24 = vpop.xlane.xlu1 %4936  ;;  %v6417_v31 = vpack.c.bf16 %v5446_v1, %v5445_v51  ;;  %v5447_v23 = vld [vmem:[%s8105_s6 + $0xb0] sm:$0xff] }
 0xfd7   :  { %v4941_v15 = vmul.f32 0.015625, %v4937_v24  ;;  %v4928_v53 = vpop.xlane.xlu0 %4927  ;;  %v6421_v54 = vpack.c.bf16 %v5448_v33, %v5447_v23  ;;  %v5450_v24 = vld [vmem:[%s8105_s6 + $0xc8] sm:$0xff] }
 0xfd8   :  { %v4951_v30 = vmax.f32 %v4947_v52, 0.0  ;;  %v4938_v6 = vmul.f32 0.015625, %v4928_v53  ;;  %v5449_v52 = vld [vmem:[%s8105_s6 + $0xc0] sm:$0xff]  ;;  %v5452_v53 = vld [vmem:[%s8105_s6 + $0xd8] sm:$0xff] }
 0xfd9   :  { %v4949_v25 = vsub.f32 %v4941_v15, %v4945_v34  ;;  %v6425_v34 = vpack.c.bf16 %v5450_v24, %v5449_v52  ;;  %v5451_v15 = vld [vmem:[%s8105_s6 + $0xd0] sm:$0xff]  ;;  %v5156_v52 = vrot.slane %v7971_v28, %v2561_v35 }
 0xfda   :  { %v4959_v0 = vadd.f32 1e-06, %v4951_v30  ;;  %v4946_v59 = vsub.f32 %v4938_v6, %v4942_v12  ;;  %v6429_v12 = vpack.c.bf16 %v5452_v53, %v5451_v15  ;;  %v5453_v30 = vld [vmem:[%s8105_s6 + $0xe0] sm:$0xff]  ;;  %v5454_v6 = vld [vmem:[%s8105_s6 + $0xe8] sm:$0xff] }
 0xfdb   :  { %v4953_v55 = vmax.f32 %v4949_v25, 0.0  ;;  %v4914_v42 = vpop.xlane.xlu0 %4913  ;;  %v6433_v25 = vpack.c.bf16 %v5454_v6, %v5453_v30 }
 0xfdc   :  { %6851 = vrsqrt.f32 %v4959_v0  ;;  %v4950_v11 = vmax.f32 %v4946_v59, 0.0  ;;  %v4920_v17 = vmul.f32 0.015625, %v4914_v42  ;;  %v5455_v0 = vld [vmem:[%s8105_s6 + $0xf0] sm:$0xff]  ;;  %v5456_v59 = vld [vmem:[%s8105_s6 + $0xf8] sm:$0xff]  ;;  %v5436_v42 = vld [vmem:[%s8104_s5 + $0x1] ss:$0 sm:$0xff] }
 0xfdd   :  { %v4961_v18 = vadd.f32 1e-06, %v4953_v55  ;;  %v6437_v55 = vpack.c.bf16 %v5456_v59, %v5455_v0  ;;  %s6954_s5 = smov [#allocation7]  }
 0xfde   :  { %v4958_v50 = vadd.f32 1e-06, %v4950_v11  ;;  %v4944_v47 = vmul.f32 %v4920_v17, %v4920_v17  ;;  %v4956_v40 = vsub.f32 %v8000_v58, %v4920_v17  ;;  %s5255_s6 = sshll.u32 %s6954_s5, 4  ;;  %s5256_s6 = int_to_ptr.vmem [resolvable:$true] %s5255_s6 }
 0xfdf   :  { %v4934_v10 = vpop.xlane.xlu0 %4933  ;;  %s6917_s2 = scalar_lea.vmem %s5256_s6, 512  ;;  %p6922_p3 = scmp.lt.s32.totalorder %s5256_s6, %s5256_s6 }
 0xfe0   :  { %6853 = vrsqrt.f32 %v4958_v50  ;;  %v4940_v38 = vmul.f32 0.015625, %v4934_v10  ;;  %p6918_p2 = scmp.ne.s32.totalorder %s5256_s6, %s6917_s2  ;;  %p6923_p4 = scmp.lt.s32.totalorder %s6917_s2, %s6917_s2 }
 0xfe1   :  { %6855 = vrsqrt.f32 %v4961_v18 }
 0xfe2   :  { %v4948_v56 = vsub.f32 %v4940_v38, %v4944_v47  ;;  %p6924_p5 = por %p6923_p4, %p6922_p3 }
 0xfe4   :  { %v4952_v21 = vmax.f32 %v4948_v56, 0.0  ;;  %p6925_p6 = pnand %p6924_p5, %p6918_p2 }
 0xfe6   :  { %v6852_v48 = vpop.eup %6851  ;;  %v4960_v8 = vadd.f32 1e-06, %v4952_v21 }
 0xfe7   :  { %v4967_v9 = vmul.f32 %v6852_v48, %v4955_v62 }
 0xfe8   :  { %6857 = vrsqrt.f32 %v4960_v8 }
 0xfe9   :  { %v4975_v2 = vmul.f32 %v4973_v20, %v4967_v9 }
 0xfea   :  { %v6854_v37 = vpop.eup %6853 }
 0xfeb   :  { %v4966_v4 = vmul.f32 %v6854_v37, %v4954_v16  ;;  %v6856_v46 = vpop.eup %6855  ;;  %v4983_v63 = vadd.f32 %v4981_v57, %v4975_v2 }
 0xfec   :  { %v4969_v27 = vmul.f32 %v6856_v46, %v4957_v60 }
 0xfed   :  { %v4974_v61 = vmul.f32 %v4973_v20, %v4966_v4 }
 0xfee   :  { %v4977_v43 = vmul.f32 %v4973_v20, %v4969_v27 }
 0xfef   :  { %v4982_v45 = vadd.f32 %v4981_v57, %v4974_v61 }
 0xff0   :  { %v4985_v26 = vadd.f32 %v4981_v57, %v4977_v43 }
 0xff1   :  { %6077 = vmatprep.mubr.msk.f32.mxu0 %vm63_vm0, %v4982_v45 }
 0xff2   :  { %v6858_v14 = vpop.eup %6857  ;;  %6078 = vmatmul.mubr.msk.f32.vlgmr.msra.gmra.mrb[44].mxu0 %vm63_vm0, %v4983_v63 }
 0xff3   :  { %v4968_v36 = vmul.f32 %v6858_v14, %v4956_v40  ;;  %6412 = vmatpush3.bf16.msra.mxu0 %v6409_v13 }
 0xff4   :  { %6414 = vmatprep.subr.bf16.mxu0 %v6413_v32 }
 0xff5   :  { %v4976_v49 = vmul.f32 %v4973_v20, %v4968_v36 }
 0xff7   :  { %v4984_v44 = vadd.f32 %v4981_v57, %v4976_v49  ;;  %6416 = vmatpush3.bf16.msra.mxu0 %v6413_v32 }
 0xff8   :  { %6418 = vmatprep.subr.bf16.mxu0 %v6417_v31 }
 0xff9   :  { %6080 = vmatprep.mubr.msk.f32.mxu0 %vm63_vm0, %v4984_v44 }
 0xffa   :  { %6081 = vmatmul.mubr.msk.f32.gmra.mrb[46].mxu0 %vm63_vm0, %v4985_v26 }
 0xffb   :  { %6420 = vmatpush3.bf16.msra.mxu0 %v6417_v31 }
 0xffc   :  { %6422 = vmatprep.subr.bf16.mxu0 %v6421_v54 }
 0xfff   :  { %6424 = vmatpush3.bf16.msra.mxu0 %v6421_v54 }
0x1000   :  { %6426 = vmatprep.subr.bf16.mxu0 %v6425_v34 }
0x1003   :  { %6428 = vmatpush3.bf16.msra.mxu0 %v6425_v34 }
0x1004   :  { %6430 = vmatprep.subr.bf16.mxu0 %v6429_v12 }
0x1007   :  { %6432 = vmatpush3.bf16.msra.mxu0 %v6429_v12 }
0x1008   :  { %6434 = vmatprep.subr.bf16.mxu0 %v6433_v25 }
0x100b   :  { %6436 = vmatpush3.bf16.msra.mxu0 %v6433_v25 }
0x100c   :  { %6438 = vmatprep.subr.bf16.mxu0 %v6437_v55 }
0x100f   :  { %6440 = vmatpush3.bf16.msra.mxu0 %v6437_v55 }
0x10c5   :  { %v6079_v11 = vpop.f32.mrb[44].mxu0 }
0x10c6   :  { %v5087_v17 = vadd.f32 %v6079_v11, %v5436_v42  ;;  %v5081_v50 = vpop.f32.mrb[45].mxu0 }
0x10c7   :  { %v5082_v18 = vadd.f32 %v5436_v42, %v5081_v50 }
0x10c8   :  { %v5101_v10 = vmul.f32 %v5087_v17, %v5087_v17 }
0x10c9   :  { %v5100_v47 = vmul.f32 %v5082_v18, %v5082_v18 }
0x10ca   :  { %v5105_v38 = vmul.f32 %v5101_v10, %v5087_v17 }
0x10cb   :  { %v5104_v56 = vmul.f32 %v5100_v47, %v5082_v18 }
0x10cc   :  { %v5109_v21 = vmul.f32 0.044715, %v5105_v38 }
0x10cd   :  { %v5108_v48 = vmul.f32 0.044715, %v5104_v56  ;;  %v6082_v62 = vpop.f32.mrb[46].mxu0 }
0x10ce   :  { %v5113_v8 = vadd.f32 %v5109_v21, %v5087_v17  ;;  %v5097_v9 = vadd.f32 %v6082_v62, %v5436_v42  ;;  %v5091_v20 = vpop.f32.mrb[47].mxu0 }
0x10cf   :  { %v5112_v16 = vadd.f32 %v5108_v48, %v5082_v18  ;;  %v5092_v37 = vadd.f32 %v5436_v42, %v5091_v20 }
0x10d0   :  { %v5117_v4 = vmul.f32 0.7978846, %v5113_v8  ;;  %v5103_v57 = vmul.f32 %v5097_v9, %v5097_v9 }
0x10d1   :  { %v5116_v2 = vmul.f32 0.7978846, %v5112_v16  ;;  %v5102_v46 = vmul.f32 %v5092_v37, %v5092_v37 }
0x10d2   :  { %6859 = vtanh.f32 %v5117_v4  ;;  %v5107_v61 = vmul.f32 %v5103_v57, %v5097_v9 }
0x10d3   :  { %v5106_v60 = vmul.f32 %v5102_v46, %v5092_v37  ;;  %6861 = vtanh.f32 %v5116_v2 }
0x10d4   :  { %v5111_v45 = vmul.f32 0.044715, %v5107_v61 }
0x10d5   :  { %v5110_v63 = vmul.f32 0.044715, %v5106_v60 }
0x10d6   :  { %v5115_v27 = vadd.f32 %v5111_v45, %v5097_v9 }
0x10d7   :  { %v5114_v40 = vadd.f32 %v5110_v63, %v5092_v37 }
0x10d8   :  { %v5119_v14 = vmul.f32 0.7978846, %v5115_v27 }
0x10d9   :  { %v5118_v36 = vmul.f32 0.7978846, %v5114_v40 }
0x10da   :  { %6863 = vtanh.f32 %v5119_v14 }
0x10db   :  { %6865 = vtanh.f32 %v5118_v36 }
0x10dc   :  { %v6860_v43 = vpop.eup %6859 }
0x10dd   :  { %v6862_v49 = vpop.eup %6861  ;;  %v5125_v44 = vadd.f32 1.0, %v6860_v43 }
0x10de   :  { %v5124_v26 = vadd.f32 1.0, %v6862_v49 }
0x10df   :  { %v5129_v22 = vmul.f32 0.5, %v5125_v44 }
0x10e0   :  { %v5128_v41 = vmul.f32 0.5, %v5124_v26 }
0x10e1   :  { %v5133_v39 = vmul.f32 %v5129_v22, %v5087_v17 }
0x10e2   :  { %v5132_v13 = vmul.f32 %v5128_v41, %v5082_v18 }
0x10e4   :  { %v6864_v29 = vpop.eup %6863  ;;  %6115 = vmatprep.mubr.f32.mxu0 %v5132_v13 }
0x10e5   :  { %v6866_v32 = vpop.eup %6865  ;;  %6116 = vmatmul.mubr.f32.vlgmr.msra.gmra.mrb[48].mxu0 %v5133_v39  ;;  %v5127_v51 = vadd.f32 1.0, %v6864_v29 }
0x10e6   :  { %v5126_v1 = vadd.f32 1.0, %v6866_v32 }
0x10e7   :  { %v5131_v31 = vmul.f32 0.5, %v5127_v51 }
0x10e8   :  { %v5130_v23 = vmul.f32 0.5, %v5126_v1 }
0x10e9   :  { %v5135_v54 = vmul.f32 %v5131_v31, %v5097_v9 }
0x10ea   :  { %v5134_v33 = vmul.f32 %v5130_v23, %v5092_v37 }
0x10ec   :  { %6118 = vmatprep.mubr.f32.mxu0 %v5134_v33 }
0x10ed   :  { %6119 = vmatmul.mubr.f32.gmra.mrb[50].mxu0 %v5135_v54 }
0x11b8   :  { %v6117_v24 = vpop.f32.mrb[48].mxu0 }
0x11b9   :  { %v5229_v34 = vadd.f32 %v6117_v24, %v5156_v52  ;;  %v5223_v15 = vpop.f32.mrb[49].mxu0 }
0x11ba   :  { %v5224_v53 = vadd.f32 %v5223_v15, %v5156_v52 }
0x11bb   :  { %v5243_v12 = vadd.f32 %v5229_v34, %v7977_v19 }
0x11bc   :  { %v5242_v30 = vadd.f32 %v5224_v53, %v7980_v5 }
0x11bd   :  { %5247 = vst.msk [vmem:[#allocation7 + $0x8] sm:$0xff] %vm63_vm0, %v5243_v12 }
0x11be   :  { %5246 = vst.msk [vmem:[#allocation7] sm:$0xff] %vm63_vm0, %v5242_v30 }
0x11c0   :  { %v6120_v6 = vpop.f32.mrb[50].mxu0 }
0x11c1   :  { %v5239_v25 = vadd.f32 %v6120_v6, %v5156_v52  ;;  %v5233_v0 = vpop.f32.mrb[51].mxu0 }
0x11c2   :  { %v5234_v7 = vadd.f32 %v5233_v0, %v5156_v52 }
0x11c3   :  { %v5245_v35 = vadd.f32 %v5239_v25, %v7989_v3 }
0x11c4   :  { %v5244_v28 = vadd.f32 %v5234_v7, %v8000_v58 }
0x11c5   :  { %5249 = vst.msk [vmem:[#allocation7 + $0x18] sm:$0xff] %vm63_vm0, %v5245_v35 }
0x11c6   :  { %5248 = vst.msk [vmem:[#allocation7 + $0x10] sm:$0xff] %vm63_vm0, %v5244_v28 }
0x11c7   :  { %6928 = shalt.err (!%p6925_p6)
}
0x11c8   :  { %s6929_s25 = scalar_lea.hbm %s8107_s8, 512 }
0x11c9   :  { %p6930_p7 = scmp.ne.s32.totalorder %s8107_s8, %s6929_s25  ;;  %p6933_p8 = scmp.lt.u32.totalorder %s6929_s25, %s8107_s8 }
0x11cb   :  { %p6935_p9 = pnand %p6933_p8, %p6930_p7 }
0x11cd   :  { %6938 = shalt.err (!%p6935_p9)
}
0x11ce   :  { %5261 = dma.vmem_to_hbm [thread:$0]  %s5256_s6, 512, %s8107_s8, [#allocation4], %s6946_s15, %s6946_s15, %s6947_s16  }
0x11cf   :  { %6943 = dma.done.wait [#allocation4], 512  }
0x11d0   :  { %6944 = vsyncadd [#allocation4], 4294966784 }
0x11d1   :  { %5265 = vsyncpa [#allocation3], 1 }
0x11d2   :  { %5266 = vsyncpa [#allocation6], 1 }
0x11d3   :  { %5267 = vsyncpa [#allocation4], 1 }

</bundles_post_ra>
